<compile_context>
chip_gen: v7x
topology: tpu7x:2x2x1
jax: 0.10.0
libtpu: 0.0.40
codegen_flags: <defaults>
</compile_context>

<pallas_src>
import functools

import jax
import jax.numpy as jnp
from jax import lax
from jax.experimental import pallas as pl
from jax.experimental.pallas import tpu as pltpu


# -----------------------------------------------------------------------------
# Static-int helpers: strength-reduce div/mod by powers of two (the VPU has no
# integer divide; W/H are compile-time constants).
# -----------------------------------------------------------------------------
def _static_mod(v, m):
    if m & (m - 1) == 0:
        return jnp.bitwise_and(v, m - 1)
    return v % m


def _static_div(v, m):
    if m & (m - 1) == 0:
        return jnp.right_shift(v, m.bit_length() - 1)
    return v // m


# -----------------------------------------------------------------------------
# Kernel
# -----------------------------------------------------------------------------
def _bottleneck_kernel(x_ref,
                       w1_ref, s1_ref, b1_ref,
                       w2_ref, s2_ref, b2_ref,
                       w3_ref, s3_ref, b3_ref,
                       o_ref, *, H, W):
    """
    x_ref  : (M, Cin)    flattened pixels (M = batch_tile*H*W), compute dtype
    w1_ref : (Cin, P)    conv1 1x1 weights
    w2_ref : (9, P, P)   conv2 3x3 weights, tap-major ((kh*3 + kw), ci, co)
    w3_ref : (P, 4P)     conv3 1x1 weights
    s*/b*  : (1, C)      folded BatchNorm scale / shift (f32)
    o_ref  : (M, 4P)     output block
    """
    f32 = jnp.float32
    cdt = x_ref.dtype
    mblk = x_ref.shape[0]

    def shifted(v, d):
        # out[i] = v[(i + d) % mblk]; wrapped rows are zeroed by the tap masks.
        if d == 0:
            return v
        return pltpu.roll(v, shift=(-d) % mblk, axis=0)

    # ---- 3x3 tap validity masks, generated in-kernel (no HBM mask operands) --
    idx = lax.broadcasted_iota(jnp.int32, (mblk, 1), 0)
    w_idx = _static_mod(idx, W)
    h_idx = _static_mod(_static_div(idx, W), H)
    m_w = {-1: (w_idx >= 1).astype(f32), 0: None, 1: (w_idx <= W - 2).astype(f32)}
    m_h = {-1: (h_idx >= 1).astype(f32), 0: None, 1: (h_idx <= H - 2).astype(f32)}

    def tap_mask(kh, kw):
        mh, mw = m_h[kh], m_w[kw]
        if mh is None:
            return mw
        if mw is None:
            return mh
        return mh * mw

    # ---- conv1 (1x1) + bn1 + relu: one whole-block matmul -------------------
    # y1 stays f32: rolls (XLU) and BN/ReLU/mask math stay in f32; operands are
    # cast to the MXU compute dtype only at each matmul boundary.
    y1 = jnp.dot(x_ref[...], w1_ref[...], preferred_element_type=f32)
    y1 = jnp.maximum(y1 * s1_ref[...] + b1_ref[...], 0.0)            # (M, P) f32

    # ---- conv2 (3x3, pad=1, stride=1) + bn2 + relu ---------------------------
    # 9 accumulating per-tap matmuls: identical MXU FLOPs to the K=3P concat
    # form but never materializes (M,3P) temporaries and needs no lane-aligned
    # concatenation, so it works for any P.
    acc = jnp.dot(y1.astype(cdt), w2_ref[4], preferred_element_type=f32)  # centre
    for kh in (-1, 0, 1):
        for kw in (-1, 0, 1):
            if kh == 0 and kw == 0:
                continue
            v = shifted(y1, kh * W + kw).astype(cdt)
            t = jnp.dot(v, w2_ref[(kh + 1) * 3 + (kw + 1)],
                        preferred_element_type=f32)
            acc = acc + t * tap_mask(kh, kw)
    y2 = jnp.maximum(acc * s2_ref[...] + b2_ref[...], 0.0).astype(cdt)    # (M, P)

    # ---- conv3 (1x1) + bn3 + residual + relu: one lane-dense store -----------
    y3 = jnp.dot(y2, w3_ref[...], preferred_element_type=f32)
    y3 = y3 * s3_ref[...] + b3_ref[...]
    res = x_ref[...].astype(f32)        # re-read VMEM block; x not held live
    o_ref[...] = jnp.maximum(y3 + res, 0.0).astype(o_ref.dtype)


# -----------------------------------------------------------------------------
# Wrappers
# -----------------------------------------------------------------------------
def _pick_batch_tile(n, hw, *, sublane, min_rows=256, max_rows=2048):
    """Divisor of n giving a sublane-aligned block of ~[min_rows, max_rows]
    pixel rows, preferring >=2 grid steps (keeps v7x's 2nd TensorCore busy)."""
    best = None
    for bt in range(1, n + 1):
        if n % bt:
            continue
        rows = bt * hw
        aligned = (rows % sublane == 0) or (bt == n)
        key = (0 if aligned else 1,
               0 if rows <= max_rows else 1,
               0 if rows >= min_rows else 1,
               0 if (n // bt) >= 2 else 1,
               -rows if rows <= max_rows else rows)
        if best is None or key < best[1]:
            best = (bt, key)
    return best[0]


def _vmem_limit_bytes(mblk, cin, p, cout, in_bytes, out_bytes):
    """Weights + double-buffered I/O blocks + f32 intermediates, with headroom."""
    weights = (cin * p + 9 * p * p + p * cout) * in_bytes + 8 * (2 * p + cout)
    io = 2 * mblk * cin * in_bytes + 2 * mblk * cout * out_bytes
    inter = mblk * (p * 4 + p * in_bytes        # y1 (f32) + one rolled tap
                    + p * 4 + p * in_bytes      # f32 accumulator + y2
                    + cout * 4 + cin * 4        # f32 conv3 result + residual
                    + 6 * 4)                    # iota / masks
    est = weights + io + inter
    return int(min(max(2 * est, 24 << 20), 64 << 20))


def bottleneck_pallas_nhwc(x_nhwc, params, *, compute_dtype=jnp.bfloat16,
                           batch_tile=None, out_dtype=None):
    N, H, W, Cin = x_nhwc.shape
    P = params["w1"].shape[1]
    Cout = params["w3"].shape[1]
    assert Cin == Cout, "identity residual requires inplanes == planes * 4"

    hw = H * W
    sublane = 16 if jnp.dtype(compute_dtype).itemsize == 2 else 8
    bt = batch_tile if batch_tile is not None else _pick_batch_tile(
        N, hw, sublane=sublane)
    assert N % bt == 0
    mblk = bt * hw
    assert (mblk % 8 == 0) or (bt == N), (
        "block row count must be 8-aligned when the grid has more than 1 step")
    out_dtype = x_nhwc.dtype if out_dtype is None else out_dtype

    # Pixels on sublanes, channels on lanes; bf16 MXU operands.
    x_flat = x_nhwc.reshape(N * hw, Cin).astype(compute_dtype)

    w1 = params["w1"].astype(compute_dtype)                      # (Cin, P)
    w2 = params["w2"].reshape(9, P, P).astype(compute_dtype)     # tap-major
    w3 = params["w3"].astype(compute_dtype)                      # (P, 4P)

    in_b = jnp.dtype(compute_dtype).itemsize
    out_b = jnp.dtype(out_dtype).itemsize
    vmem_limit = _vmem_limit_bytes(mblk, Cin, P, Cout, in_b, out_b)

    row_spec = lambda c: pl.BlockSpec((mblk, c), lambda i: (i, 0))
    # Weights / BN params: whole-array VMEM residents, not double-buffered.
    vmem = pl.BlockSpec(memory_space=pltpu.MemorySpace.VMEM)

    out_flat = pl.pallas_call(
        functools.partial(_bottleneck_kernel, H=H, W=W),
        grid=(N // bt,),
        in_specs=[row_spec(Cin),
                  vmem, vmem, vmem,        # w1, s1, b1
                  vmem, vmem, vmem,        # w2, s2, b2
                  vmem, vmem, vmem],       # w3, s3, b3
        out_specs=row_spec(Cout),
        out_shape=jax.ShapeDtypeStruct((N * hw, Cout), out_dtype),
        compiler_params=pltpu.CompilerParams(
            dimension_semantics=("parallel",),
            vmem_limit_bytes=vmem_limit),
    )(x_flat,
      w1, params["s1"], params["b1"],
      w2, params["s2"], params["b2"],
      w3, params["s3"], params["b3"])

    return out_flat.reshape(N, H, W, Cout)


def bottleneck_pallas(x_nchw, params, **kw):
    # NCHW adapter matching the PyTorch module.  (Real deployments should keep
    # the surrounding model NHWC end-to-end to avoid these two transposes.)
    x = jnp.transpose(x_nchw, (0, 2, 3, 1))
    y = bottleneck_pallas_nhwc(x, params, **kw)
    return jnp.transpose(y, (0, 3, 1, 2))


# -----------------------------------------------------------------------------
# Deterministic parameter init (synthetic; matches the module's shapes)
# -----------------------------------------------------------------------------
def init_params(key, inplanes, planes):
    exp = 4
    eps = 1e-5
    ks = jax.random.split(key, 15)

    def bn_fold(kg, kb, km, kv, c):
        gamma = 1.0 + 0.1 * jax.random.normal(kg, (c,), jnp.float32)
        beta = 0.1 * jax.random.normal(kb, (c,), jnp.float32)
        mean = 0.1 * jax.random.normal(km, (c,), jnp.float32)
        var = jnp.abs(1.0 + 0.1 * jax.random.normal(kv, (c,), jnp.float32))
        scale = gamma * lax.rsqrt(var + eps)
        shift = beta - mean * scale
        return scale.reshape(1, c), shift.reshape(1, c)

    # PyTorch conv weights are OIHW; convert to the layouts the kernel expects.
    w1_oihw = 0.1 * jax.random.normal(ks[0], (planes, inplanes, 1, 1), jnp.float32)
    w2_oihw = 0.1 * jax.random.normal(ks[1], (planes, planes, 3, 3), jnp.float32)
    w3_oihw = 0.1 * jax.random.normal(ks[2], (planes * exp, planes, 1, 1), jnp.float32)

    w1 = jnp.transpose(w1_oihw[:, :, 0, 0], (1, 0))              # (Cin, P)
    w2 = jnp.transpose(w2_oihw, (2, 3, 1, 0))                    # HWIO (3,3,P,P)
    w3 = jnp.transpose(w3_oihw[:, :, 0, 0], (1, 0))              # (P, 4P)

    s1, b1 = bn_fold(ks[3], ks[4], ks[5], ks[6], planes)
    s2, b2 = bn_fold(ks[7], ks[8], ks[9], ks[10], planes)
    s3, b3 = bn_fold(ks[11], ks[12], ks[13], ks[14], planes * exp)

    return dict(w1=w1, s1=s1, b1=b1, w2=w2, s2=s2, b2=b2, w3=w3, s3=s3, b3=b3)


# -----------------------------------------------------------------------------
# Pure-JAX reference (lax.conv), mirroring the kernel's bf16 operand rounding
# -----------------------------------------------------------------------------
def bottleneck_ref(x_nchw, params, compute_dtype=jnp.bfloat16):
    f32 = jnp.float32
    dn = ("NHWC", "HWIO", "NHWC")

    def rnd(v):
        return v.astype(compute_dtype).astype(f32)

    def conv(v, w_hwio, pad):
        return lax.conv_general_dilated(rnd(v), rnd(w_hwio), (1, 1), pad,
                                        dimension_numbers=dn,
                                        precision=lax.Precision.HIGHEST)

    x = rnd(jnp.transpose(x_nchw, (0, 2, 3, 1)))                 # NHWC
    cin, p = params["w1"].shape
    cout = params["w3"].shape[1]
    w1 = params["w1"].reshape(1, 1, cin, p)
    w3 = params["w3"].reshape(1, 1, p, cout)

    y = conv(x, w1, "VALID")
    y = jnp.maximum(y * params["s1"] + params["b1"], 0.0)
    y = conv(y, params["w2"], ((1, 1), (1, 1)))
    y = jnp.maximum(y * params["s2"] + params["b2"], 0.0)
    y = conv(y, w3, "VALID")
    y = y * params["s3"] + params["b3"]
    y = jnp.maximum(y + x, 0.0)
    return jnp.transpose(y, (0, 3, 1, 2))


if __name__ == "__main__":
    key = jax.random.PRNGKey(0)
    kx, kp = jax.random.split(key)

    N, planes, H, W = 2, 8, 16, 16
    inplanes = planes * 4                                        # identity residual

    x = jax.random.normal(kx, (N, inplanes, H, W), jnp.float32)  # NCHW like PyTorch
    params = init_params(kp, inplanes, planes)

    out = jax.block_until_ready(bottleneck_pallas(x, params))
    ref = bottleneck_ref(x, params)

    assert out.shape == (N, inplanes, H, W), out.shape
    err = float(jnp.max(jnp.abs(out - ref)))
    assert jnp.allclose(out, ref, rtol=1e-2, atol=1e-2), f"max abs err = {err}"
    print("KERNEL_OK")
</pallas_src>

<mosaic_0001>
module attributes {stable_mosaic.version = 11 : i64} {
  func.func @_bottleneck_kernel(%arg0: i32, %arg1: memref<256x32xbf16, #tpu.memory_space<vmem>>, %arg2: memref<32x8xbf16, #tpu.memory_space<vmem>>, %arg3: memref<1x8xf32, #tpu.memory_space<vmem>>, %arg4: memref<1x8xf32, #tpu.memory_space<vmem>>, %arg5: memref<9x8x8xbf16, #tpu.memory_space<vmem>>, %arg6: memref<1x8xf32, #tpu.memory_space<vmem>>, %arg7: memref<1x8xf32, #tpu.memory_space<vmem>>, %arg8: memref<8x32xbf16, #tpu.memory_space<vmem>>, %arg9: memref<1x32xf32, #tpu.memory_space<vmem>>, %arg10: memref<1x32xf32, #tpu.memory_space<vmem>>, %arg11: memref<256x32xf32, #tpu.memory_space<vmem>>) attributes {dimension_semantics = [#tpu.dimension_semantics<parallel>], iteration_bounds = array<i64: 2>, scalar_prefetch = 0 : i64, scratch_operands = 0 : i64, tpu.core_type = #tpu.core_type<tc>, window_params = [{transform_indices = @transform_0, window_bounds = array<i64: 256, 32>}, {pipeline_mode = #tpu.pipeline_mode<synchronous>, transform_indices = @transform_1, window_bounds = array<i64: 32, 8>}, {pipeline_mode = #tpu.pipeline_mode<synchronous>, transform_indices = @transform_2, window_bounds = array<i64: 1, 8>}, {pipeline_mode = #tpu.pipeline_mode<synchronous>, transform_indices = @transform_3, window_bounds = array<i64: 1, 8>}, {pipeline_mode = #tpu.pipeline_mode<synchronous>, transform_indices = @transform_4, window_bounds = array<i64: 9, 8, 8>}, {pipeline_mode = #tpu.pipeline_mode<synchronous>, transform_indices = @transform_5, window_bounds = array<i64: 1, 8>}, {pipeline_mode = #tpu.pipeline_mode<synchronous>, transform_indices = @transform_6, window_bounds = array<i64: 1, 8>}, {pipeline_mode = #tpu.pipeline_mode<synchronous>, transform_indices = @transform_7, window_bounds = array<i64: 8, 32>}, {pipeline_mode = #tpu.pipeline_mode<synchronous>, transform_indices = @transform_8, window_bounds = array<i64: 1, 32>}, {pipeline_mode = #tpu.pipeline_mode<synchronous>, transform_indices = @transform_9, window_bounds = array<i64: 1, 32>}, {transform_indices = @transform_10, window_bounds = array<i64: 256, 32>}]} {
    %0 = tpu.iota {dimensions = array<i32: 0>} : vector<256x1xi32>
    %c15_i32 = arith.constant 15 : i32
    %1 = vector.broadcast %c15_i32 : i32 to vector<256x1xi32>
    %2 = arith.andi %0, %1 : vector<256x1xi32>
    %c4_i32 = arith.constant 4 : i32
    %3 = vector.broadcast %c4_i32 : i32 to vector<256x1xi32>
    %4 = arith.shrsi %0, %3 : vector<256x1xi32>
    %c15_i32_0 = arith.constant 15 : i32
    %5 = vector.broadcast %c15_i32_0 : i32 to vector<256x1xi32>
    %6 = arith.andi %4, %5 : vector<256x1xi32>
    %c1_i32 = arith.constant 1 : i32
    %7 = vector.broadcast %c1_i32 : i32 to vector<256x1xi32>
    %8 = arith.cmpi sge, %2, %7 : vector<256x1xi32>
    %9 = arith.extui %8 : vector<256x1xi1> to vector<256x1xi32>
    %10 = arith.sitofp %9 : vector<256x1xi32> to vector<256x1xf32>
    %c14_i32 = arith.constant 14 : i32
    %11 = vector.broadcast %c14_i32 : i32 to vector<256x1xi32>
    %12 = arith.cmpi sle, %2, %11 : vector<256x1xi32>
    %13 = arith.extui %12 : vector<256x1xi1> to vector<256x1xi32>
    %14 = arith.sitofp %13 : vector<256x1xi32> to vector<256x1xf32>
    %c1_i32_1 = arith.constant 1 : i32
    %15 = vector.broadcast %c1_i32_1 : i32 to vector<256x1xi32>
    %16 = arith.cmpi sge, %6, %15 : vector<256x1xi32>
    %17 = arith.extui %16 : vector<256x1xi1> to vector<256x1xi32>
    %18 = arith.sitofp %17 : vector<256x1xi32> to vector<256x1xf32>
    %c14_i32_2 = arith.constant 14 : i32
    %19 = vector.broadcast %c14_i32_2 : i32 to vector<256x1xi32>
    %20 = arith.cmpi sle, %6, %19 : vector<256x1xi32>
    %21 = arith.extui %20 : vector<256x1xi1> to vector<256x1xi32>
    %22 = arith.sitofp %21 : vector<256x1xi32> to vector<256x1xf32>
    %c0 = arith.constant 0 : index
    %c0_3 = arith.constant 0 : index
    %23 = vector.load %arg1[%c0, %c0_3] : memref<256x32xbf16, #tpu.memory_space<vmem>>, vector<256x32xbf16>
    %c0_4 = arith.constant 0 : index
    %c0_5 = arith.constant 0 : index
    %24 = vector.load %arg2[%c0_4, %c0_5] : memref<32x8xbf16, #tpu.memory_space<vmem>>, vector<32x8xbf16>
    %cst = arith.constant dense<0.000000e+00> : vector<256x8xf32>
    %25 = tpu.matmul %23, %24, %cst {dimension_numbers = #tpu.dot_dimension_numbers<[1], [0], [0], [1], [0, 0, 1, 1], [], []>} : vector<256x32xbf16>, vector<32x8xbf16>, vector<256x8xf32> -> vector<256x8xf32>
    %c0_6 = arith.constant 0 : index
    %c0_7 = arith.constant 0 : index
    %26 = vector.load %arg3[%c0_6, %c0_7] : memref<1x8xf32, #tpu.memory_space<vmem>>, vector<1x8xf32>
    %27 = vector.broadcast %26 : vector<1x8xf32> to vector<256x8xf32>
    %28 = arith.mulf %25, %27 : vector<256x8xf32>
    %c0_8 = arith.constant 0 : index
    %c0_9 = arith.constant 0 : index
    %29 = vector.load %arg4[%c0_8, %c0_9] : memref<1x8xf32, #tpu.memory_space<vmem>>, vector<1x8xf32>
    %30 = vector.broadcast %29 : vector<1x8xf32> to vector<256x8xf32>
    %31 = arith.addf %28, %30 : vector<256x8xf32>
    %cst_10 = arith.constant 0.000000e+00 : f32
    %32 = vector.broadcast %cst_10 : f32 to vector<256x8xf32>
    %33 = arith.maximumf %31, %32 : vector<256x8xf32>
    %34 = arith.truncf %33 : vector<256x8xf32> to vector<256x8xbf16>
    %c4 = arith.constant 4 : index
    %c0_11 = arith.constant 0 : index
    %c0_12 = arith.constant 0 : index
    %35 = vector.load %arg5[%c4, %c0_11, %c0_12] : memref<9x8x8xbf16, #tpu.memory_space<vmem>>, vector<1x8x8xbf16>
    %36 = vector.shape_cast %35 : vector<1x8x8xbf16> to vector<8x8xbf16>
    %cst_13 = arith.constant dense<0.000000e+00> : vector<256x8xf32>
    %37 = tpu.matmul %34, %36, %cst_13 {dimension_numbers = #tpu.dot_dimension_numbers<[1], [0], [0], [1], [0, 0, 1, 1], [], []>} : vector<256x8xbf16>, vector<8x8xbf16>, vector<256x8xf32> -> vector<256x8xf32>
    %c17_i32 = arith.constant 17 : i32
    %38 = tpu.dynamic_rotate %33 by %c17_i32 dim 0 : vector<256x8xf32>, i32 -> vector<256x8xf32>
    %39 = arith.truncf %38 : vector<256x8xf32> to vector<256x8xbf16>
    %c0_14 = arith.constant 0 : index
    %c0_15 = arith.constant 0 : index
    %c0_16 = arith.constant 0 : index
    %40 = vector.load %arg5[%c0_14, %c0_15, %c0_16] : memref<9x8x8xbf16, #tpu.memory_space<vmem>>, vector<1x8x8xbf16>
    %41 = vector.shape_cast %40 : vector<1x8x8xbf16> to vector<8x8xbf16>
    %cst_17 = arith.constant dense<0.000000e+00> : vector<256x8xf32>
    %42 = tpu.matmul %39, %41, %cst_17 {dimension_numbers = #tpu.dot_dimension_numbers<[1], [0], [0], [1], [0, 0, 1, 1], [], []>} : vector<256x8xbf16>, vector<8x8xbf16>, vector<256x8xf32> -> vector<256x8xf32>
    %43 = arith.mulf %18, %10 : vector<256x1xf32>
    %44 = vector.broadcast %43 : vector<256x1xf32> to vector<256x8xf32>
    %45 = arith.mulf %42, %44 : vector<256x8xf32>
    %46 = arith.addf %37, %45 : vector<256x8xf32>
    %c16_i32 = arith.constant 16 : i32
    %47 = tpu.dynamic_rotate %33 by %c16_i32 dim 0 : vector<256x8xf32>, i32 -> vector<256x8xf32>
    %48 = arith.truncf %47 : vector<256x8xf32> to vector<256x8xbf16>
    %c1 = arith.constant 1 : index
    %c0_18 = arith.constant 0 : index
    %c0_19 = arith.constant 0 : index
    %49 = vector.load %arg5[%c1, %c0_18, %c0_19] : memref<9x8x8xbf16, #tpu.memory_space<vmem>>, vector<1x8x8xbf16>
    %50 = vector.shape_cast %49 : vector<1x8x8xbf16> to vector<8x8xbf16>
    %cst_20 = arith.constant dense<0.000000e+00> : vector<256x8xf32>
    %51 = tpu.matmul %48, %50, %cst_20 {dimension_numbers = #tpu.dot_dimension_numbers<[1], [0], [0], [1], [0, 0, 1, 1], [], []>} : vector<256x8xbf16>, vector<8x8xbf16>, vector<256x8xf32> -> vector<256x8xf32>
    %52 = vector.broadcast %18 : vector<256x1xf32> to vector<256x8xf32>
    %53 = arith.mulf %51, %52 : vector<256x8xf32>
    %54 = arith.addf %46, %53 : vector<256x8xf32>
    %c15_i32_21 = arith.constant 15 : i32
    %55 = tpu.dynamic_rotate %33 by %c15_i32_21 dim 0 : vector<256x8xf32>, i32 -> vector<256x8xf32>
    %56 = arith.truncf %55 : vector<256x8xf32> to vector<256x8xbf16>
    %c2 = arith.constant 2 : index
    %c0_22 = arith.constant 0 : index
    %c0_23 = arith.constant 0 : index
    %57 = vector.load %arg5[%c2, %c0_22, %c0_23] : memref<9x8x8xbf16, #tpu.memory_space<vmem>>, vector<1x8x8xbf16>
    %58 = vector.shape_cast %57 : vector<1x8x8xbf16> to vector<8x8xbf16>
    %cst_24 = arith.constant dense<0.000000e+00> : vector<256x8xf32>
    %59 = tpu.matmul %56, %58, %cst_24 {dimension_numbers = #tpu.dot_dimension_numbers<[1], [0], [0], [1], [0, 0, 1, 1], [], []>} : vector<256x8xbf16>, vector<8x8xbf16>, vector<256x8xf32> -> vector<256x8xf32>
    %60 = arith.mulf %18, %14 : vector<256x1xf32>
    %61 = vector.broadcast %60 : vector<256x1xf32> to vector<256x8xf32>
    %62 = arith.mulf %59, %61 : vector<256x8xf32>
    %63 = arith.addf %54, %62 : vector<256x8xf32>
    %c1_i32_25 = arith.constant 1 : i32
    %64 = tpu.dynamic_rotate %33 by %c1_i32_25 dim 0 : vector<256x8xf32>, i32 -> vector<256x8xf32>
    %65 = arith.truncf %64 : vector<256x8xf32> to vector<256x8xbf16>
    %c3 = arith.constant 3 : index
    %c0_26 = arith.constant 0 : index
    %c0_27 = arith.constant 0 : index
    %66 = vector.load %arg5[%c3, %c0_26, %c0_27] : memref<9x8x8xbf16, #tpu.memory_space<vmem>>, vector<1x8x8xbf16>
    %67 = vector.shape_cast %66 : vector<1x8x8xbf16> to vector<8x8xbf16>
    %cst_28 = arith.constant dense<0.000000e+00> : vector<256x8xf32>
    %68 = tpu.matmul %65, %67, %cst_28 {dimension_numbers = #tpu.dot_dimension_numbers<[1], [0], [0], [1], [0, 0, 1, 1], [], []>} : vector<256x8xbf16>, vector<8x8xbf16>, vector<256x8xf32> -> vector<256x8xf32>
    %69 = vector.broadcast %10 : vector<256x1xf32> to vector<256x8xf32>
    %70 = arith.mulf %68, %69 : vector<256x8xf32>
    %71 = arith.addf %63, %70 : vector<256x8xf32>
    %c255_i32 = arith.constant 255 : i32
    %72 = tpu.dynamic_rotate %33 by %c255_i32 dim 0 : vector<256x8xf32>, i32 -> vector<256x8xf32>
    %73 = arith.truncf %72 : vector<256x8xf32> to vector<256x8xbf16>
    %c5 = arith.constant 5 : index
    %c0_29 = arith.constant 0 : index
    %c0_30 = arith.constant 0 : index
    %74 = vector.load %arg5[%c5, %c0_29, %c0_30] : memref<9x8x8xbf16, #tpu.memory_space<vmem>>, vector<1x8x8xbf16>
    %75 = vector.shape_cast %74 : vector<1x8x8xbf16> to vector<8x8xbf16>
    %cst_31 = arith.constant dense<0.000000e+00> : vector<256x8xf32>
    %76 = tpu.matmul %73, %75, %cst_31 {dimension_numbers = #tpu.dot_dimension_numbers<[1], [0], [0], [1], [0, 0, 1, 1], [], []>} : vector<256x8xbf16>, vector<8x8xbf16>, vector<256x8xf32> -> vector<256x8xf32>
    %77 = vector.broadcast %14 : vector<256x1xf32> to vector<256x8xf32>
    %78 = arith.mulf %76, %77 : vector<256x8xf32>
    %79 = arith.addf %71, %78 : vector<256x8xf32>
    %c241_i32 = arith.constant 241 : i32
    %80 = tpu.dynamic_rotate %33 by %c241_i32 dim 0 : vector<256x8xf32>, i32 -> vector<256x8xf32>
    %81 = arith.truncf %80 : vector<256x8xf32> to vector<256x8xbf16>
    %c6 = arith.constant 6 : index
    %c0_32 = arith.constant 0 : index
    %c0_33 = arith.constant 0 : index
    %82 = vector.load %arg5[%c6, %c0_32, %c0_33] : memref<9x8x8xbf16, #tpu.memory_space<vmem>>, vector<1x8x8xbf16>
    %83 = vector.shape_cast %82 : vector<1x8x8xbf16> to vector<8x8xbf16>
    %cst_34 = arith.constant dense<0.000000e+00> : vector<256x8xf32>
    %84 = tpu.matmul %81, %83, %cst_34 {dimension_numbers = #tpu.dot_dimension_numbers<[1], [0], [0], [1], [0, 0, 1, 1], [], []>} : vector<256x8xbf16>, vector<8x8xbf16>, vector<256x8xf32> -> vector<256x8xf32>
    %85 = arith.mulf %22, %10 : vector<256x1xf32>
    %86 = vector.broadcast %85 : vector<256x1xf32> to vector<256x8xf32>
    %87 = arith.mulf %84, %86 : vector<256x8xf32>
    %88 = arith.addf %79, %87 : vector<256x8xf32>
    %c240_i32 = arith.constant 240 : i32
    %89 = tpu.dynamic_rotate %33 by %c240_i32 dim 0 : vector<256x8xf32>, i32 -> vector<256x8xf32>
    %90 = arith.truncf %89 : vector<256x8xf32> to vector<256x8xbf16>
    %c7 = arith.constant 7 : index
    %c0_35 = arith.constant 0 : index
    %c0_36 = arith.constant 0 : index
    %91 = vector.load %arg5[%c7, %c0_35, %c0_36] : memref<9x8x8xbf16, #tpu.memory_space<vmem>>, vector<1x8x8xbf16>
    %92 = vector.shape_cast %91 : vector<1x8x8xbf16> to vector<8x8xbf16>
    %cst_37 = arith.constant dense<0.000000e+00> : vector<256x8xf32>
    %93 = tpu.matmul %90, %92, %cst_37 {dimension_numbers = #tpu.dot_dimension_numbers<[1], [0], [0], [1], [0, 0, 1, 1], [], []>} : vector<256x8xbf16>, vector<8x8xbf16>, vector<256x8xf32> -> vector<256x8xf32>
    %94 = vector.broadcast %22 : vector<256x1xf32> to vector<256x8xf32>
    %95 = arith.mulf %93, %94 : vector<256x8xf32>
    %96 = arith.addf %88, %95 : vector<256x8xf32>
    %c239_i32 = arith.constant 239 : i32
    %97 = tpu.dynamic_rotate %33 by %c239_i32 dim 0 : vector<256x8xf32>, i32 -> vector<256x8xf32>
    %98 = arith.truncf %97 : vector<256x8xf32> to vector<256x8xbf16>
    %c8 = arith.constant 8 : index
    %c0_38 = arith.constant 0 : index
    %c0_39 = arith.constant 0 : index
    %99 = vector.load %arg5[%c8, %c0_38, %c0_39] : memref<9x8x8xbf16, #tpu.memory_space<vmem>>, vector<1x8x8xbf16>
    %100 = vector.shape_cast %99 : vector<1x8x8xbf16> to vector<8x8xbf16>
    %cst_40 = arith.constant dense<0.000000e+00> : vector<256x8xf32>
    %101 = tpu.matmul %98, %100, %cst_40 {dimension_numbers = #tpu.dot_dimension_numbers<[1], [0], [0], [1], [0, 0, 1, 1], [], []>} : vector<256x8xbf16>, vector<8x8xbf16>, vector<256x8xf32> -> vector<256x8xf32>
    %102 = arith.mulf %22, %14 : vector<256x1xf32>
    %103 = vector.broadcast %102 : vector<256x1xf32> to vector<256x8xf32>
    %104 = arith.mulf %101, %103 : vector<256x8xf32>
    %105 = arith.addf %96, %104 : vector<256x8xf32>
    %c0_41 = arith.constant 0 : index
    %c0_42 = arith.constant 0 : index
    %106 = vector.load %arg6[%c0_41, %c0_42] : memref<1x8xf32, #tpu.memory_space<vmem>>, vector<1x8xf32>
    %107 = vector.broadcast %106 : vector<1x8xf32> to vector<256x8xf32>
    %108 = arith.mulf %105, %107 : vector<256x8xf32>
    %c0_43 = arith.constant 0 : index
    %c0_44 = arith.constant 0 : index
    %109 = vector.load %arg7[%c0_43, %c0_44] : memref<1x8xf32, #tpu.memory_space<vmem>>, vector<1x8xf32>
    %110 = vector.broadcast %109 : vector<1x8xf32> to vector<256x8xf32>
    %111 = arith.addf %108, %110 : vector<256x8xf32>
    %cst_45 = arith.constant 0.000000e+00 : f32
    %112 = vector.broadcast %cst_45 : f32 to vector<256x8xf32>
    %113 = arith.maximumf %111, %112 : vector<256x8xf32>
    %114 = arith.truncf %113 : vector<256x8xf32> to vector<256x8xbf16>
    %c0_46 = arith.constant 0 : index
    %c0_47 = arith.constant 0 : index
    %115 = vector.load %arg8[%c0_46, %c0_47] : memref<8x32xbf16, #tpu.memory_space<vmem>>, vector<8x32xbf16>
    %cst_48 = arith.constant dense<0.000000e+00> : vector<256x32xf32>
    %116 = tpu.matmul %114, %115, %cst_48 {dimension_numbers = #tpu.dot_dimension_numbers<[1], [0], [0], [1], [0, 0, 1, 1], [], []>} : vector<256x8xbf16>, vector<8x32xbf16>, vector<256x32xf32> -> vector<256x32xf32>
    %c0_49 = arith.constant 0 : index
    %c0_50 = arith.constant 0 : index
    %117 = vector.load %arg9[%c0_49, %c0_50] : memref<1x32xf32, #tpu.memory_space<vmem>>, vector<1x32xf32>
    %118 = vector.broadcast %117 : vector<1x32xf32> to vector<256x32xf32>
    %119 = arith.mulf %116, %118 : vector<256x32xf32>
    %c0_51 = arith.constant 0 : index
    %c0_52 = arith.constant 0 : index
    %120 = vector.load %arg10[%c0_51, %c0_52] : memref<1x32xf32, #tpu.memory_space<vmem>>, vector<1x32xf32>
    %121 = vector.broadcast %120 : vector<1x32xf32> to vector<256x32xf32>
    %122 = arith.addf %119, %121 : vector<256x32xf32>
    %c0_53 = arith.constant 0 : index
    %c0_54 = arith.constant 0 : index
    %123 = vector.load %arg1[%c0_53, %c0_54] : memref<256x32xbf16, #tpu.memory_space<vmem>>, vector<256x32xbf16>
    %124 = arith.extf %123 : vector<256x32xbf16> to vector<256x32xf32>
    %125 = arith.addf %122, %124 : vector<256x32xf32>
    %cst_55 = arith.constant 0.000000e+00 : f32
    %126 = vector.broadcast %cst_55 : f32 to vector<256x32xf32>
    %127 = arith.maximumf %125, %126 : vector<256x32xf32>
    %c0_56 = arith.constant 0 : index
    %c0_57 = arith.constant 0 : index
    %128 = vector.load %arg11[%c0_56, %c0_57] : memref<256x32xf32, #tpu.memory_space<vmem>>, vector<256x32xf32>
    tpu.vector_store %arg11[%c0_56, %c0_57], %127 {strides = array<i32>} : memref<256x32xf32, #tpu.memory_space<vmem>>, vector<256x32xf32>,
    return
  }
  func.func @transform_0(%arg0: i32) -> (i32, i32) {
    %c0_i32 = arith.constant 0 : i32
    %c0_i32_0 = arith.constant 0 : i32
    return %arg0, %c0_i32 : i32, i32
  }
  func.func @transform_1(%arg0: i32) -> (i32, i32) {
    %c0_i32 = arith.constant 0 : i32
    %c0_i32_0 = arith.constant 0 : i32
    %c0_i32_1 = arith.constant 0 : i32
    return %c0_i32, %c0_i32_0 : i32, i32
  }
  func.func @transform_2(%arg0: i32) -> (i32, i32) {
    %c0_i32 = arith.constant 0 : i32
    %c0_i32_0 = arith.constant 0 : i32
    %c0_i32_1 = arith.constant 0 : i32
    return %c0_i32, %c0_i32_0 : i32, i32
  }
  func.func @transform_3(%arg0: i32) -> (i32, i32) {
    %c0_i32 = arith.constant 0 : i32
    %c0_i32_0 = arith.constant 0 : i32
    %c0_i32_1 = arith.constant 0 : i32
    return %c0_i32, %c0_i32_0 : i32, i32
  }
  func.func @transform_4(%arg0: i32) -> (i32, i32, i32) {
    %c0_i32 = arith.constant 0 : i32
    %c0_i32_0 = arith.constant 0 : i32
    %c0_i32_1 = arith.constant 0 : i32
    %c0_i32_2 = arith.constant 0 : i32
    return %c0_i32, %c0_i32_0, %c0_i32_1 : i32, i32, i32
  }
  func.func @transform_5(%arg0: i32) -> (i32, i32) {
    %c0_i32 = arith.constant 0 : i32
    %c0_i32_0 = arith.constant 0 : i32
    %c0_i32_1 = arith.constant 0 : i32
    return %c0_i32, %c0_i32_0 : i32, i32
  }
  func.func @transform_6(%arg0: i32) -> (i32, i32) {
    %c0_i32 = arith.constant 0 : i32
    %c0_i32_0 = arith.constant 0 : i32
    %c0_i32_1 = arith.constant 0 : i32
    return %c0_i32, %c0_i32_0 : i32, i32
  }
  func.func @transform_7(%arg0: i32) -> (i32, i32) {
    %c0_i32 = arith.constant 0 : i32
    %c0_i32_0 = arith.constant 0 : i32
    %c0_i32_1 = arith.constant 0 : i32
    return %c0_i32, %c0_i32_0 : i32, i32
  }
  func.func @transform_8(%arg0: i32) -> (i32, i32) {
    %c0_i32 = arith.constant 0 : i32
    %c0_i32_0 = arith.constant 0 : i32
    %c0_i32_1 = arith.constant 0 : i32
    return %c0_i32, %c0_i32_0 : i32, i32
  }
  func.func @transform_9(%arg0: i32) -> (i32, i32) {
    %c0_i32 = arith.constant 0 : i32
    %c0_i32_0 = arith.constant 0 : i32
    %c0_i32_1 = arith.constant 0 : i32
    return %c0_i32, %c0_i32_0 : i32, i32
  }
  func.func @transform_10(%arg0: i32) -> (i32, i32) {
    %c0_i32 = arith.constant 0 : i32
    %c0_i32_0 = arith.constant 0 : i32
    return %arg0, %c0_i32 : i32, i32
  }
}

</mosaic_0001>

<bundles_post_ra>
// kernel: tpu_custom_call.1
= control target key start
LH: loop header
LB: loop body
LE: loop exit
PB: predicated region body
PF: predicated region fallthrough
CT: control target
= control target key end

     0   :  { %s5366_s13 = smov 0   ;;  %s8141_s0 = inlined_call_operand.vmem [shape: bf16[512,32], index: 0, kind: input, shape index: {}]   ;;  %s8142_s1 = inlined_call_operand.vmem [shape: bf16[32,8], index: 1, kind: input, shape index: {}]   ;;  %s8143_s2 = inlined_call_operand.vmem [shape: f32[1,8], index: 2, kind: input, shape index: {}]   ;;  %s8144_s3 = inlined_call_operand.vmem [shape: f32[1,8], index: 3, kind: input, shape index: {}]   ;;  %s8145_s4 = inlined_call_operand.vmem [shape: bf16[9,8,8], index: 4, kind: input, shape index: {}]   ;;  %s8146_s5 = inlined_call_operand.vmem [shape: f32[1,8], index: 5, kind: input, shape index: {}]   ;;  %s8147_s6 = inlined_call_operand.vmem [shape: f32[1,8], index: 6, kind: input, shape index: {}]   ;;  %s8148_s7 = inlined_call_operand.vmem [shape: bf16[8,32], index: 7, kind: input, shape index: {}]   ;;  %s8149_s8 = inlined_call_operand.vmem [shape: f32[1,32], index: 8, kind: input, shape index: {}]   ;;  %s8150_s9 = inlined_call_operand.vmem [shape: f32[1,32], index: 9, kind: input, shape index: {}]   ;;  %s8151_s10 = inlined_call_operand.vmem [shape: f32[512,32], index: 10, kind: output, shape index: {}]  }
   0x1 LB: > { %s4351_s14 = sadd.s32 4294967295, %s5308_s13   ;;  %p4355_p0 = scmp.ge.s32.totalorder %s5308_s13, 1  ;;  %s5308_s13 = sphi %s5366_s13, %s20_s13  }
   0x2   : > { %p313_p1 = scmp.lt.s32.totalorder %s5308_s13, 3 }
   0x4   : > { %p314_p2 = pnand %p4355_p0, %p313_p1 }
   0x6   : > { %317 = sbr.rel (%p314_p2) target bundleno = 1033 (0x409), region = 60 }
   0xd   : > { %v5252_v0 = vld [vmem:[%s8142_s1] sm:$0xff]   ;;  %s4356_s17 = sshll.u32 %s4351_s14, 5  ;;  %v5253_v1 = vld [vmem:[%s8142_s1 + $0x8] sm:$0xff]   ;;  %vm1005_vm0 = vcmask 261120   ;;  %vm1474_vm1 = vcmask 1043456   ;;  %v364_v23 = vlaneseq  ;;  %vm1425_vm4 = vcmask 64512  }
   0xe   : > { %p352_p3 = scmp.lt.s32.totalorder %s4356_s17, 63  ;;  %4854 = vmatprep.subr.bf16.mxu0 %v5252_v0  ;;  %v1424_v18 = vld [vmem:[%s8145_s4] sm:$0xf]  ;;  %v4492_v20 = vld [vmem:[%s8145_s4 + $0x10] sm:$0xf] }
   0xf   : > { %4855 = vmatpush3.bf16.msra.mxu0 %v5252_v0  ;;  %5233 = vmatprep.subr.msk.bf16.mxu1 %vm1474_vm1, %v1424_v18  ;;  %v1476_v19 = vsel %vm1474_vm1, %v1424_v18, 0  ;;  %v5433_v21 = vld [vmem:[%s8145_s4 + $0x4] sm:$0xf]  ;;  %v5440_v22 = vld [vmem:[%s8143_s2] ss:$0 sm:$0xff]  ;;  %v5451_v32 = vshrl.u32 %v364_v23, 7 }
  0x10   : > { %s8737_s17 = smov (!%p352_p3, %s4356_s17), 63  ;;  %4856 = vmatprep.subr.bf16.mxu0 %v5253_v1  ;;  %5231 = vmatpush3.bf16.msra.mxu1 %v1476_v19  ;;  %v5445_v25 = vld [vmem:[%s8144_s3] ss:$0 sm:$0xff] }
  0x11   : > { %s4357_s20 = sshll.u32 %s8737_s17, 2  ;;  %5234 = vmatprep.subr.msk.bf16.mxu1 %vm1474_vm1, %v4492_v20  ;;  %vm1375_vm2 = vcmp.lt.s32.totalorder %v5451_v32, 1  ;;  %vm2177_vm3 = vcmp.lt.s32.totalorder %v5451_v32, 7  ;;  %s4359_s21 = sshll.u32 %s8737_s17, 3 }
  0x12   : > { %s5386_s23 = scalar_lea.vmem %s8141_s0, %s4357_s20  ;;  %s8001_s25 = scalar_lea.vmem %s8151_s10, %s4359_s21 }
  0x13   : > { %4857 = vmatpush3.bf16.msra.mxu0 %v5253_v1  ;;  %v877_v2 = vld [vmem:[%s5386_s23] sm:$0xff]   ;;  %v879_v3 = vld [vmem:[%s5386_s23 + $0x8] sm:$0xff]   ;;  %v881_v4 = vld [vmem:[%s5386_s23 + $0x10] sm:$0xff]  }
  0x14   : > { %4858 = vmatprep.mubr.msk.bf16.mxu0 %vm1005_vm0, %v877_v2  ;;  %v883_v5 = vld [vmem:[%s5386_s23 + $0x18] sm:$0xff]   ;;  %v885_v6 = vld [vmem:[%s5386_s23 + $0x20] sm:$0xff]   ;;  %v887_v7 = vld [vmem:[%s5386_s23 + $0x28] sm:$0xff]   ;;  %5232 = vmatprep.subr.msk.bf16.mxu0 %vm1474_vm1, %v1424_v18 }
  0x15   : > { %v889_v8 = vld [vmem:[%s5386_s23 + $0x30] sm:$0xff]   ;;  %v891_v9 = vld [vmem:[%s5386_s23 + $0x38] sm:$0xff]   ;;  %v893_v10 = vld [vmem:[%s5386_s23 + $0x40] sm:$0xff]  }
  0x16   : > { %4859 = vmatmul.mubr.msk.bf16.vlgmr.msra.gmra.mrb[0].mxu0 %vm1005_vm0, %v879_v3  ;;  %v895_v11 = vld [vmem:[%s5386_s23 + $0x48] sm:$0xff]   ;;  %v897_v12 = vld [vmem:[%s5386_s23 + $0x50] sm:$0xff]   ;;  %v899_v13 = vld [vmem:[%s5386_s23 + $0x58] sm:$0xff]  }
  0x17   : > { %4862 = vmatprep.mubr.msk.bf16.mxu0 %vm1005_vm0, %v881_v4  ;;  %v901_v14 = vld [vmem:[%s5386_s23 + $0x60] sm:$0xff]   ;;  %v903_v15 = vld [vmem:[%s5386_s23 + $0x68] sm:$0xff]   ;;  %v905_v16 = vld [vmem:[%s5386_s23 + $0x70] sm:$0xff]   ;;  %4891 = vmatpush3.bf16.msra.mxu0 %v1476_v19 }
  0x18   : > { %v907_v17 = vld [vmem:[%s5386_s23 + $0x78] sm:$0xff]   ;;  %5235 = vmatprep.subr.msk.bf16.mxu0 %vm1474_vm1, %v5433_v21 }
  0x1e   : > { %4863 = vmatmul.mubr.msk.bf16.gmra.mrb[4].mxu0 %vm1005_vm0, %v883_v5 }
  0x1f   : > { %4866 = vmatprep.mubr.msk.bf16.mxu0 %vm1005_vm0, %v885_v6 }
  0x26   : > { %4867 = vmatmul.mubr.msk.bf16.gmra.mrb[8].mxu0 %vm1005_vm0, %v887_v7 }
  0x27   : > { %4870 = vmatprep.mubr.msk.bf16.mxu0 %vm1005_vm0, %v889_v8 }
  0x2e   : > { %4871 = vmatmul.mubr.msk.bf16.gmra.mrb[12].mxu0 %vm1005_vm0, %v891_v9 }
  0x2f   : > { %4874 = vmatprep.mubr.msk.bf16.mxu0 %vm1005_vm0, %v893_v10  ;;  %v5503_v10 = vsel %vm1474_vm1, %v4492_v20, 0 }
  0x36   : > { %4875 = vmatmul.mubr.msk.bf16.gmra.mrb[16].mxu0 %vm1005_vm0, %v895_v11 }
  0x37   : > { %4878 = vmatprep.mubr.msk.bf16.mxu0 %vm1005_vm0, %v897_v12 }
  0x3e   : > { %4879 = vmatmul.mubr.msk.bf16.gmra.mrb[20].mxu0 %vm1005_vm0, %v899_v13 }
  0x3f   : > { %4882 = vmatprep.mubr.msk.bf16.mxu0 %vm1005_vm0, %v901_v14 }
  0x46   : > { %4883 = vmatmul.mubr.msk.bf16.gmra.mrb[24].mxu0 %vm1005_vm0, %v903_v15 }
  0x47   : > { %4886 = vmatprep.mubr.msk.bf16.mxu0 %vm1005_vm0, %v905_v16 }
  0x4e   : > { %4887 = vmatmul.mubr.msk.bf16.gmra.mrb[28].mxu0 %vm1005_vm0, %v907_v17 }
  0xe9   : > { %v4860_v24 = vpop.f32.mrb[0].mxu0 }
  0xea   : > { %v1224_v26 = vmul.f32 %v4860_v24, %v5440_v22  ;;  %v1088_v27 = vpop.f32.mrb[1].mxu0 }
  0xeb   : > { %v1222_v28 = vmul.f32 %v5440_v22, %v1088_v27  ;;  %v4861_v29 = vpop.f32.mrb[2].mxu0 }
  0xec   : > { %v1263_v30 = vadd.f32 %v5445_v25, %v1224_v26  ;;  %v1225_v31 = vmul.f32 %v4861_v29, %v5440_v22  ;;  %v1091_v33 = vpop.f32.mrb[3].mxu0 }
  0xed   : > { %v1261_v34 = vadd.f32 %v5445_v25, %v1222_v28  ;;  %v1223_v35 = vmul.f32 %v5440_v22, %v1091_v33 }
  0xee   : > { %v1295_v36 = vmax.f32 %v1263_v30, 0.0  ;;  %v1264_v37 = vadd.f32 %v5445_v25, %v1225_v31 }
  0xef   : > { %v5456_v38 = vmax.f32 %v1261_v34, 0.0  ;;  %v1262_v39 = vadd.f32 %v5445_v25, %v1223_v35 }
  0xf0   : > { %v1345_v40 = vrot.slane %v1295_v36, 7  ;;  %v1296_v41 = vmax.f32 %v1264_v37, 0.0  ;;  %v2147_v42 = vrot.slane %v1295_v36, 1 }
  0xf1   : > { %v8153_v43 = vrot.slane %v5456_v38, 7  ;;  %v8152_v44 = vrot.slane %v5456_v38, 1  ;;  %v1294_v45 = vmax.f32 %v1262_v39, 0.0  ;;  %v4864_v46 = vpop.f32.mrb[4].mxu0 }
  0xf2   : > { %v5463_v47 = vpack.c.bf16 %v1296_v41, %v1295_v36  ;;  %v1346_v48 = vrot.slane %v1296_v41, 7  ;;  %v2148_v49 = vrot.slane %v1296_v41, 1  ;;  %v1228_v50 = vmul.f32 %v4864_v46, %v5440_v22  ;;  %v1104_v51 = vpop.f32.mrb[5].mxu0 }
  0xf3   : > { %v1344_v52 = vrot.slane %v1294_v45, 7  ;;  %v2146_v53 = vrot.slane %v1294_v45, 1  ;;  %v1226_v54 = vmul.f32 %v5440_v22, %v1104_v51  ;;  %v4865_v55 = vpop.f32.mrb[6].mxu0  ;;  %v5468_v56 = vpack.c.bf16 %v1294_v45, %v5456_v38 }
  0xf4   : > { %v1267_v57 = vadd.f32 %v5445_v25, %v1228_v50  ;;  %v1229_v58 = vmul.f32 %v4865_v55, %v5440_v22  ;;  %v1107_v59 = vpop.f32.mrb[7].mxu0  ;;  %v1404_v60 = vsel %vm1375_vm2, %v1345_v40, %v1346_v48  ;;  %v2206_v61 = vsel %vm2177_vm3, %v2147_v42, %v2148_v49 }
  0xf5   : > { %8333 = vst [vmem:[#allocation2_spill] sm:$0xff] %v5468_v56  ;;  %v5480_v62 = vsel %vm1375_vm2, %v8153_v43, %v1344_v52  ;;  %v2207_v63 = vsel %vm2177_vm3, %v2146_v53, %v2147_v42  ;;  %v2208_v0 = vsel %vm2177_vm3, %v8152_v44, %v2146_v53  ;;  %v1265_v1 = vadd.f32 %v5445_v25, %v1226_v54 }
  0xf6   : > { %v5489_v2 = vpack.c.bf16 %v2207_v63, %v2208_v0  ;;  %v5491_v3 = vmax.f32 %v1267_v57, 0.0  ;;  %v1268_v4 = vadd.f32 %v5445_v25, %v1229_v58  ;;  %v1227_v5 = vmul.f32 %v5440_v22, %v1107_v59 }
  0xf7   : > { %v5495_v6 = vmax.f32 %v1265_v1, 0.0  ;;  %v1405_v7 = vsel %vm1375_vm2, %v1344_v52, %v1345_v40  ;;  %v5552_v53 = vsel %vm1474_vm1, %v5433_v21, 0 }
  0xf8   : > { %8334 = vst [vmem:[#allocation3_spill] sm:$0xff] %v5489_v2  ;;  %v5499_v8 = vmax.f32 %v1268_v4, 0.0  ;;  %v1266_v9 = vadd.f32 %v5445_v25, %v1227_v5  ;;  %v1349_v11 = vrot.slane %v5491_v3, 7  ;;  %v5508_v15 = vpack.c.bf16 %v1404_v60, %v1405_v7 }
  0xf9   : > { %v1347_v12 = vrot.slane %v5495_v6, 7  ;;  %v2149_v13 = vrot.slane %v5495_v6, 1  ;;  %v4868_v14 = vpop.f32.mrb[8].mxu0  ;;  %v2151_v16 = vrot.slane %v5491_v3, 1 }
  0xfa   : > { %v1350_v17 = vrot.slane %v5499_v8, 7  ;;  %v1298_v18 = vmax.f32 %v1266_v9, 0.0  ;;  %v1232_v19 = vmul.f32 %v4868_v14, %v5440_v22  ;;  %v1120_v23 = vpop.f32.mrb[9].mxu0  ;;  %v5518_v27 = vpack.c.bf16 %v5499_v8, %v5491_v3 }
  0xfb   : > { %v1230_v20 = vmul.f32 %v5440_v22, %v1120_v23  ;;  %v4869_v24 = vpop.f32.mrb[10].mxu0  ;;  %v1403_v26 = vsel %vm1375_vm2, %v1346_v48, %v1347_v12  ;;  %v2205_v28 = vsel %vm2177_vm3, %v2148_v49, %v2149_v13  ;;  %v2152_v51 = vrot.slane %v5499_v8, 1 }
  0xfc   : > { %v1348_v29 = vrot.slane %v1298_v18, 7  ;;  %v2150_v30 = vrot.slane %v1298_v18, 1  ;;  %v1271_v31 = vadd.f32 %v5445_v25, %v1232_v19  ;;  %v1233_v33 = vmul.f32 %v4869_v24, %v5440_v22  ;;  %v1123_v34 = vpop.f32.mrb[11].mxu0 }
  0xfd   : > { %v1269_v35 = vadd.f32 %v5445_v25, %v1230_v20  ;;  %v1231_v36 = vmul.f32 %v5440_v22, %v1123_v34  ;;  %v5529_v37 = vpack.c.bf16 %v1298_v18, %v5495_v6  ;;  %v1400_v39 = vsel %vm1375_vm2, %v1349_v11, %v1350_v17 }
  0xfe   : > { %v5533_v40 = vmax.f32 %v1271_v31, 0.0  ;;  %v1272_v41 = vadd.f32 %v5445_v25, %v1233_v33  ;;  %v1402_v42 = vsel %vm1375_vm2, %v1347_v12, %v1348_v29  ;;  %v1401_v45 = vsel %vm1375_vm2, %v1348_v29, %v1349_v11 }
  0xff   : > { %v5540_v46 = vmax.f32 %v1269_v35, 0.0  ;;  %v1270_v48 = vadd.f32 %v5445_v25, %v1231_v36  ;;  %v5543_v49 = vpack.c.bf16 %v1402_v42, %v1403_v26  ;;  %v5545_v50 = vpack.c.bf16 %v1400_v39, %v1401_v45 }
 0x100   : > { %v5548_v52 = vmax.f32 %v1272_v41, 0.0  ;;  %v5554_v54 = vpack.c.bf16 %v2205_v28, %v2206_v61  ;;  %v1353_v55 = vrot.slane %v5533_v40, 7  ;;  %v2203_v60 = vsel %vm2177_vm3, %v2150_v30, %v2151_v16 }
 0x101   : > { %v1351_v57 = vrot.slane %v5540_v46, 7  ;;  %v5558_v58 = vmax.f32 %v1270_v48, 0.0  ;;  %v4872_v59 = vpop.f32.mrb[12].mxu0  ;;  %v2155_v63 = vrot.slane %v5533_v40, 1  ;;  %v2153_v4 = vrot.slane %v5540_v46, 1 }
 0x102   : > { %v1354_v0 = vrot.slane %v5548_v52, 7  ;;  %v1236_v21 = vmul.f32 %v4872_v59, %v5440_v22  ;;  %v1136_v61 = vpop.f32.mrb[13].mxu0  ;;  %v5569_v1 = vpack.c.bf16 %v5548_v52, %v5533_v40  ;;  %v2204_v35 = vsel %vm2177_vm3, %v2149_v13, %v2150_v30 }
 0x103   : > { %v1352_v5 = vrot.slane %v5558_v58, 7  ;;  %v1234_v7 = vmul.f32 %v5440_v22, %v1136_v61  ;;  %v4873_v8 = vpop.f32.mrb[14].mxu0  ;;  %v1399_v9 = vsel %vm1375_vm2, %v1350_v17, %v1351_v57  ;;  %v5582_v19 = vpack.c.bf16 %v5558_v58, %v5540_v46 }
 0x104   : > { %v1275_v11 = vadd.f32 %v5445_v25, %v1236_v21  ;;  %v1237_v12 = vmul.f32 %v4873_v8, %v5440_v22  ;;  %v1139_v14 = vpop.f32.mrb[15].mxu0  ;;  %v1396_v18 = vsel %vm1375_vm2, %v1353_v55, %v1354_v0  ;;  %v2201_v36 = vsel %vm2177_vm3, %v2152_v51, %v2153_v4 }
 0x105   : > { %v1273_v23 = vadd.f32 %v5445_v25, %v1234_v7  ;;  %v1235_v20 = vmul.f32 %v5440_v22, %v1139_v14  ;;  %v1397_v24 = vsel %vm1375_vm2, %v1352_v5, %v1353_v55  ;;  %v1398_v17 = vsel %vm1375_vm2, %v1351_v57, %v1352_v5 }
 0x106   : > { %v5590_v26 = vmax.f32 %v1275_v11, 0.0  ;;  %v1276_v28 = vadd.f32 %v5445_v25, %v1237_v12  ;;  %v5593_v29 = vpack.c.bf16 %v1396_v18, %v1397_v24  ;;  %v5595_v31 = vpack.c.bf16 %v1398_v17, %v1399_v9 }
 0x107   : > { %v5597_v33 = vmax.f32 %v1273_v23, 0.0  ;;  %v1274_v34 = vadd.f32 %v5445_v25, %v1235_v20  ;;  %v2156_v39 = vrot.slane %v5548_v52, 1  ;;  %v2154_v41 = vrot.slane %v5558_v58, 1 }
 0x108   : > { %8335 = vst [vmem:[#allocation4_spill] sm:$0xff] %v5593_v29  ;;  %v5610_v42 = vmax.f32 %v1276_v28, 0.0  ;;  %4904 = vmatprep.mubr.msk.bf16.mxu1 %vm1425_vm4, %v5593_v29  ;;  %v5614_v45 = vpack.c.bf16 %v2203_v60, %v2204_v35  ;;  %v1357_v6 = vrot.slane %v5590_v26, 7  ;;  %v2202_v55 = vsel %vm2177_vm3, %v2151_v16, %v2152_v51 }
 0x109   : > { %v1355_v13 = vrot.slane %v5597_v33, 7  ;;  %v5618_v30 = vmax.f32 %v1274_v34, 0.0  ;;  %v4876_v48 = vpop.f32.mrb[16].mxu0  ;;  %v8154_v61 = vrot.slane %v5597_v33, 1 }
 0x10a   : > { %v1358_v58 = vrot.slane %v5610_v42, 7  ;;  %v1240_v59 = vmul.f32 %v4876_v48, %v5440_v22  ;;  %v1152_v60 = vpop.f32.mrb[17].mxu0  ;;  %v5629_v21 = vpack.c.bf16 %v5610_v42, %v5590_v26 }
 0x10b   : > { %v1356_v5 = vrot.slane %v5618_v30, 7  ;;  %v1238_v3 = vmul.f32 %v5440_v22, %v1152_v60  ;;  %v4877_v7 = vpop.f32.mrb[18].mxu0  ;;  %v1395_v16 = vsel %vm1375_vm2, %v1354_v0, %v1355_v13  ;;  %v5642_v12 = vpack.c.bf16 %v5618_v30, %v5597_v33 }
 0x10c   : > { %v1279_v51 = vadd.f32 %v5445_v25, %v1240_v59  ;;  %v1241_v8 = vmul.f32 %v4877_v7, %v5440_v22  ;;  %v1155_v9 = vpop.f32.mrb[19].mxu0  ;;  %v1392_v11 = vsel %vm1375_vm2, %v1357_v6, %v1358_v58 }
 0x10d   : > { %v1277_v14 = vadd.f32 %v5445_v25, %v1238_v3  ;;  %v1239_v18 = vmul.f32 %v5440_v22, %v1155_v9  ;;  %v1394_v23 = vsel %vm1375_vm2, %v1355_v13, %v1356_v5  ;;  %v1393_v0 = vsel %vm1375_vm2, %v1356_v5, %v1357_v6  ;;  %v5664_v13 = vld [vmem:[%s8145_s4 + $0x8] sm:$0xf] }
 0x10e   : > { %v5650_v20 = vmax.f32 %v1279_v51, 0.0  ;;  %v1280_v24 = vadd.f32 %v5445_v25, %v1241_v8  ;;  %v5653_v17 = vpack.c.bf16 %v1394_v23, %v1395_v16  ;;  %v5655_v28 = vpack.c.bf16 %v1392_v11, %v1393_v0 }
 0x10f   : > { %v5658_v35 = vmax.f32 %v1277_v14, 0.0  ;;  %v1278_v48 = vadd.f32 %v5445_v25, %v1239_v18  ;;  %v5666_v6 = vpack.c.bf16 %v2201_v36, %v2202_v55  ;;  %v2199_v3 = vsel %vm2177_vm3, %v2154_v41, %v2155_v63 }
 0x110   : > { %8336 = vst [vmem:[#allocation5_spill] sm:$0xff] %v5653_v17  ;;  %8337 = vst [vmem:[#allocation6_spill] sm:$0xff] %v5655_v28  ;;  %v1361_v60 = vrot.slane %v5650_v20, 7  ;;  %v5670_v5 = vmax.f32 %v1280_v24, 0.0  ;;  %4905 = vmatmul.mubr.msk.bf16.vlgmr.msra.gmra.mrb[0].mxu1 %vm1425_vm4, %v5653_v17  ;;  %v2200_v51 = vsel %vm2177_vm3, %v2153_v4, %v2154_v41 }
 0x111   : > { %v1359_v16 = vrot.slane %v5658_v35, 7  ;;  %v5680_v36 = vmax.f32 %v1278_v48, 0.0  ;;  %v4880_v55 = vpop.f32.mrb[20].mxu0  ;;  %4908 = vmatprep.mubr.msk.bf16.mxu1 %vm1425_vm4, %v5655_v28  ;;  %4925 = vmatpush3.bf16.msra.mxu1 %v5503_v10  ;;  %v5727_v59 = vpack.c.bf16 %v2199_v3, %v2200_v51  ;;  %v2198_v3 = vsel %vm2177_vm3, %v2155_v63, %v2156_v39 }
 0x112   : > { %v1362_v9 = vrot.slane %v5670_v5, 7  ;;  %v1244_v11 = vmul.f32 %v4880_v55, %v5440_v22  ;;  %v1168_v14 = vpop.f32.mrb[21].mxu0  ;;  %5236 = vmatprep.subr.msk.bf16.mxu1 %vm1474_vm1, %v5664_v13  ;;  %v5696_v18 = vpack.c.bf16 %v5670_v5, %v5650_v20 }
 0x113   : > { %v1360_v46 = vrot.slane %v5680_v36, 7  ;;  %v1242_v4 = vmul.f32 %v5440_v22, %v1168_v14  ;;  %v4881_v41 = vpop.f32.mrb[22].mxu0  ;;  %v1391_v23 = vsel %vm1375_vm2, %v1358_v58, %v1359_v16  ;;  %v5709_v44 = vpack.c.bf16 %v5680_v36, %v5658_v35 }
 0x114   : > { %v1283_v0 = vadd.f32 %v5445_v25, %v1244_v11  ;;  %v1245_v24 = vmul.f32 %v4881_v41, %v5440_v22  ;;  %v1171_v48 = vpop.f32.mrb[23].mxu0  ;;  %v1388_v55 = vsel %vm1375_vm2, %v1361_v60, %v1362_v9 }
 0x115   : > { %v1281_v10 = vadd.f32 %v5445_v25, %v1242_v4  ;;  %v1243_v14 = vmul.f32 %v5440_v22, %v1171_v48  ;;  %v1390_v43 = vsel %vm1375_vm2, %v1359_v16, %v1360_v46  ;;  %v1389_v58 = vsel %vm1375_vm2, %v1360_v46, %v1361_v60 }
 0x116   : > { %v5717_v11 = vmax.f32 %v1283_v0, 0.0  ;;  %v1284_v41 = vadd.f32 %v5445_v25, %v1245_v24  ;;  %v5720_v7 = vpack.c.bf16 %v1390_v43, %v1391_v23  ;;  %v5722_v34 = vpack.c.bf16 %v1388_v55, %v1389_v58 }
 0x117   : > { %v5724_v8 = vmax.f32 %v1281_v10, 0.0  ;;  %v1282_v4 = vadd.f32 %v5445_v25, %v1243_v14  ;;  %v2197_v60 = vsel %vm2177_vm3, %v2156_v39, %v8154_v61 }
 0x118   : > { %8338 = vst [vmem:[#allocation7_spill] sm:$0xff] %v5720_v7  ;;  %8339 = vst [vmem:[#allocation8_spill] sm:$0xff] %v5722_v34  ;;  %v1365_v43 = vrot.slane %v5717_v11, 7  ;;  %v5737_v46 = vmax.f32 %v1284_v41, 0.0  ;;  %4909 = vmatmul.mubr.msk.bf16.gmra.mrb[4].mxu1 %vm1425_vm4, %v5720_v7  ;;  %v5753_v24 = vpack.c.bf16 %v2197_v60, %v2198_v3 }
 0x119   : > { %v1363_v10 = vrot.slane %v5724_v8, 7  ;;  %v5749_v23 = vmax.f32 %v1282_v4, 0.0  ;;  %v4884_v0 = vpop.f32.mrb[24].mxu0  ;;  %4912 = vmatprep.mubr.msk.bf16.mxu1 %vm1425_vm4, %v5722_v34 }
 0x11a   : > { %8340 = vst [vmem:[#allocation9_spill] sm:$0xff] %v5753_v24  ;;  %v1366_v52 = vrot.slane %v5737_v46, 7  ;;  %v1248_v40 = vmul.f32 %v4884_v0, %v5440_v22  ;;  %v1184_v55 = vpop.f32.mrb[25].mxu0  ;;  %v5760_v63 = vpack.c.bf16 %v5737_v46, %v5717_v11 }
 0x11b   : > { %v1364_v14 = vrot.slane %v5749_v23, 7  ;;  %v1246_v58 = vmul.f32 %v5440_v22, %v1184_v55  ;;  %v4885_v41 = vpop.f32.mrb[26].mxu0  ;;  %v1387_v4 = vsel %vm1375_vm2, %v1362_v9, %v1363_v10  ;;  %v5773_v48 = vpack.c.bf16 %v5749_v23, %v5724_v8 }
 0x11c   : > { %v1287_v60 = vadd.f32 %v5445_v25, %v1248_v40  ;;  %v1249_v3 = vmul.f32 %v4885_v41, %v5440_v22  ;;  %v1187_v0 = vpop.f32.mrb[27].mxu0  ;;  %v1384_v51 = vsel %vm1375_vm2, %v1365_v43, %v1366_v52 }
 0x11d   : > { %v1285_v39 = vadd.f32 %v5445_v25, %v1246_v58  ;;  %v1247_v55 = vmul.f32 %v5440_v22, %v1187_v0  ;;  %v1386_v16 = vsel %vm1375_vm2, %v1363_v10, %v1364_v14  ;;  %v1385_v9 = vsel %vm1375_vm2, %v1364_v14, %v1365_v43 }
 0x11e   : > { %v5781_v40 = vmax.f32 %v1287_v60, 0.0  ;;  %v1288_v41 = vadd.f32 %v5445_v25, %v1249_v3  ;;  %v5784_v61 = vpack.c.bf16 %v1386_v16, %v1387_v4  ;;  %v5786_v57 = vpack.c.bf16 %v1384_v51, %v1385_v9 }
 0x11f   : > { %v5789_v7 = vmax.f32 %v1285_v39, 0.0  ;;  %v1286_v58 = vadd.f32 %v5445_v25, %v1247_v55  ;;  %v8343_v0 = vrot.slane %v5590_v26, 1  ;;  %v8344_v10 = vrot.slane %v5618_v30, 1 }
 0x120   : > { %8341 = vst [vmem:[#allocation10_spill] sm:$0xff] %v5784_v61  ;;  %8342 = vst [vmem:[#allocation11_spill] sm:$0xff] %v5786_v57  ;;  %v1369_v14 = vrot.slane %v5781_v40, 7  ;;  %v5800_v4 = vmax.f32 %v1288_v41, 0.0  ;;  %4913 = vmatmul.mubr.msk.bf16.gmra.mrb[8].mxu1 %vm1425_vm4, %v5784_v61  ;;  %v8346_v39 = vrot.slane %v5597_v33, 1 }
 0x121   : > { %v2195_v43 = vsel %vm2177_vm3, %v8344_v10, %v8343_v0  ;;  %v8345_v51 = vmov %v8344_v10  ;;  %v1367_v3 = vrot.slane %v5789_v7, 7  ;;  %v5812_v9 = vmax.f32 %v1286_v58, 0.0  ;;  %v4888_v0 = vpop.f32.mrb[28].mxu0  ;;  %4916 = vmatprep.mubr.msk.bf16.mxu1 %vm1425_vm4, %v5786_v57 }
 0x122   : > { %v2196_v60 = vsel %vm2177_vm3, %v8346_v39, %v8345_v51  ;;  %v1370_v10 = vrot.slane %v5800_v4, 7  ;;  %v1252_v33 = vmul.f32 %v4888_v0, %v5440_v22  ;;  %v1200_v16 = vpop.f32.mrb[29].mxu0  ;;  %v5823_v51 = vpack.c.bf16 %v5800_v4, %v5781_v40 }
 0x123   : > { %v5816_v41 = vpack.c.bf16 %v2195_v43, %v2196_v60  ;;  %v1368_v58 = vrot.slane %v5812_v9, 7  ;;  %v1250_v55 = vmul.f32 %v5440_v22, %v1200_v16  ;;  %v4889_v34 = vpop.f32.mrb[30].mxu0  ;;  %v1383_v43 = vsel %vm1375_vm2, %v1366_v52, %v1367_v3 }
 0x124   : > { %v1291_v60 = vadd.f32 %v5445_v25, %v1252_v33  ;;  %v1253_v30 = vmul.f32 %v4889_v34, %v5440_v22  ;;  %v1203_v0 = vpop.f32.mrb[31].mxu0  ;;  %v1380_v57 = vsel %vm1375_vm2, %v1369_v14, %v1370_v10  ;;  %v5836_v61 = vpack.c.bf16 %v5812_v9, %v5789_v7 }
 0x125   : > { %8347 = vst [vmem:[#allocation12_spill] sm:$0xff] %v5816_v41  ;;  %v1289_v39 = vadd.f32 %v5445_v25, %v1250_v55  ;;  %v1251_v16 = vmul.f32 %v5440_v22, %v1203_v0  ;;  %v1382_v28 = vsel %vm1375_vm2, %v1367_v3, %v1368_v58  ;;  %v1381_v52 = vsel %vm1375_vm2, %v1368_v58, %v1369_v14 }
 0x126   : > { %v1323_v33 = vmax.f32 %v1291_v60, 0.0  ;;  %v1292_v34 = vadd.f32 %v5445_v25, %v1253_v30  ;;  %v5845_v17 = vpack.c.bf16 %v1382_v28, %v1383_v43  ;;  %v5847_v29 = vpack.c.bf16 %v1380_v57, %v1381_v52 }
 0x127   : > { %v1321_v41 = vmax.f32 %v1289_v39, 0.0  ;;  %v1290_v24 = vadd.f32 %v5445_v25, %v1251_v16  ;;  %v8349_v55 = vrot.slane %v5658_v35, 1  ;;  %v8350_v22 = vrot.slane %v5610_v42, 1 }
 0x128   : > { %8348 = vst [vmem:[#allocation13_spill] sm:$0xff] %v5847_v29  ;;  %v8352_v14 = vrot.slane %v5590_v26, 1  ;;  %v1373_v30 = vrot.slane %v1323_v33, 7  ;;  %v2175_v57 = vrot.slane %v1323_v33, 1  ;;  %v1324_v58 = vmax.f32 %v1292_v34, 0.0  ;;  %4917 = vmatmul.mubr.msk.bf16.gmra.mrb[12].mxu1 %vm1425_vm4, %v5845_v17 }
 0x129   : > { %v2193_v3 = vsel %vm2177_vm3, %v8350_v22, %v8349_v55  ;;  %v8351_v0 = vmov %v8350_v22  ;;  %v1371_v39 = vrot.slane %v1321_v41, 7  ;;  %v2173_v43 = vrot.slane %v1321_v41, 1  ;;  %4920 = vmatprep.mubr.msk.bf16.mxu1 %vm1425_vm4, %v5847_v29 }
 0x12a   : > { %v2194_v28 = vsel %vm2177_vm3, %v8352_v14, %v8351_v0  ;;  %v1322_v60 = vmax.f32 %v1290_v24, 0.0  ;;  %v8353_v42 = vrot.slane %v5650_v20, 1  ;;  %v8354_v26 = vrot.slane %v5680_v36, 1 }
 0x12b   : > { %v5864_v25 = vpack.c.bf16 %v2193_v3, %v2194_v28  ;;  %v1374_v52 = vrot.slane %v1324_v58, 7  ;;  %v2176_v34 = vrot.slane %v1324_v58, 1  ;;  %v5874_v55 = vpack.c.bf16 %v1324_v58, %v1323_v33 }
 0x12c   : > { %v2191_v16 = vsel %vm2177_vm3, %v8354_v26, %v8353_v42  ;;  %v8356_v22 = vmov %v8354_v26  ;;  %v8357_v3 = vrot.slane %v5658_v35, 1  ;;  %v1372_v0 = vrot.slane %v1322_v60, 7 }
 0x12d   : > { %8355 = vst [vmem:[#allocation14_spill] sm:$0xff] %v5874_v55  ;;  %v2174_v14 = vrot.slane %v1322_v60, 1  ;;  %v1379_v28 = vsel %vm1375_vm2, %v1370_v10, %v1371_v39  ;;  %v5884_v29 = vpack.c.bf16 %v1322_v60, %v1321_v41  ;;  %v8358_v42 = vrot.slane %v5456_v38, 7 }
 0x12e   : > { %v2192_v24 = vsel %vm2177_vm3, %v8357_v3, %v8356_v22  ;;  %v1376_v36 = vsel %vm1375_vm2, %v1373_v30, %v1374_v52  ;;  %v2178_v35 = vsel %vm2177_vm3, %v2175_v57, %v2176_v34  ;;  %v8359_v58 = vrot.slane %v5456_v38, 1 }
 0x12f   : > { %v1407_v33 = vsel %vm1375_vm2, %v1374_v52, %v8358_v42  ;;  %v1377_v41 = vsel %vm1375_vm2, %v1372_v0, %v1373_v30  ;;  %v1378_v60 = vsel %vm1375_vm2, %v1371_v39, %v1372_v0  ;;  %v5911_v42 = vpack.c.bf16 %v2191_v16, %v2192_v24 }
 0x130   : > { %v2209_v26 = vsel %vm2177_vm3, %v2176_v34, %v8359_v58  ;;  %v5899_v10 = vpack.c.bf16 %v5480_v62, %v1407_v33  ;;  %v5907_v52 = vpack.c.bf16 %v1376_v36, %v1377_v41  ;;  %v5909_v3 = vpack.c.bf16 %v1378_v60, %v1379_v28 }
 0x131   : > { %v5905_v22 = vpack.c.bf16 %v2209_v26, %v2178_v35  ;;  %v8361_v38 = vrot.slane %v5724_v8, 1  ;;  %v8362_v34 = vrot.slane %v5670_v5, 1  ;;  %v8364_v33 = vrot.slane %v5650_v20, 1  ;;  %v4559_v8 = vld [vmem:[%s8145_s4 + $0xc] sm:$0xf] }
 0x132   : > { %v8365_v0 = vrot.slane %v5717_v11, 1  ;;  %v8366_v28 = vrot.slane %v5749_v23, 1  ;;  %v8369_v5 = vrot.slane %v5789_v7, 1  ;;  %v8370_v20 = vrot.slane %v5737_v46, 1  ;;  %4892 = vmatprep.mubr.msk.bf16.mxu0 %vm1425_vm4, %v5907_v52  ;;  %4921 = vmatmul.mubr.msk.bf16.gmra.mrb[16].mxu1 %vm1425_vm4, %v5909_v3 }
 0x133   : > { %8360 = vst [vmem:[#allocation15_spill] sm:$0xff] %v5905_v22  ;;  %v2189_v62 = vsel %vm2177_vm3, %v8362_v34, %v8361_v38  ;;  %v8363_v30 = vmov %v8362_v34  ;;  %v8368_v36 = vmov %v8361_v38  ;;  %4893 = vmatmul.mubr.msk.bf16.vlgmr.msra.gmra.mrb[32].mxu0 %vm1425_vm4, %v5899_v10  ;;  %4926 = vmatprep.mubr.msk.bf16.mxu1 %vm1425_vm4, %v5468_v56 }
 0x134   : > { %v2190_v39 = vsel %vm2177_vm3, %v8364_v33, %v8363_v30  ;;  %v2187_v16 = vsel %vm2177_vm3, %v8366_v28, %v8365_v0  ;;  %v8367_v24 = vmov %v8366_v28  ;;  %v2185_v58 = vsel %vm2177_vm3, %v8370_v20, %v8369_v5  ;;  %4959 = vmatpush3.bf16.msra.mxu0 %v5552_v53  ;;  %4896 = vmatprep.mubr.msk.bf16.mxu0 %vm1425_vm4, %v5508_v15 }
 0x135   : > { %v2188_v35 = vsel %vm2177_vm3, %v8368_v36, %v8367_v24  ;;  %v5950_v23 = vpack.c.bf16 %v2189_v62, %v2190_v39  ;;  %v8372_v41 = vmov %v8370_v20  ;;  %v8373_v60 = vmov %v8365_v0  ;;  %5237 = vmatprep.subr.msk.bf16.mxu0 %vm1474_vm1, %v4559_v8 }
 0x136   : > { %v5952_v26 = vpack.c.bf16 %v2187_v16, %v2188_v35  ;;  %v2186_v38 = vsel %vm2177_vm3, %v8373_v60, %v8372_v41  ;;  %v8375_v62 = vrot.slane %v5781_v40, 1  ;;  %v8376_v30 = vrot.slane %v5812_v9, 1  ;;  %v4576_v40 = vld [vmem:[%s8145_s4 + $0x14] sm:$0xf] }
 0x137   : > { %v5964_v34 = vpack.c.bf16 %v2185_v58, %v2186_v38  ;;  %v8378_v33 = vmov %v8369_v5  ;;  %v8380_v28 = vrot.slane %v5800_v4, 1  ;;  %v2179_v36 = vsel %vm2177_vm3, %v2174_v14, %v2175_v57  ;;  %v4593_v57 = vld [vmem:[%s8145_s4 + $0x18] sm:$0xf]  ;;  %v4627_v58 = vld [vmem:[%s8145_s4 + $0x20] sm:$0xf]  ;;  %v8386_v41 = vld [vmem:[#allocation12_spill] sm:$0xff] }
 0x138   : > { %8371 = vst [vmem:[#allocation16_spill] sm:$0xff] %v5952_v26  ;;  %v2183_v46 = vsel %vm2177_vm3, %v8376_v30, %v8375_v62  ;;  %v8377_v11 = vmov %v8376_v30  ;;  %v8382_v9 = vmov %v8375_v62  ;;  %v2180_v35 = vsel %vm2177_vm3, %v2173_v43, %v2174_v14  ;;  %v4610_v14 = vld [vmem:[%s8145_s4 + $0x1c] sm:$0xf]  ;;  %v8387_v60 = vld [vmem:[#allocation4_spill] sm:$0xff]  ;;  %v8389_v62 = vld [vmem:[#allocation6_spill] sm:$0xff] }
 0x139   : > { %8374 = vst [vmem:[#allocation17_spill] sm:$0xff] %v5964_v34  ;;  %v2184_v39 = vsel %vm2177_vm3, %v8378_v33, %v8377_v11  ;;  %v2181_v16 = vsel %vm2177_vm3, %v8380_v28, %v2173_v43  ;;  %v8381_v24 = vmov %v8380_v28  ;;  %v6000_v5 = vpack.c.bf16 %v2179_v36, %v2180_v35  ;;  %v8388_v38 = vld [vmem:[#allocation5_spill] sm:$0xff]  ;;  %v8390_v30 = vld [vmem:[#allocation7_spill] sm:$0xff]  ;;  %v8392_v11 = vld [vmem:[#allocation10_spill] sm:$0xff] }
 0x13a   : > { %v5981_v0 = vpack.c.bf16 %v2183_v46, %v2184_v39  ;;  %v2182_v7 = vsel %vm2177_vm3, %v8382_v9, %v8381_v24  ;;  %v2277_v4 = vsel %vm1474_vm1, %v5664_v13, 0  ;;  %4927 = vmatmul.mubr.msk.bf16.vlgmr.msra.gmra.mrb[20].mxu1 %vm1425_vm4, %v5463_v47  ;;  %v2539_v13 = vsel %vm1474_vm1, %v4559_v8, 0  ;;  %v8385_v8 = vld [vmem:[#allocation9_spill] sm:$0xff]  ;;  %v8391_v46 = vld [vmem:[#allocation8_spill] sm:$0xff]  ;;  %v8393_v33 = vld [vmem:[#allocation11_spill] sm:$0xff] }
 0x13b   : > { %v5994_v53 = vpack.c.bf16 %v2181_v16, %v2182_v7  ;;  %8384 = vst [vmem:[#allocation20_spill] sm:$0xff] %v6000_v5  ;;  %4897 = vmatmul.mubr.msk.bf16.gmra.mrb[36].mxu0 %vm1425_vm4, %v5543_v49  ;;  %4930 = vmatprep.mubr.msk.bf16.mxu1 %vm1425_vm4, %v5529_v37  ;;  %v2769_v43 = vsel %vm1474_vm1, %v4576_v40, 0  ;;  %v2999_v20 = vsel %vm1474_vm1, %v4593_v57, 0  ;;  %v3261_v39 = vsel %vm1474_vm1, %v4610_v14, 0  ;;  %v8394_v28 = vld [vmem:[#allocation13_spill] sm:$0xff] }
 0x13c   : > { %8379 = vst [vmem:[#allocation18_spill] sm:$0xff] %v5981_v0  ;;  %4900 = vmatprep.mubr.msk.bf16.mxu0 %vm1425_vm4, %v5545_v50  ;;  %4993 = vmatpush3.bf16.msra.mxu1 %v2277_v4  ;;  %v3491_v16 = vsel %vm1474_vm1, %v4627_v58, 0  ;;  %v377_v9 = vadd.s32 96, %v5451_v32 }
 0x13d   : > { %8383 = vst [vmem:[#allocation19_spill] sm:$0xff] %v5994_v53  ;;  %5238 = vmatprep.subr.msk.bf16.mxu1 %vm1474_vm1, %v4576_v40  ;;  %v6224_v40 = vadd.s32 120, %v5451_v32 }
 0x13e   : > { %v441_v35 = vshra.s32 %v377_v9, 4 }
 0x13f   : > { %8397 = vst [vmem:[#allocation4_spill] sm:$0xff] %v6224_v40 }
 0x142   : > { %4931 = vmatmul.mubr.msk.bf16.gmra.mrb[24].mxu1 %vm1425_vm4, %v5518_v27 }
 0x143   : > { %4901 = vmatmul.mubr.msk.bf16.gmra.mrb[40].mxu0 %vm1425_vm4, %v5595_v31  ;;  %4934 = vmatprep.mubr.msk.bf16.mxu1 %vm1425_vm4, %v5582_v19 }
 0x144   : > { %4960 = vmatprep.mubr.msk.bf16.mxu0 %vm1425_vm4, %v5874_v55 }
 0x14a   : > { %4935 = vmatmul.mubr.msk.bf16.gmra.mrb[28].mxu1 %vm1425_vm4, %v5569_v1 }
 0x14b   : > { %4938 = vmatprep.mubr.msk.bf16.mxu1 %vm1425_vm4, %v5642_v12  ;;  %4961 = vmatmul.mubr.msk.bf16.vlgmr.msra.gmra.mrb[44].mxu0 %vm1425_vm4, %v5468_v56 }
 0x14c   : > { %5027 = vmatpush3.bf16.msra.mxu0 %v2539_v13  ;;  %4964 = vmatprep.mubr.msk.bf16.mxu0 %vm1425_vm4, %v5463_v47 }
 0x14d   : > { %5239 = vmatprep.subr.msk.bf16.mxu0 %vm1474_vm1, %v4593_v57 }
 0x152   : > { %4939 = vmatmul.mubr.msk.bf16.gmra.mrb[32].mxu1 %vm1425_vm4, %v5629_v21 }
 0x153   : > { %4942 = vmatprep.mubr.msk.bf16.mxu1 %vm1425_vm4, %v5709_v44  ;;  %4965 = vmatmul.mubr.msk.bf16.gmra.mrb[48].mxu0 %vm1425_vm4, %v5529_v37 }
 0x154   : > { %4968 = vmatprep.mubr.msk.bf16.mxu0 %vm1425_vm4, %v5518_v27 }
 0x15a   : > { %4943 = vmatmul.mubr.msk.bf16.gmra.mrb[36].mxu1 %vm1425_vm4, %v5696_v18 }
 0x15b   : > { %4946 = vmatprep.mubr.msk.bf16.mxu1 %vm1425_vm4, %v5773_v48  ;;  %4969 = vmatmul.mubr.msk.bf16.gmra.mrb[52].mxu0 %vm1425_vm4, %v5582_v19 }
 0x15c   : > { %4972 = vmatprep.mubr.msk.bf16.mxu0 %vm1425_vm4, %v5569_v1 }
 0x162   : > { %4947 = vmatmul.mubr.msk.bf16.gmra.mrb[40].mxu1 %vm1425_vm4, %v5760_v63 }
 0x163   : > { %4950 = vmatprep.mubr.msk.bf16.mxu1 %vm1425_vm4, %v5836_v61  ;;  %4973 = vmatmul.mubr.msk.bf16.gmra.mrb[56].mxu0 %vm1425_vm4, %v5642_v12 }
 0x164   : > { %4976 = vmatprep.mubr.msk.bf16.mxu0 %vm1425_vm4, %v5629_v21 }
 0x16a   : > { %4951 = vmatmul.mubr.msk.bf16.gmra.mrb[44].mxu1 %vm1425_vm4, %v5823_v51 }
 0x16b   : > { %4954 = vmatprep.mubr.msk.bf16.mxu1 %vm1425_vm4, %v5884_v29  ;;  %4977 = vmatmul.mubr.msk.bf16.gmra.mrb[60].mxu0 %vm1425_vm4, %v5709_v44 }
 0x16c   : > { %4980 = vmatprep.mubr.msk.bf16.mxu0 %vm1425_vm4, %v5696_v18 }
 0x172   : > { %4955 = vmatmul.mubr.msk.bf16.gmra.mrb[48].mxu1 %vm1425_vm4, %v5874_v55 }
 0x173   : > { %4981 = vmatmul.mubr.msk.bf16.gmra.mrb[64].mxu0 %vm1425_vm4, %v5773_v48  ;;  %4994 = vmatprep.mubr.msk.bf16.mxu1 %vm1425_vm4, %v5905_v22 }
 0x174   : > { %4984 = vmatprep.mubr.msk.bf16.mxu0 %vm1425_vm4, %v5760_v63 }
 0x17a   : > { %4995 = vmatmul.mubr.msk.bf16.vlgmr.msra.gmra.mrb[52].mxu1 %vm1425_vm4, %v5489_v2 }
 0x17b   : > { %4985 = vmatmul.mubr.msk.bf16.gmra.mrb[68].mxu0 %vm1425_vm4, %v5836_v61  ;;  %4998 = vmatprep.mubr.msk.bf16.mxu1 %vm1425_vm4, %v5554_v54 }
 0x17c   : > { %4988 = vmatprep.mubr.msk.bf16.mxu0 %vm1425_vm4, %v5823_v51  ;;  %5061 = vmatpush3.bf16.msra.mxu1 %v2769_v43 }
 0x17d   : > { %5240 = vmatprep.subr.msk.bf16.mxu1 %vm1474_vm1, %v4610_v14 }
 0x182   : > { %4999 = vmatmul.mubr.msk.bf16.gmra.mrb[56].mxu1 %vm1425_vm4, %v5614_v45 }
 0x183   : > { %4989 = vmatmul.mubr.msk.bf16.gmra.mrb[72].mxu0 %vm1425_vm4, %v5884_v29  ;;  %5002 = vmatprep.mubr.msk.bf16.mxu1 %vm1425_vm4, %v5666_v6 }
 0x184   : > { %5028 = vmatprep.mubr.msk.bf16.mxu0 %vm1425_vm4, %v5899_v10 }
 0x18a   : > { %5003 = vmatmul.mubr.msk.bf16.gmra.mrb[60].mxu1 %vm1425_vm4, %v5727_v59 }
 0x18b   : > { %5006 = vmatprep.mubr.msk.bf16.mxu1 %vm1425_vm4, %v8385_v8  ;;  %5029 = vmatmul.mubr.msk.bf16.vlgmr.msra.gmra.mrb[76].mxu0 %vm1425_vm4, %v5508_v15 }
 0x18c   : > { %5095 = vmatpush3.bf16.msra.mxu0 %v2999_v20  ;;  %5032 = vmatprep.mubr.msk.bf16.mxu0 %vm1425_vm4, %v5543_v49  ;;  %v409_v20 = vand.u32 15, %v377_v9 }
 0x18d   : > { %5241 = vmatprep.subr.msk.bf16.mxu0 %vm1474_vm1, %v4627_v58  ;;  %v6232_v58 = vand.u32 15, %v441_v35 }
 0x18e   : > { %vm505_vm7 = vcmp.ge.s32.totalorder %v409_v20, 1 }
 0x18f   : > { %8401 = vst [vmem:[#allocation8_spill] sm:$0xff] %v6232_v58  ;;  %vm697_vm8 = vcmp.ge.s32.totalorder %v6232_v58, 1  ;;  %v381_v58 = vadd.s32 128, %v5451_v32 }
 0x192   : > { %5007 = vmatmul.mubr.msk.bf16.gmra.mrb[64].mxu1 %vm1425_vm4, %v8386_v41 }
 0x193   : > { %5010 = vmatprep.mubr.msk.bf16.mxu1 %vm1425_vm4, %v5864_v25  ;;  %5033 = vmatmul.mubr.msk.bf16.gmra.mrb[80].mxu0 %vm1425_vm4, %v5545_v50 }
 0x194   : > { %5036 = vmatprep.mubr.msk.bf16.mxu0 %vm1425_vm4, %v5595_v31 }
 0x19a   : > { %5011 = vmatmul.mubr.msk.bf16.gmra.mrb[68].mxu1 %vm1425_vm4, %v5911_v42 }
 0x19b   : > { %5014 = vmatprep.mubr.msk.bf16.mxu1 %vm1425_vm4, %v5950_v23  ;;  %5037 = vmatmul.mubr.msk.bf16.gmra.mrb[84].mxu0 %vm1425_vm4, %v8387_v60 }
 0x19c   : > { %5040 = vmatprep.mubr.msk.bf16.mxu0 %vm1425_vm4, %v8388_v38 }
 0x1a2   : > { %5015 = vmatmul.mubr.msk.bf16.gmra.mrb[72].mxu1 %vm1425_vm4, %v5952_v26 }
 0x1a3   : > { %5018 = vmatprep.mubr.msk.bf16.mxu1 %vm1425_vm4, %v5964_v34  ;;  %5041 = vmatmul.mubr.msk.bf16.gmra.mrb[88].mxu0 %vm1425_vm4, %v8389_v62 }
 0x1a4   : > { %5044 = vmatprep.mubr.msk.bf16.mxu0 %vm1425_vm4, %v8390_v30 }
 0x1aa   : > { %5019 = vmatmul.mubr.msk.bf16.gmra.mrb[76].mxu1 %vm1425_vm4, %v5981_v0 }
 0x1ab   : > { %5022 = vmatprep.mubr.msk.bf16.mxu1 %vm1425_vm4, %v5994_v53  ;;  %5045 = vmatmul.mubr.msk.bf16.gmra.mrb[92].mxu0 %vm1425_vm4, %v8391_v46 }
 0x1ac   : > { %5048 = vmatprep.mubr.msk.bf16.mxu0 %vm1425_vm4, %v8392_v11 }
 0x1b2   : > { %5023 = vmatmul.mubr.msk.bf16.gmra.mrb[80].mxu1 %vm1425_vm4, %v6000_v5 }
 0x1b3   : > { %5049 = vmatmul.mubr.msk.bf16.gmra.mrb[96].mxu0 %vm1425_vm4, %v8393_v33  ;;  %5062 = vmatprep.mubr.msk.bf16.mxu1 %vm1425_vm4, %v5489_v2  ;;  %v6312_v2 = vadd.s32 136, %v5451_v32 }
 0x1b4   : > { %5052 = vmatprep.mubr.msk.bf16.mxu0 %vm1425_vm4, %v5845_v17 }
 0x1b5   : > { %8420 = vst [vmem:[#allocation34_spill] sm:$0xff] %v6312_v2 }
 0x1ba   : > { %5063 = vmatmul.mubr.msk.bf16.vlgmr.msra.gmra.mrb[84].mxu1 %vm1425_vm4, %v5554_v54 }
 0x1bb   : > { %5053 = vmatmul.mubr.msk.bf16.gmra.mrb[100].mxu0 %vm1425_vm4, %v8394_v28  ;;  %5066 = vmatprep.mubr.msk.bf16.mxu1 %vm1425_vm4, %v5614_v45 }
 0x1bc   : > { %5056 = vmatprep.mubr.msk.bf16.mxu0 %vm1425_vm4, %v5909_v3  ;;  %5129 = vmatpush3.bf16.msra.mxu1 %v3261_v39 }
 0x1c2   : > { %5067 = vmatmul.mubr.msk.bf16.gmra.mrb[88].mxu1 %vm1425_vm4, %v5666_v6 }
 0x1c3   : > { %5057 = vmatmul.mubr.msk.bf16.gmra.mrb[104].mxu0 %vm1425_vm4, %v5907_v52  ;;  %5070 = vmatprep.mubr.msk.bf16.mxu1 %vm1425_vm4, %v5727_v59 }
 0x1c4   : > { %5096 = vmatprep.mubr.msk.bf16.mxu0 %vm1425_vm4, %v5508_v15 }
 0x1ca   : > { %5071 = vmatmul.mubr.msk.bf16.gmra.mrb[92].mxu1 %vm1425_vm4, %v8385_v8 }
 0x1cb   : > { %5074 = vmatprep.mubr.msk.bf16.mxu1 %vm1425_vm4, %v8386_v41  ;;  %5097 = vmatmul.mubr.msk.bf16.vlgmr.msra.gmra.mrb[108].mxu0 %vm1425_vm4, %v5543_v49 }
 0x1cc   : > { %5163 = vmatpush3.bf16.msra.mxu0 %v3491_v16  ;;  %5100 = vmatprep.mubr.msk.bf16.mxu0 %vm1425_vm4, %v5545_v50 }
 0x1d2   : > { %5075 = vmatmul.mubr.msk.bf16.gmra.mrb[96].mxu1 %vm1425_vm4, %v5864_v25 }
 0x1d3   : > { %5078 = vmatprep.mubr.msk.bf16.mxu1 %vm1425_vm4, %v5911_v42  ;;  %5101 = vmatmul.mubr.msk.bf16.gmra.mrb[112].mxu0 %vm1425_vm4, %v5595_v31  ;;  %v379_v31 = vadd.s32 112, %v5451_v32 }
 0x1d4   : > { %5104 = vmatprep.mubr.msk.bf16.mxu0 %vm1425_vm4, %v8387_v60  ;;  %v383_v60 = vadd.s32 144, %v5451_v32 }
 0x1d5   : > { %v443_v7 = vshra.s32 %v379_v31, 4  ;;  %v411_v57 = vand.u32 15, %v379_v31 }
 0x1d6   : > { %v415_v20 = vand.u32 15, %v383_v60 }
 0x1d7   : > { %v6228_v43 = vand.u32 15, %v443_v7  ;;  %vm507_vm5 = vcmp.ge.s32.totalorder %v411_v57, 1 }
 0x1d8   : > { %vm6307_vm10 = vcmp.ge.s32.totalorder %v415_v20, 1  ;;  %v369_v20 = vadd.s32 32, %v5451_v32 }
 0x1d9   : > { %8399 = vst [vmem:[#allocation6_spill] sm:$0xff] %v6228_v43  ;;  %vm699_vm6 = vcmp.ge.s32.totalorder %v6228_v43, 1 }
 0x1da   : > { %5079 = vmatmul.mubr.msk.bf16.gmra.mrb[100].mxu1 %vm1425_vm4, %v5950_v23 }
 0x1db   : > { %5082 = vmatprep.mubr.msk.bf16.mxu1 %vm1425_vm4, %v5952_v26  ;;  %5105 = vmatmul.mubr.msk.bf16.gmra.mrb[116].mxu0 %vm1425_vm4, %v8388_v38  ;;  %v444_v38 = vshra.s32 %v6224_v40, 4 }
 0x1dc   : > { %5108 = vmatprep.mubr.msk.bf16.mxu0 %vm1425_vm4, %v8389_v62  ;;  %v6244_v62 = vadd.s32 104, %v5451_v32 }
 0x1dd   : > { %v6260_v16 = vand.u32 15, %v444_v38 }
 0x1de   : > { %8402 = vst [vmem:[#allocation10_spill] sm:$0xff] %v6244_v62  ;;  %v442_v31 = vshra.s32 %v6244_v62, 4  ;;  %v6281_v62 = vadd.s32 152, %v5451_v32 }
 0x1df   : > { %8407 = vst [vmem:[#allocation23_spill] sm:$0xff] %v6260_v16  ;;  %vm700_vm9 = vcmp.ge.s32.totalorder %v6260_v16, 1  ;;  %v446_v16 = vshra.s32 %v6312_v2, 4 }
 0x1e0   : > { %8413 = vst [vmem:[#allocation29_spill] sm:$0xff] %v6281_v62  ;;  %v6298_v40 = vand.u32 15, %v442_v31  ;;  %v371_v31 = vadd.s32 48, %v5451_v32 }
 0x1e2   : > { %5083 = vmatmul.mubr.msk.bf16.gmra.mrb[104].mxu1 %vm1425_vm4, %v5964_v34  ;;  %8415 = vst [vmem:[#allocation31_spill] sm:$0xff] %v6298_v40 }
 0x1e3   : > { %5086 = vmatprep.mubr.msk.bf16.mxu1 %vm1425_vm4, %v5981_v0  ;;  %5109 = vmatmul.mubr.msk.bf16.gmra.mrb[120].mxu0 %vm1425_vm4, %v8390_v30  ;;  %v6201_v15 = vpop.f32.mrb[0].mxu1  ;;  %v367_v30 = vadd.s32 16, %v5451_v32 }
 0x1e4   : > { %5112 = vmatprep.mubr.msk.bf16.mxu0 %vm1425_vm4, %v8391_v46  ;;  %v6203_v49 = vpop.f32.mrb[1].mxu1 }
 0x1e5   : > { %v6205_v50 = vpop.f32.mrb[2].mxu1  ;;  %v431_v7 = vshra.s32 %v367_v30, 4 }
 0x1e6   : > { %v6208_v24 = vpop.f32.mrb[3].mxu1 }
 0x1ea   : > { %5087 = vmatmul.mubr.msk.bf16.gmra.mrb[108].mxu1 %vm1425_vm4, %v5994_v53 }
 0x1eb   : > { %5090 = vmatprep.mubr.msk.bf16.mxu1 %vm1425_vm4, %v6000_v5  ;;  %5113 = vmatmul.mubr.msk.bf16.gmra.mrb[124].mxu0 %vm1425_vm4, %v8392_v11  ;;  %v6219_v36 = vpop.f32.mrb[4].mxu1 }
 0x1ec   : > { %5116 = vmatprep.mubr.msk.bf16.mxu0 %vm1425_vm4, %v8393_v33  ;;  %8395 = vst [vmem:[#allocation9_spill] sm:$0xff] %v6219_v36  ;;  %v6221_v4 = vpop.f32.mrb[5].mxu1 }
 0x1ed   : > { %8396 = vst [vmem:[#allocation12_spill] sm:$0xff] %v6221_v4  ;;  %v6226_v13 = vpop.f32.mrb[6].mxu1 }
 0x1ee   : > { %8398 = vst [vmem:[#allocation5_spill] sm:$0xff] %v6226_v13  ;;  %v6230_v14 = vpop.f32.mrb[7].mxu1 }
 0x1ef   : > { %8400 = vst [vmem:[#allocation7_spill] sm:$0xff] %v6230_v14 }
 0x1f2   : > { %5091 = vmatmul.mubr.msk.bf16.gmra.mrb[112].mxu1 %vm1425_vm4, %v5905_v22 }
 0x1f3   : > { %5117 = vmatmul.mubr.msk.bf16.gmra.mrb[128].mxu0 %vm1425_vm4, %v5845_v17  ;;  %5130 = vmatprep.mubr.msk.bf16.mxu1 %vm1425_vm4, %v5463_v47  ;;  %v6249_v46 = vpop.f32.mrb[8].mxu1  ;;  %v447_v17 = vshra.s32 %v383_v60, 4  ;;  %v8176_v47 = vmov 0.0   ;;  %v399_v60 = vand.u32 15, %v367_v30  ;;  %v445_v30 = vshra.s32 %v381_v58, 4 }
 0x1f4   : > { %5120 = vmatprep.mubr.msk.bf16.mxu0 %vm1425_vm4, %v8394_v28  ;;  %8403 = vst [vmem:[#allocation11_spill] sm:$0xff] %v6249_v46  ;;  %v6252_v11 = vpop.f32.mrb[9].mxu1  ;;  %v6255_v33 = vsel %vm507_vm5, 1.0, %v8176_v47  ;;  %v6258_v39 = vsel %vm699_vm6, 1.0, %v8176_v47  ;;  %v6268_v35 = vsel %vm505_vm7, 1.0, %v8176_v47  ;;  %v6271_v57 = vsel %vm697_vm8, 1.0, %v8176_v47 }
 0x1f5   : > { %8404 = vst [vmem:[#allocation13_spill] sm:$0xff] %v6252_v11  ;;  %8405 = vst [vmem:[#allocation21_spill] sm:$0xff] %v6255_v33  ;;  %v6262_v28 = vpop.f32.mrb[10].mxu1  ;;  %v6276_v38 = vmul.f32 %v6258_v39, %v6255_v33  ;;  %v6278_v43 = vand.u32 15, %v447_v17  ;;  %v429_v47 = vshra.s32 %v5451_v32, 4  ;;  %v6292_v17 = vadd.s32 24, %v5451_v32 }
 0x1f6   : > { %8406 = vst [vmem:[#allocation22_spill] sm:$0xff] %v6258_v39  ;;  %8408 = vst [vmem:[#allocation24_spill] sm:$0xff] %v6262_v28  ;;  %v6265_v9 = vpop.f32.mrb[11].mxu1  ;;  %v6296_v33 = vmul.f32 %v6271_v57, %v6268_v35  ;;  %vm6324_vm12 = vcmp.ge.s32.totalorder %v399_v60, 1  ;;  %v397_v39 = vand.u32 15, %v5451_v32  ;;  %v6473_v46 = vadd.s32 88, %v5451_v32 }
 0x1f7   : > { %8409 = vst [vmem:[#allocation25_spill] sm:$0xff] %v6265_v9  ;;  %8410 = vst [vmem:[#allocation26_spill] sm:$0xff] %v6268_v35  ;;  %vm703_vm11 = vcmp.ge.s32.totalorder %v6278_v43, 1  ;;  %v432_v9 = vshra.s32 %v6292_v17, 4 }
 0x1f8   : > { %8411 = vst [vmem:[#allocation27_spill] sm:$0xff] %v6271_v57  ;;  %8412 = vst [vmem:[#allocation28_spill] sm:$0xff] %v6278_v43  ;;  %v8427_v43 = vmov 0.0   ;;  %vm493_vm15 = vcmp.ge.s32.totalorder %v397_v39, 1  ;;  %v403_v57 = vand.u32 15, %v371_v31  ;;  %v6387_v39 = vand.u32 15, %v446_v16 }
 0x1f9   : > { %8414 = vst [vmem:[#allocation30_spill] sm:$0xff] %v6292_v17  ;;  %v6349_v17 = vand.u32 15, %v445_v30  ;;  %v6407_v16 = vadd.s32 80, %v5451_v32  ;;  %8456 = vst [vmem:[#allocation61_spill] sm:$0xff] %v6473_v46 }
 0x1fa   : > { %5131 = vmatmul.mubr.msk.bf16.vlgmr.msra.gmra.mrb[116].mxu1 %vm1425_vm4, %v5529_v37  ;;  %v6302_v37 = vand.u32 15, %v431_v7  ;;  %v448_v7 = vshra.s32 %v6281_v62, 4  ;;  %v6340_v62 = vsel %vm6307_vm10, 1.0, %v8427_v43  ;;  %8440 = vst [vmem:[#allocation49_spill] sm:$0xff] %v6387_v39  ;;  %vm6423_vm6 = vcmp.ge.s32.totalorder %v403_v57, 1 }
 0x1fb   : > { %5121 = vmatmul.mubr.msk.bf16.gmra.mrb[132].mxu0 %vm1425_vm4, %v5909_v3  ;;  %5134 = vmatprep.mubr.msk.bf16.mxu1 %vm1425_vm4, %v5518_v27  ;;  %v6305_v3 = vadd.s32 8, %v5451_v32  ;;  %v6314_v35 = vpop.f32.mrb[12].mxu1  ;;  %8428 = vst [vmem:[#allocation39_spill] sm:$0xff] %v6340_v62  ;;  %8431 = vst [vmem:[#allocation42_spill] sm:$0xff] %v6349_v17  ;;  %vm701_vm8 = vcmp.ge.s32.totalorder %v6349_v17, 1  ;;  %v6438_v57 = vadd.s32 160, %v5451_v32 }
 0x1fc   : > { %5124 = vmatprep.mubr.msk.bf16.mxu0 %vm1425_vm4, %v5907_v52  ;;  %8416 = vst [vmem:[#allocation32_spill] sm:$0xff] %v6302_v37  ;;  %8421 = vst [vmem:[#allocation35_spill] sm:$0xff] %v6314_v35  ;;  %v413_v52 = vand.u32 15, %v381_v58  ;;  %v6319_v22 = vpop.f32.mrb[13].mxu1  ;;  %v6329_v35 = vand.u32 15, %v429_v47  ;;  %v6335_v58 = vsel %vm700_vm9, 1.0, %v8427_v43 }
 0x1fd   : > { %8417 = vst [vmem:[#allocation33_spill] sm:$0xff] %v6305_v3  ;;  %8422 = vst [vmem:[#allocation36_spill] sm:$0xff] %v6319_v22  ;;  %v6322_v5 = vpop.f32.mrb[14].mxu1  ;;  %vm687_vm13 = vcmp.ge.s32.totalorder %v6302_v37, 1  ;;  %v6347_v47 = vsel %vm703_vm11, 1.0, %v8427_v43  ;;  %v435_v22 = vshra.s32 %v371_v31, 4 }
 0x1fe   : > { %8423 = vst [vmem:[#allocation37_spill] sm:$0xff] %v6322_v5  ;;  %8426 = vst [vmem:[#allocation38_spill] sm:$0xff] %v6329_v35  ;;  %v6342_v60 = vpop.f32.mrb[15].mxu1  ;;  %v430_v5 = vshra.s32 %v6305_v3, 4  ;;  %vm6352_vm14 = vcmp.ge.s32.totalorder %v413_v52, 1  ;;  %v6356_v27 = vand.u32 15, %v448_v7 }
 0x1ff   : > { %8429 = vst [vmem:[#allocation40_spill] sm:$0xff] %v6342_v60  ;;  %8430 = vst [vmem:[#allocation41_spill] sm:$0xff] %v6347_v47  ;;  %v6363_v37 = vsel %vm6324_vm12, 1.0, %v8427_v43  ;;  %v433_v3 = vshra.s32 %v369_v20, 4  ;;  %v6370_v30 = vsel %vm687_vm13, 1.0, %v8427_v43  ;;  %vm685_vm2 = vcmp.ge.s32.totalorder %v6329_v35, 1 }
 0x200   : > { %8434 = vst [vmem:[#allocation43_spill] sm:$0xff] %v6356_v27  ;;  %8435 = vst [vmem:[#allocation44_spill] sm:$0xff] %v6363_v37  ;;  %v6373_v52 = vand.u32 15, %v432_v9  ;;  %v401_v7 = vand.u32 15, %v369_v20  ;;  %v6391_v9 = vand.u32 15, %v435_v22  ;;  %v6399_v20 = vsel %vm493_vm15, 1.0, %v8427_v43 }
 0x201   : > { %8445 = vst [vmem:[#allocation54_spill] sm:$0xff] %v6399_v20  ;;  %v6402_v2 = vsel %vm685_vm2, 1.0, %v8427_v43  ;;  %v6404_v28 = vand.u32 15, %v433_v3  ;;  %v6410_v22 = vadd.s32 176, %v5451_v32  ;;  %v407_v4 = vand.u32 15, %v6407_v16 }
 0x202   : > { %5135 = vmatmul.mubr.msk.bf16.gmra.mrb[120].mxu1 %vm1425_vm4, %v5582_v19  ;;  %8436 = vst [vmem:[#allocation45_spill] sm:$0xff] %v6373_v52  ;;  %v6377_v19 = vand.u32 15, %v430_v5  ;;  %8442 = vst [vmem:[#allocation51_spill] sm:$0xff] %v6391_v9  ;;  %vm688_vm3 = vcmp.ge.s32.totalorder %v6373_v52, 1  ;;  %vm6427_vm7 = vcmp.ge.s32.totalorder %v401_v7, 1  ;;  %v1639_v52 = vmul.f32 %v6402_v2, %v6399_v20 }
 0x203   : > { %5125 = vmatmul.mubr.msk.bf16.gmra.mrb[136].mxu0 %vm1425_vm4, %v5899_v10  ;;  %5138 = vmatprep.mubr.msk.bf16.mxu1 %vm1425_vm4, %v5569_v1  ;;  %v6380_v10 = vadd.s32 56, %v5451_v32  ;;  %v6385_v1 = vsel %vm6352_vm14, 1.0, %v8427_v43  ;;  %8446 = vst [vmem:[#allocation55_spill] sm:$0xff] %v6404_v28  ;;  %vm691_vm9 = vcmp.ge.s32.totalorder %v6391_v9, 1  ;;  %v6441_v7 = vsel %vm688_vm3, 1.0, %v8427_v43 }
 0x204   : > { %5164 = vmatprep.mubr.msk.bf16.mxu0 %vm1425_vm4, %v5554_v54  ;;  %8437 = vst [vmem:[#allocation46_spill] sm:$0xff] %v6377_v19  ;;  %8439 = vst [vmem:[#allocation48_spill] sm:$0xff] %v6385_v1  ;;  %v6394_v54 = vadd.s32 40, %v5451_v32  ;;  %vm686_vm5 = vcmp.ge.s32.totalorder %v6377_v19, 1  ;;  %vm689_vm10 = vcmp.ge.s32.totalorder %v6404_v28, 1  ;;  %v6457_v9 = vsel %vm6423_vm6, 1.0, %v8427_v43 }
 0x205   : > { %8438 = vst [vmem:[#allocation47_spill] sm:$0xff] %v6380_v10  ;;  %v6389_v35 = vpop.f32.mrb[16].mxu1  ;;  %v6448_v20 = vsel %vm686_vm5, 1.0, %v8427_v43  ;;  %8453 = vst [vmem:[#allocation58_spill] sm:$0xff] %v6457_v9  ;;  %v6476_v0 = vsel %vm689_vm10, 1.0, %v8427_v43  ;;  %vm698_vm11 = vcmp.ge.s32.totalorder %v6298_v40, 1 }
 0x206   : > { %8441 = vst [vmem:[#allocation50_spill] sm:$0xff] %v6389_v35  ;;  %8443 = vst [vmem:[#allocation52_spill] sm:$0xff] %v6394_v54  ;;  %v4894_v5 = vpop.f32.mrb[32].mxu0  ;;  %v6396_v31 = vpop.f32.mrb[17].mxu1  ;;  %v1641_v35 = vmul.f32 %v6370_v30, %v6363_v37  ;;  %v436_v37 = vshra.s32 %v6380_v10, 4  ;;  %v434_v19 = vshra.s32 %v6394_v54, 4 }
 0x207   : > { %8444 = vst [vmem:[#allocation53_spill] sm:$0xff] %v6396_v31  ;;  %v1512_v60 = vpop.f32.mrb[33].mxu0  ;;  %v6414_v11 = vpop.f32.mrb[18].mxu1  ;;  %v6418_v31 = vadd.s32 64, %v5451_v32  ;;  %v439_v10 = vshra.s32 %v6407_v16, 4  ;;  %vm704_vm12 = vcmp.ge.s32.totalorder %v6356_v27, 1 }
 0x208   : > { %8447 = vst [vmem:[#allocation56_spill] sm:$0xff] %v6414_v11  ;;  %v4895_v53 = vpop.f32.mrb[34].mxu0  ;;  %v6420_v3 = vpop.f32.mrb[19].mxu1  ;;  %v1673_v54 = vmul.f32 %v4894_v5, %v1641_v35  ;;  %v6478_v14 = vand.u32 15, %v434_v19  ;;  %v6481_v35 = vadd.s32 72, %v5451_v32  ;;  %vm503_vm15 = vcmp.ge.s32.totalorder %v407_v4, 1 }
 0x209   : > { %8448 = vst [vmem:[#allocation57_spill] sm:$0xff] %v6420_v3  ;;  %v1515_v11 = vpop.f32.mrb[35].mxu0  ;;  %v437_v28 = vshra.s32 %v6418_v31, 4  ;;  %v1671_v3 = vmul.f32 %v1639_v52, %v1512_v60  ;;  %v6487_v34 = vand.u32 15, %v439_v10  ;;  %v405_v26 = vand.u32 15, %v6418_v31 }
 0x20a   : > { %5139 = vmatmul.mubr.msk.bf16.gmra.mrb[124].mxu1 %vm1425_vm4, %v5642_v12  ;;  %v6462_v12 = vsel %vm6427_vm7, 1.0, %v8427_v43  ;;  %8457 = vst [vmem:[#allocation62_spill] sm:$0xff] %v6478_v14  ;;  %8458 = vst [vmem:[#allocation63_spill] sm:$0xff] %v6481_v35  ;;  %v1672_v60 = vmul.f32 %v6448_v20, %v1515_v11  ;;  %v440_v11 = vshra.s32 %v6473_v46, 4  ;;  %vm690_vm14 = vcmp.ge.s32.totalorder %v6478_v14, 1 }
 0x20b   : > { %5142 = vmatprep.mubr.msk.bf16.mxu1 %vm1425_vm4, %v5629_v21  ;;  %5165 = vmatmul.mubr.msk.bf16.vlgmr.msra.gmra.mrb[140].mxu0 %vm1425_vm4, %v5614_v45  ;;  %8454 = vst [vmem:[#allocation59_spill] sm:$0xff] %v6462_v12  ;;  %v6468_v21 = vsel %vm691_vm9, 1.0, %v8427_v43  ;;  %v6470_v45 = vand.u32 15, %v436_v37  ;;  %8459 = vst [vmem:[#allocation64_spill] sm:$0xff] %v6487_v34  ;;  %v6494_v55 = vand.u32 15, %v437_v28  ;;  %v1643_v16 = vmul.f32 %v6476_v0, %v6462_v12 }
 0x20c   : > { %5168 = vmatprep.mubr.msk.bf16.mxu0 %vm1425_vm4, %v5666_v6  ;;  %v1674_v6 = vmul.f32 %v4895_v53, %v6441_v7  ;;  %v438_v28 = vshra.s32 %v6481_v35, 4  ;;  %vm695_vm2 = vcmp.ge.s32.totalorder %v6487_v34, 1  ;;  %vm6526_vm3 = vcmp.ge.s32.totalorder %v405_v26, 1 }
 0x20d   : > { %8455 = vst [vmem:[#allocation60_spill] sm:$0xff] %v6470_v45  ;;  %v4928_v56 = vpop.f32.mrb[20].mxu1  ;;  %8460 = vst [vmem:[#allocation65_spill] sm:$0xff] %v6494_v55  ;;  %vm692_vm13 = vcmp.ge.s32.totalorder %v6470_v45, 1  ;;  %vm693_vm5 = vcmp.ge.s32.totalorder %v6494_v55, 1  ;;  %v6542_v17 = vsel %vm503_vm15, 1.0, %v8427_v43 }
 0x20e   : > { %v6484_v5 = vadd.f32 %v4928_v56, %v1673_v54  ;;  %v4898_v13 = vpop.f32.mrb[36].mxu0  ;;  %v1788_v37 = vpop.f32.mrb[21].mxu1  ;;  %v1645_v56 = vmul.f32 %v6468_v21, %v6457_v9  ;;  %8465 = vst [vmem:[#allocation68_spill] sm:$0xff] %v6542_v17  ;;  %v6545_v34 = vsel %vm695_vm2, 1.0, %v8427_v43  ;;  %v6547_v45 = vand.u32 15, %v438_v28 }
 0x20f   : > { %v6491_v52 = vadd.f32 %v1788_v37, %v1671_v3  ;;  %v1528_v19 = vpop.f32.mrb[37].mxu0  ;;  %v4929_v36 = vpop.f32.mrb[22].mxu1  ;;  %v451_v37 = vshra.s32 %v6410_v22, 4  ;;  %8466 = vst [vmem:[#allocation69_spill] sm:$0xff] %v6545_v34  ;;  %v1649_v9 = vmul.f32 %v6545_v34, %v6542_v17  ;;  %v417_v46 = vand.u32 15, %v6438_v57 }
 0x210   : > { %v6499_v53 = vadd.f32 %v4929_v36, %v1674_v6  ;;  %v4899_v10 = vpop.f32.mrb[38].mxu0  ;;  %v1791_v54 = vpop.f32.mrb[23].mxu1  ;;  %v6512_v36 = vsel %vm701_vm8, 1.0, %v8427_v43  ;;  %v419_v6 = vand.u32 15, %v6410_v22  ;;  %v1677_v4 = vmul.f32 %v4898_v13, %v1645_v56  ;;  %8467 = vst [vmem:[#allocation70_spill] sm:$0xff] %v6547_v45 }
 0x211   : > { %v6505_v3 = vadd.f32 %v1791_v54, %v1672_v60  ;;  %v1531_v31 = vpop.f32.mrb[39].mxu0  ;;  %8461 = vst [vmem:[#allocation66_spill] sm:$0xff] %v6512_v36  ;;  %v6520_v60 = vsel %vm692_vm13, 1.0, %v8427_v43  ;;  %v6535_v22 = vsel %vm690_vm14, 1.0, %v8427_v43  ;;  %v6571_v54 = vadd.s32 168, %v5451_v32 }
 0x212   : > { %5143 = vmatmul.mubr.msk.bf16.gmra.mrb[128].mxu1 %vm1425_vm4, %v5709_v44  ;;  %v449_v44 = vshra.s32 %v6438_v57, 4  ;;  %v1678_v13 = vmul.f32 %v4899_v10, %v6520_v60  ;;  %v1676_v10 = vmul.f32 %v6535_v22, %v1531_v31  ;;  %vm694_vm7 = vcmp.ge.s32.totalorder %v6547_v45, 1 }
 0x213   : > { %5146 = vmatprep.mubr.msk.bf16.mxu1 %vm1425_vm4, %v5696_v18  ;;  %5169 = vmatmul.mubr.msk.bf16.gmra.mrb[144].mxu0 %vm1425_vm4, %v5727_v59  ;;  %v6539_v18 = vand.u32 15, %v440_v11  ;;  %v1675_v59 = vmul.f32 %v1643_v16, %v1528_v19  ;;  %v6560_v19 = vsel %vm693_vm5, 1.0, %v8427_v43  ;;  %v6562_v11 = vand.u32 15, %v451_v37  ;;  %8472 = vst [vmem:[#allocation75_spill] sm:$0xff] %v6571_v54 }
 0x214   : > { %5172 = vmatprep.mubr.msk.bf16.mxu0 %vm1425_vm4, %v8385_v8  ;;  %v6555_v8 = vsel %vm6526_vm3, 1.0, %v8427_v43  ;;  %8469 = vst [vmem:[#allocation72_spill] sm:$0xff] %v6560_v19  ;;  %v6565_v16 = vadd.s32 184, %v5451_v32  ;;  %v6587_v17 = vsel %vm698_vm11, 1.0, %v8427_v43  ;;  %vm515_vm8 = vcmp.ge.s32.totalorder %v419_v6, 1 }
 0x215   : > { %8464 = vst [vmem:[#allocation67_spill] sm:$0xff] %v6539_v18  ;;  %v4932_v26 = vpop.f32.mrb[24].mxu1  ;;  %8468 = vst [vmem:[#allocation71_spill] sm:$0xff] %v6555_v8  ;;  %vm696_vm6 = vcmp.ge.s32.totalorder %v6539_v18, 1  ;;  %v6600_v57 = vsel %vm704_vm12, 1.0, %v8427_v43  ;;  %vm702_vm9 = vcmp.ge.s32.totalorder %v6387_v39, 1 }
 0x216   : > { %v6550_v56 = vadd.f32 %v4932_v26, %v1677_v4  ;;  %v4902_v14 = vpop.f32.mrb[40].mxu0  ;;  %v1804_v12 = vpop.f32.mrb[25].mxu1  ;;  %8470 = vst [vmem:[#allocation73_spill] sm:$0xff] %v6562_v11  ;;  %8471 = vst [vmem:[#allocation74_spill] sm:$0xff] %v6565_v16  ;;  %vm707_vm10 = vcmp.ge.s32.totalorder %v6562_v11, 1  ;;  %v452_v6 = vshra.s32 %v6565_v16, 4 }
 0x217   : > { %v6568_v28 = vadd.f32 %v1804_v12, %v1675_v59  ;;  %v1544_v4 = vpop.f32.mrb[41].mxu0  ;;  %v4933_v26 = vpop.f32.mrb[26].mxu1  ;;  %v1647_v12 = vmul.f32 %v6560_v19, %v6555_v8  ;;  %vm6628_vm11 = vcmp.ge.s32.totalorder %v417_v46, 1  ;;  %v450_v11 = vshra.s32 %v6571_v54, 4 }
 0x218   : > { %v6575_v55 = vadd.f32 %v4933_v26, %v1678_v13  ;;  %v4903_v37 = vpop.f32.mrb[42].mxu0  ;;  %v1807_v35 = vpop.f32.mrb[27].mxu1  ;;  %v6591_v13 = vmul.f32 %v6347_v47, %v6340_v62  ;;  %v6593_v26 = vand.u32 15, %v449_v44  ;;  %v1681_v44 = vmul.f32 %v4902_v14, %v1649_v9 }
 0x219   : > { %v6581_v31 = vadd.f32 %v1807_v35, %v1676_v10  ;;  %v1547_v59 = vpop.f32.mrb[43].mxu0  ;;  %v6607_v35 = vsel %vm696_vm6, 1.0, %v8427_v43  ;;  %v6621_v10 = vsel %vm694_vm7, 1.0, %v8427_v43  ;;  %v1679_v27 = vmul.f32 %v1647_v12, %v1544_v4 }
 0x21a   : > { %8473 = vst [vmem:[#allocation76_spill] sm:$0xff] %v6593_v26  ;;  %5147 = vmatmul.mubr.msk.bf16.gmra.mrb[132].mxu1 %vm1425_vm4, %v5773_v48  ;;  %v6615_v48 = vmul.f32 %v6512_v36, %v6385_v1  ;;  %v6634_v14 = vsel %vm707_vm10, 1.0, %v8427_v43  ;;  %vm705_vm12 = vcmp.ge.s32.totalorder %v6593_v26, 1  ;;  %v1682_v9 = vmul.f32 %v4903_v37, %v6607_v35 }
 0x21b   : > { %5150 = vmatprep.mubr.msk.bf16.mxu1 %vm1425_vm4, %v5760_v63  ;;  %5173 = vmatmul.mubr.msk.bf16.gmra.mrb[148].mxu0 %vm1425_vm4, %v8386_v41  ;;  %v6626_v63 = vsel %vm515_vm8, 1.0, %v8427_v43  ;;  %v391_v46 = vadd.s32 208, %v5451_v32  ;;  %v1680_v1 = vmul.f32 %v6621_v10, %v1547_v59  ;;  %v6645_v54 = vand.u32 15, %v452_v6 }
 0x21c   : > { %5176 = vmatprep.mubr.msk.bf16.mxu0 %vm1425_vm4, %v5864_v25  ;;  %8474 = vst [vmem:[#allocation77_spill] sm:$0xff] %v6626_v63  ;;  %v389_v16 = vadd.s32 192, %v5451_v32  ;;  %v6651_v47 = vand.u32 15, %v450_v11  ;;  %v6662_v6 = vsel %vm6628_vm11, 1.0, %v8427_v43  ;;  %v6682_v41 = vmul.f32 %v6634_v14, %v6626_v63 }
 0x21d   : > { %v4936_v40 = vpop.f32.mrb[28].mxu1  ;;  %8477 = vst [vmem:[#allocation78_spill] sm:$0xff] %v6645_v54  ;;  %8479 = vst [vmem:[#allocation80_spill] sm:$0xff] %v6662_v6  ;;  %vm708_vm13 = vcmp.ge.s32.totalorder %v6645_v54, 1 }
 0x21e   : > { %v6638_v45 = vadd.f32 %v4936_v40, %v1681_v44  ;;  %v1820_v25 = vpop.f32.mrb[29].mxu1  ;;  %v4962_v18 = vpop.f32.mrb[44].mxu0  ;;  %8478 = vst [vmem:[#allocation79_spill] sm:$0xff] %v6651_v47  ;;  %vm706_vm14 = vcmp.ge.s32.totalorder %v6651_v47, 1 }
 0x21f   : > { %v6642_v62 = vadd.f32 %v1820_v25, %v1679_v27  ;;  %v2083_v4 = vmul.f32 %v4962_v18, %v6370_v30  ;;  %v4937_v12 = vpop.f32.mrb[30].mxu1  ;;  %v1954_v8 = vpop.f32.mrb[45].mxu0 }
 0x220   : > { %v6648_v36 = vadd.f32 %v4937_v12, %v1682_v9  ;;  %v2081_v40 = vmul.f32 %v6402_v2, %v1954_v8  ;;  %v1823_v37 = vpop.f32.mrb[31].mxu1  ;;  %v4963_v44 = vpop.f32.mrb[46].mxu0  ;;  %v6667_v8 = vsel %vm705_vm12, 1.0, %v8427_v43  ;;  %v455_v9 = vshra.s32 %v391_v46, 4 }
 0x221   : > { %v6654_v59 = vadd.f32 %v2083_v4, %v6484_v5  ;;  %v6656_v27 = vadd.f32 %v1823_v37, %v1680_v1  ;;  %v2084_v18 = vmul.f32 %v4963_v44, %v6441_v7  ;;  %v1957_v25 = vpop.f32.mrb[47].mxu0  ;;  %v6678_v1 = vsel %vm702_vm9, 1.0, %v8427_v43 }
 0x222   : > { %v6670_v11 = vadd.f32 %v2081_v40, %v6491_v52  ;;  %v2082_v5 = vmul.f32 %v6448_v20, %v1957_v25  ;;  %5151 = vmatmul.mubr.msk.bf16.gmra.mrb[136].mxu1 %vm1425_vm4, %v5836_v61  ;;  %8480 = vst [vmem:[#allocation81_spill] sm:$0xff] %v6678_v1  ;;  %v1685_v61 = vmul.f32 %v6201_v15, %v6276_v38  ;;  %v453_v52 = vshra.s32 %v389_v16, 4 }
 0x223   : > { %v6685_v4 = vadd.f32 %v2084_v18, %v6499_v53  ;;  %5154 = vmatprep.mubr.msk.bf16.mxu1 %vm1425_vm4, %v5823_v51  ;;  %5177 = vmatmul.mubr.msk.bf16.gmra.mrb[152].mxu0 %vm1425_vm4, %v5911_v42  ;;  %v1683_v53 = vmul.f32 %v6296_v33, %v6203_v49  ;;  %v6703_v51 = vmul.f32 %v6667_v8, %v6662_v6  ;;  %v423_v42 = vand.u32 15, %v391_v46 }
 0x224   : > { %v6695_v12 = vadd.f32 %v2082_v5, %v6505_v3  ;;  %5180 = vmatprep.mubr.msk.bf16.mxu0 %vm1425_vm4, %v5950_v23  ;;  %v1686_v38 = vmul.f32 %v6205_v50, %v6335_v58  ;;  %v421_v40 = vand.u32 15, %v389_v16  ;;  %v6709_v3 = vadd.s32 216, %v5451_v32 }
 0x225   : > { %v4940_v15 = vpop.f32.mrb[32].mxu1  ;;  %v1684_v49 = vmul.f32 %v6587_v17, %v6208_v24  ;;  %v6715_v33 = vand.u32 15, %v455_v9  ;;  %v6723_v50 = vsel %vm708_vm13, 1.0, %v8427_v43  ;;  %v6725_v16 = vand.u32 15, %v453_v52 }
 0x226   : > { %8481 = vst [vmem:[#allocation82_spill] sm:$0xff] %v6709_v3  ;;  %v6711_v37 = vadd.f32 %v4940_v15, %v1685_v61  ;;  %v1836_v23 = vpop.f32.mrb[33].mxu1  ;;  %v4966_v44 = vpop.f32.mrb[48].mxu0  ;;  %vm6739_vm15 = vcmp.ge.s32.totalorder %v423_v42, 1  ;;  %vm6743_vm2 = vcmp.ge.s32.totalorder %v421_v40, 1  ;;  %v456_v42 = vshra.s32 %v6709_v3, 4 }
 0x227   : > { %8482 = vst [vmem:[#allocation83_spill] sm:$0xff] %v6715_v33  ;;  %v6717_v18 = vadd.f32 %v1836_v23, %v1683_v53  ;;  %v2087_v46 = vmul.f32 %v4966_v44, %v6468_v21  ;;  %v4941_v25 = vpop.f32.mrb[34].mxu1  ;;  %v1970_v5 = vpop.f32.mrb[49].mxu0  ;;  %8483 = vst [vmem:[#allocation84_spill] sm:$0xff] %v6725_v16  ;;  %v6731_v53 = vadd.s32 200, %v5451_v32  ;;  %vm711_vm3 = vcmp.ge.s32.totalorder %v6715_v33, 1 }
 0x228   : > { %v6727_v61 = vadd.f32 %v4941_v25, %v1686_v38  ;;  %v2085_v15 = vmul.f32 %v6476_v0, %v1970_v5  ;;  %v1839_v24 = vpop.f32.mrb[35].mxu1  ;;  %v4967_v9 = vpop.f32.mrb[50].mxu0  ;;  %vm709_vm5 = vcmp.ge.s32.totalorder %v6725_v16, 1  ;;  %v6797_v52 = vadd.s32 224, %v5451_v32 }
 0x229   : > { %8484 = vst [vmem:[#allocation85_spill] sm:$0xff] %v6731_v53  ;;  %v6734_v23 = vadd.f32 %v2087_v46, %v6550_v56  ;;  %v6736_v44 = vadd.f32 %v1839_v24, %v1684_v49  ;;  %v2088_v54 = vmul.f32 %v4967_v9, %v6520_v60  ;;  %v1973_v26 = vpop.f32.mrb[51].mxu0  ;;  %v6756_v56 = vsel %vm706_vm14, 1.0, %v8427_v43  ;;  %v8490_v49 = vld [vmem:[#allocation14_spill] sm:$0xff]  ;;  %v8494_v24 = vld [vmem:[#allocation17_spill] sm:$0xff] }
 0x22a   : > { %v6748_v25 = vadd.f32 %v2085_v15, %v6568_v28  ;;  %v2086_v5 = vmul.f32 %v6535_v22, %v1973_v26  ;;  %5155 = vmatmul.mubr.msk.bf16.gmra.mrb[140].mxu1 %vm1425_vm4, %v5884_v29  ;;  %v8491_v28 = vld [vmem:[#allocation16_spill] sm:$0xff]  ;;  %v8492_v29 = vld [vmem:[#allocation9_spill] sm:$0xff]  ;;  %v395_v46 = vadd.s32 240, %v5451_v32  ;;  %v6781_v9 = vsel %vm6739_vm15, 1.0, %v8427_v43 }
 0x22b   : > { %v6761_v40 = vadd.f32 %v2088_v54, %v6575_v55  ;;  %5158 = vmatprep.mubr.msk.bf16.mxu1 %vm1425_vm4, %v8490_v49  ;;  %5181 = vmatmul.mubr.msk.bf16.gmra.mrb[156].mxu0 %vm1425_vm4, %v8491_v28  ;;  %v1689_v26 = vmul.f32 %v8492_v29, %v6591_v13  ;;  %v8495_v55 = vld [vmem:[#allocation12_spill] sm:$0xff]  ;;  %8496 = vst [vmem:[#allocation16_spill] sm:$0xff] %v6781_v9  ;;  %v6786_v13 = vsel %vm6743_vm2, 1.0, %v8427_v43  ;;  %v454_v49 = vshra.s32 %v6731_v53, 4 }
 0x22c   : > { %v6772_v15 = vadd.f32 %v2086_v5, %v6581_v31  ;;  %5184 = vmatprep.mubr.msk.bf16.mxu0 %vm1425_vm4, %v8494_v24  ;;  %v1687_v54 = vmul.f32 %v6615_v48, %v8495_v55  ;;  %8497 = vst [vmem:[#allocation9_spill] sm:$0xff] %v6786_v13  ;;  %v8498_v5 = vld [vmem:[#allocation5_spill] sm:$0xff]  ;;  %v6794_v48 = vsel %vm711_vm3, 1.0, %v8427_v43  ;;  %v8499_v55 = vld [vmem:[#allocation7_spill] sm:$0xff]  ;;  %v6806_v39 = vsel %vm709_vm5, 1.0, %v8427_v43 }
 0x22d   : > { %8489 = vst [vmem:[#allocation86_spill] sm:$0xff] %v6761_v40  ;;  %v4944_v31 = vpop.f32.mrb[36].mxu1  ;;  %v1690_v28 = vmul.f32 %v8498_v5, %v6600_v57  ;;  %v1688_v47 = vmul.f32 %v6678_v1, %v8499_v55  ;;  %v6811_v53 = vand.u32 15, %v456_v42  ;;  %v6816_v40 = vand.u32 15, %v454_v49  ;;  %v3876_v42 = vld [vmem:[%s8148_s7] sm:$0xf] }
 0x22e   : > { %8493 = vst [vmem:[#allocation14_spill] sm:$0xff] %v6772_v15  ;;  %v6799_v29 = vadd.f32 %v4944_v31, %v1689_v26  ;;  %v1852_v24 = vpop.f32.mrb[37].mxu1  ;;  %v4970_v38 = vpop.f32.mrb[52].mxu0  ;;  %v459_v26 = vshra.s32 %v395_v46, 4  ;;  %5242 = vmatprep.subr.msk.bf16.mxu1 %vm1474_vm1, %v3876_v42 }
 0x22f   : > { %v6808_v5 = vadd.f32 %v1852_v24, %v1687_v54  ;;  %v2091_v33 = vmul.f32 %v4970_v38, %v6545_v34  ;;  %v4945_v6 = vpop.f32.mrb[38].mxu1  ;;  %v1986_v63 = vpop.f32.mrb[53].mxu0  ;;  %8500 = vst [vmem:[#allocation17_spill] sm:$0xff] %v6811_v53  ;;  %8501 = vst [vmem:[#allocation12_spill] sm:$0xff] %v6816_v40  ;;  %vm710_vm6 = vcmp.ge.s32.totalorder %v6816_v40, 1 }
 0x230   : > { %v6813_v31 = vadd.f32 %v4945_v6, %v1690_v28  ;;  %v2089_v3 = vmul.f32 %v6560_v19, %v1986_v63  ;;  %v1855_v15 = vpop.f32.mrb[39].mxu1  ;;  %v4971_v55 = vpop.f32.mrb[54].mxu0  ;;  %v457_v6 = vshra.s32 %v6797_v52, 4  ;;  %v8504_v28 = vld [vmem:[#allocation2_spill] sm:$0xff] }
 0x231   : > { %v6819_v16 = vadd.f32 %v2091_v33, %v6638_v45  ;;  %v6821_v54 = vadd.f32 %v1855_v15, %v1688_v47  ;;  %v2092_v24 = vmul.f32 %v4971_v55, %v6607_v35  ;;  %v1989_v38 = vpop.f32.mrb[55].mxu0  ;;  %v3926_v47 = vsel %vm1474_vm1, %v3876_v42, 0 }
 0x232   : > { %v6829_v63 = vadd.f32 %v2089_v3, %v6642_v62  ;;  %v2090_v49 = vmul.f32 %v6621_v10, %v1989_v38  ;;  %5159 = vmatmul.mubr.msk.bf16.gmra.mrb[144].mxu1 %vm1425_vm4, %v8504_v28  ;;  %v1665_v45 = vmul.f32 %v6794_v48, %v6781_v9  ;;  %v1663_v33 = vmul.f32 %v6806_v39, %v6786_v13  ;;  %v8506_v62 = vld [vmem:[#allocation18_spill] sm:$0xff]  ;;  %v8507_v3 = vld [vmem:[#allocation11_spill] sm:$0xff] }
 0x233   : > { %8502 = vst [vmem:[#allocation5_spill] sm:$0xff] %v6819_v16  ;;  %v427_v15 = vand.u32 15, %v395_v46  ;;  %v6841_v55 = vadd.f32 %v2092_v24, %v6648_v36  ;;  %5185 = vmatmul.mubr.msk.bf16.gmra.mrb[160].mxu0 %vm1425_vm4, %v8506_v62  ;;  %5197 = vmatpush3.bf16.msra.mxu1 %v3926_v47  ;;  %v1693_v38 = vmul.f32 %v8507_v3, %v6682_v41  ;;  %v6847_v28 = vand.u32 15, %v459_v26  ;;  %v8511_v13 = vld [vmem:[#allocation19_spill] sm:$0xff]  ;;  %v8512_v36 = vld [vmem:[#allocation13_spill] sm:$0xff]  ;;  %v8514_v24 = vld [vmem:[#allocation24_spill] sm:$0xff] }
 0x234   : > { %8503 = vst [vmem:[#allocation7_spill] sm:$0xff] %v6829_v63  ;;  %v6850_v42 = vadd.s32 248, %v5451_v32  ;;  %v6853_v9 = vadd.f32 %v2090_v49, %v6656_v27  ;;  %5188 = vmatprep.mubr.msk.bf16.mxu0 %vm1425_vm4, %v8511_v13  ;;  %v1691_v46 = vmul.f32 %v6703_v51, %v8512_v36  ;;  %vm712_vm1 = vcmp.ge.s32.totalorder %v6811_v53, 1  ;;  %v8516_v51 = vld [vmem:[#allocation25_spill] sm:$0xff]  ;;  %v8533_v53 = vld [vmem:[#allocation40_spill] sm:$0xff] }
 0x235   : > { %8505 = vst [vmem:[#allocation2_spill] sm:$0xff] %v6841_v55  ;;  %8508 = vst [vmem:[#allocation18_spill] sm:$0xff] %v6847_v28  ;;  %v6862_v41 = vadd.s32 232, %v5451_v32  ;;  %v4948_v26 = vpop.f32.mrb[40].mxu1  ;;  %v1694_v47 = vmul.f32 %v8514_v24, %v6723_v50  ;;  %v425_v27 = vand.u32 15, %v6797_v52  ;;  %v6867_v49 = vand.u32 15, %v457_v6 }
 0x236   : > { %8509 = vst [vmem:[#allocation11_spill] sm:$0xff] %v6850_v42  ;;  %8510 = vst [vmem:[#allocation87_spill] sm:$0xff] %v6853_v9  ;;  %v6869_v62 = vadd.f32 %v4948_v26, %v1693_v38  ;;  %v1868_v13 = vpop.f32.mrb[41].mxu1  ;;  %v4974_v3 = vpop.f32.mrb[56].mxu0  ;;  %v1692_v36 = vmul.f32 %v6756_v56, %v8516_v51  ;;  %vm6873_vm7 = vcmp.ge.s32.totalorder %v427_v15, 1  ;;  %v8519_v55 = vld [vmem:[#allocation22_spill] sm:$0xff] }
 0x237   : > { %8513 = vst [vmem:[#allocation19_spill] sm:$0xff] %v6862_v41  ;;  %8515 = vst [vmem:[#allocation13_spill] sm:$0xff] %v6867_v49  ;;  %v6877_v32 = vadd.f32 %v1868_v13, %v1691_v46  ;;  %v2095_v63 = vmul.f32 %v4974_v3, %v8519_v55  ;;  %v4949_v24 = vpop.f32.mrb[42].mxu1  ;;  %v2002_v16 = vpop.f32.mrb[57].mxu0  ;;  %vm715_vm8 = vcmp.ge.s32.totalorder %v6847_v28, 1  ;;  %v460_v52 = vshra.s32 %v6850_v42, 4 }
 0x238   : > { %v6882_v6 = vadd.f32 %v4949_v24, %v1694_v47  ;;  %v8520_v38 = vld [vmem:[#allocation27_spill] sm:$0xff]  ;;  %v1871_v19 = vpop.f32.mrb[43].mxu1  ;;  %v4975_v51 = vpop.f32.mrb[58].mxu0  ;;  %v458_v15 = vshra.s32 %v6862_v41, 4  ;;  %vm521_vm9 = vcmp.ge.s32.totalorder %v425_v27, 1  ;;  %vm713_vm10 = vcmp.ge.s32.totalorder %v6867_v49, 1 }
 0x239   : > { %v2093_v26 = vmul.f32 %v8520_v38, %v2002_v16  ;;  %v6887_v34 = vadd.f32 %v2095_v63, %v6711_v37  ;;  %v6889_v46 = vadd.f32 %v1871_v19, %v1692_v36  ;;  %v2096_v13 = vmul.f32 %v4975_v51, %v6335_v58  ;;  %v2005_v3 = vpop.f32.mrb[59].mxu0  ;;  %v8524_v63 = vld [vmem:[#allocation20_spill] sm:$0xff]  ;;  %v8525_v27 = vld [vmem:[#allocation35_spill] sm:$0xff]  ;;  %v8534_v41 = vld [vmem:[#allocation41_spill] sm:$0xff] }
 0x23a   : > { %v2094_v16 = vmul.f32 %v6587_v17, %v2005_v3  ;;  %v6900_v24 = vsel %vm712_vm1, 1.0, %v8427_v43  ;;  %v6905_v19 = vsel %vm710_vm6, 1.0, %v8427_v43  ;;  %v6910_v37 = vsel %vm6873_vm7, 1.0, %v8427_v43  ;;  %v8528_v9 = vld [vmem:[#allocation15_spill] sm:$0xff] }
 0x23b   : > { %v6894_v47 = vadd.f32 %v2093_v26, %v6717_v18  ;;  %8522 = vst [vmem:[#allocation25_spill] sm:$0xff] %v6910_v37  ;;  %v6913_v18 = vadd.f32 %v2096_v13, %v6727_v61  ;;  %5189 = vmatmul.mubr.msk.bf16.gmra.mrb[164].mxu0 %vm1425_vm4, %v8524_v63  ;;  %v1697_v36 = vmul.f32 %v8525_v27, %v1665_v45  ;;  %v6921_v26 = vsel %vm715_vm8, 1.0, %v8427_v43  ;;  %v8529_v61 = vld [vmem:[#allocation36_spill] sm:$0xff] }
 0x23c   : > { %v6923_v51 = vand.u32 15, %v460_v52  ;;  %v6926_v3 = vadd.f32 %v2094_v16, %v6736_v44  ;;  %5192 = vmatprep.mubr.msk.bf16.mxu0 %vm1425_vm4, %v8528_v9  ;;  %v1695_v13 = vmul.f32 %v1663_v33, %v8529_v61  ;;  %v6932_v49 = vsel %vm521_vm9, 1.0, %v8427_v43  ;;  %v8532_v52 = vld [vmem:[#allocation37_spill] sm:$0xff] }
 0x23d   : > { %8521 = vst [vmem:[#allocation24_spill] sm:$0xff] %v6894_v47  ;;  %8523 = vst [vmem:[#allocation22_spill] sm:$0xff] %v6913_v18  ;;  %v6935_v45 = vsel %vm713_vm10, 1.0, %v8427_v43  ;;  %v6937_v63 = vand.u32 15, %v458_v15  ;;  %v4952_v27 = vpop.f32.mrb[44].mxu1  ;;  %v1698_v28 = vmul.f32 %v8532_v52, %v6900_v24  ;;  %v1696_v9 = vmul.f32 %v6905_v19, %v8533_v53 }
 0x23e   : > { %8526 = vst [vmem:[#allocation27_spill] sm:$0xff] %v6923_v51  ;;  %8527 = vst [vmem:[#allocation20_spill] sm:$0xff] %v6926_v3  ;;  %v6941_v40 = vadd.f32 %v4952_v27, %v1697_v36  ;;  %v1884_v44 = vpop.f32.mrb[45].mxu1  ;;  %v4978_v16 = vpop.f32.mrb[60].mxu0  ;;  %v1669_v33 = vmul.f32 %v6921_v26, %v6910_v37  ;;  %v1667_v18 = vmul.f32 %v6935_v45, %v6932_v49  ;;  %vm716_vm11 = vcmp.ge.s32.totalorder %v6923_v51, 1  ;;  %v8535_v27 = vld [vmem:[#allocation66_spill] sm:$0xff] }
 0x23f   : > { %8530 = vst [vmem:[#allocation35_spill] sm:$0xff] %v6932_v49  ;;  %8531 = vst [vmem:[#allocation15_spill] sm:$0xff] %v6937_v63  ;;  %v6947_v61 = vadd.f32 %v1884_v44, %v1695_v13  ;;  %v2099_v42 = vmul.f32 %v4978_v16, %v8534_v41  ;;  %v4953_v15 = vpop.f32.mrb[46].mxu1  ;;  %v2018_v3 = vpop.f32.mrb[61].mxu0  ;;  %vm714_vm12 = vcmp.ge.s32.totalorder %v6937_v63, 1 }
 0x240   : > { %v6953_v36 = vadd.f32 %v4953_v15, %v1698_v28  ;;  %v2097_v52 = vmul.f32 %v8535_v27, %v2018_v3  ;;  %v1887_v47 = vpop.f32.mrb[47].mxu1  ;;  %v4979_v53 = vpop.f32.mrb[62].mxu0  ;;  %v8538_v15 = vld [vmem:[#allocation30_spill] sm:$0xff]  ;;  %v6969_v3 = vsel %vm716_vm11, 1.0, %v8427_v43 }
 0x241   : > { %v6958_v13 = vadd.f32 %v2099_v42, %v6799_v29  ;;  %v6960_v44 = vadd.f32 %v1887_v47, %v1696_v9  ;;  %v2100_v16 = vmul.f32 %v4979_v53, %v6600_v57  ;;  %v2021_v37 = vpop.f32.mrb[63].mxu0  ;;  %v400_v51 = vand.u32 15, %v8538_v15  ;;  %v8540_v29 = vld [vmem:[#allocation3_spill] sm:$0xff]  ;;  %v8541_v42 = vld [vmem:[#allocation33_spill] sm:$0xff]  ;;  %v8542_v9 = vld [vmem:[#allocation50_spill] sm:$0xff] }
 0x242   : > { %v6964_v49 = vadd.f32 %v2097_v52, %v6808_v5  ;;  %v2098_v28 = vmul.f32 %v6678_v1, %v2021_v37  ;;  %v398_v47 = vand.u32 15, %v8541_v42  ;;  %v1701_v53 = vmul.f32 %v8542_v9, %v1669_v33  ;;  %v8544_v52 = vld [vmem:[#allocation53_spill] sm:$0xff] }
 0x243   : > { %8536 = vst [vmem:[#allocation36_spill] sm:$0xff] %v6958_v13  ;;  %v6972_v63 = vadd.f32 %v2100_v16, %v6813_v31  ;;  %5193 = vmatmul.mubr.msk.bf16.gmra.mrb[168].mxu0 %vm1425_vm4, %v8540_v29  ;;  %v6979_v5 = vsel %vm714_vm12, 1.0, %v8427_v43  ;;  %v1699_v15 = vmul.f32 %v1667_v18, %v8544_v52  ;;  %v8545_v13 = vld [vmem:[#allocation56_spill] sm:$0xff]  ;;  %vm6989_vm13 = vcmp.le.s32.totalorder %v400_v51, 14  ;;  %v8548_v33 = vld [vmem:[#allocation57_spill] sm:$0xff]  ;;  %v8549_v51 = vld [vmem:[#allocation47_spill] sm:$0xff] }
 0x244   : > { %8537 = vst [vmem:[#allocation37_spill] sm:$0xff] %v6964_v49  ;;  %v6982_v37 = vadd.f32 %v2098_v28, %v6821_v54  ;;  %v1702_v31 = vmul.f32 %v8545_v13, %v6969_v3  ;;  %v1700_v9 = vmul.f32 %v6979_v5, %v8548_v33  ;;  %vm590_vm14 = vcmp.le.s32.totalorder %v398_v47, 14 }
 0x245   : > { %8539 = vst [vmem:[#allocation40_spill] sm:$0xff] %v6972_v63  ;;  %v4956_v49 = vpop.f32.mrb[48].mxu1  ;;  %v7011_v47 = vsel %vm6989_vm13, 1.0, %v8427_v43  ;;  %v7018_v33 = vsel %vm590_vm14, 1.0, %v8427_v43 }
 0x246   : > { %8543 = vst [vmem:[#allocation30_spill] sm:$0xff] %v6982_v37  ;;  %v6987_v16 = vadd.f32 %v4956_v49, %v1701_v53  ;;  %v1900_v63 = vpop.f32.mrb[49].mxu1  ;;  %v4982_v29 = vpop.f32.mrb[64].mxu0  ;;  %v404_v37 = vand.u32 15, %v8549_v51  ;;  %8550 = vst [vmem:[#allocation3_spill] sm:$0xff] %v7011_v47  ;;  %v2443_v42 = vmul.f32 %v6441_v7, %v7011_v47 }
 0x247   : > { %v6995_v27 = vadd.f32 %v1900_v63, %v1699_v15  ;;  %v2103_v54 = vmul.f32 %v4982_v29, %v6634_v14  ;;  %v4957_v18 = vpop.f32.mrb[50].mxu1  ;;  %v2034_v28 = vpop.f32.mrb[65].mxu0  ;;  %8551 = vst [vmem:[#allocation33_spill] sm:$0xff] %v7018_v33 }
 0x248   : > { %v6998_v52 = vadd.f32 %v4957_v18, %v1702_v31  ;;  %v2101_v49 = vmul.f32 %v6667_v8, %v2034_v28  ;;  %v1903_v13 = vpop.f32.mrb[51].mxu1  ;;  %v4983_v53 = vpop.f32.mrb[66].mxu0  ;;  %vm596_vm15 = vcmp.le.s32.totalorder %v404_v37, 14 }
 0x249   : > { %v7003_v41 = vadd.f32 %v2103_v54, %v6869_v62  ;;  %v7005_v1 = vadd.f32 %v1903_v13, %v1700_v9  ;;  %v2104_v63 = vmul.f32 %v4983_v53, %v6723_v50  ;;  %v2037_v15 = vpop.f32.mrb[67].mxu0  ;;  %v8552_v9 = vld [vmem:[#allocation52_spill] sm:$0xff] }
 0x24a   : > { %v7014_v31 = vadd.f32 %v2101_v49, %v6877_v32  ;;  %v2102_v29 = vmul.f32 %v6756_v56, %v2037_v15  ;;  %v402_v54 = vand.u32 15, %v8552_v9  ;;  %v2441_v32 = vmul.f32 %v6448_v20, %v7018_v33  ;;  %v8554_v9 = vld [vmem:[#allocation61_spill] sm:$0xff] }
 0x24b   : > { %v7021_v62 = vadd.f32 %v2104_v63, %v6882_v6 }
 0x24c   : > { %v7025_v18 = vadd.f32 %v2102_v29, %v6889_v46  ;;  %v7035_v46 = vsel %vm596_vm15, 1.0, %v8427_v43  ;;  %vm594_vm2 = vcmp.le.s32.totalorder %v402_v54, 14 }
 0x24d   : > { %v4996_v28 = vpop.f32.mrb[52].mxu1  ;;  %8553 = vst [vmem:[#allocation50_spill] sm:$0xff] %v7035_v46 }
 0x24e   : > { %v2474_v49 = vmul.f32 %v4996_v28, %v6370_v30  ;;  %v4986_v13 = vpop.f32.mrb[68].mxu0  ;;  %v2313_v53 = vpop.f32.mrb[53].mxu1  ;;  %v408_v28 = vand.u32 15, %v8554_v9 }
 0x24f   : > { %v2107_v6 = vmul.f32 %v4986_v13, %v6794_v48  ;;  %v2472_v51 = vmul.f32 %v6402_v2, %v2313_v53  ;;  %v2050_v63 = vpop.f32.mrb[69].mxu0  ;;  %v4997_v15 = vpop.f32.mrb[54].mxu1 }
 0x250   : > { %v7038_v7 = vadd.f32 %v2474_v49, %v6654_v59  ;;  %v2105_v37 = vmul.f32 %v6806_v39, %v2050_v63  ;;  %v2475_v20 = vmul.f32 %v4997_v15, %v2443_v42  ;;  %v4987_v29 = vpop.f32.mrb[70].mxu0  ;;  %v2316_v30 = vpop.f32.mrb[55].mxu1  ;;  %v7054_v42 = vsel %vm594_vm2, 1.0, %v8427_v43 }
 0x251   : > { %v7043_v13 = vadd.f32 %v2107_v6, %v6941_v40  ;;  %v7046_v2 = vadd.f32 %v2472_v51, %v6670_v11  ;;  %v2108_v53 = vmul.f32 %v4987_v29, %v6900_v24  ;;  %v2473_v33 = vmul.f32 %v2441_v32, %v2316_v30  ;;  %v2053_v54 = vpop.f32.mrb[71].mxu0  ;;  %8555 = vst [vmem:[#allocation53_spill] sm:$0xff] %v7054_v42  ;;  %v8556_v6 = vld [vmem:[#allocation63_spill] sm:$0xff] }
 0x252   : > { %v7050_v59 = vadd.f32 %v2105_v37, %v6947_v61  ;;  %v2106_v49 = vmul.f32 %v6905_v19, %v2053_v54  ;;  %v2507_v63 = vadd.f32 %v2475_v20, %v6685_v4  ;;  %v406_v11 = vand.u32 15, %v8556_v6 }
 0x253   : > { %v7058_v40 = vadd.f32 %v2108_v53, %v6953_v36  ;;  %v2505_v51 = vadd.f32 %v2473_v33, %v6695_v12  ;;  %v2447_v61 = vmul.f32 %v6520_v60, %v7035_v46  ;;  %vm600_vm3 = vcmp.le.s32.totalorder %v408_v28, 14  ;;  %v8558_v53 = vld [vmem:[#allocation4_spill] sm:$0xff] }
 0x254   : > { %v7063_v32 = vadd.f32 %v2106_v49, %v6960_v44  ;;  %v2445_v37 = vmul.f32 %v6535_v22, %v7054_v42  ;;  %v7073_v44 = vsel %vm600_vm3, 1.0, %v8427_v43  ;;  %vm598_vm5 = vcmp.le.s32.totalorder %v406_v11, 14  ;;  %v8570_v42 = vld [vmem:[#allocation7_spill] sm:$0xff] }
 0x255   : > { %v5000_v15 = vpop.f32.mrb[56].mxu1  ;;  %8557 = vst [vmem:[#allocation56_spill] sm:$0xff] %v7073_v44  ;;  %v412_v54 = vand.u32 15, %v8558_v53  ;;  %v8564_v53 = vld [vmem:[#allocation72_spill] sm:$0xff] }
 0x256   : > { %v2478_v4 = vmul.f32 %v5000_v15, %v6468_v21  ;;  %v4990_v20 = vpop.f32.mrb[72].mxu0  ;;  %v2329_v36 = vpop.f32.mrb[57].mxu1 }
 0x257   : > { %v2111_v29 = vmul.f32 %v4990_v20, %v6921_v26  ;;  %v2476_v30 = vmul.f32 %v6476_v0, %v2329_v36  ;;  %v2066_v12 = vpop.f32.mrb[73].mxu0  ;;  %v5001_v33 = vpop.f32.mrb[58].mxu1  ;;  %v8560_v20 = vld [vmem:[#allocation86_spill] sm:$0xff]  ;;  %vm604_vm1 = vcmp.le.s32.totalorder %v412_v54, 14 }
 0x258   : > { %v7076_v60 = vadd.f32 %v2478_v4, %v6734_v23  ;;  %v2109_v9 = vmul.f32 %v6935_v45, %v2066_v12  ;;  %v2479_v22 = vmul.f32 %v5001_v33, %v2447_v61  ;;  %v4991_v28 = vpop.f32.mrb[74].mxu0  ;;  %v2332_v21 = vpop.f32.mrb[59].mxu1  ;;  %v7092_v61 = vsel %vm598_vm5, 1.0, %v8427_v43 }
 0x259   : > { %v7081_v49 = vadd.f32 %v2111_v29, %v6987_v16  ;;  %v7084_v0 = vadd.f32 %v2476_v30, %v6748_v25  ;;  %v2112_v6 = vmul.f32 %v4991_v28, %v6969_v3  ;;  %v2477_v15 = vmul.f32 %v2445_v37, %v2332_v21  ;;  %v2069_v11 = vpop.f32.mrb[75].mxu0  ;;  %8559 = vst [vmem:[#allocation57_spill] sm:$0xff] %v7092_v61  ;;  %v8561_v29 = vld [vmem:[#allocation10_spill] sm:$0xff]  ;;  %v8563_v28 = vld [vmem:[#allocation69_spill] sm:$0xff] }
 0x25a   : > { %v7088_v23 = vadd.f32 %v2109_v9, %v6995_v27  ;;  %v2110_v4 = vmul.f32 %v6979_v5, %v2069_v11  ;;  %v2511_v36 = vadd.f32 %v2479_v22, %v8560_v20  ;;  %v410_v25 = vand.u32 15, %v8561_v29  ;;  %v8562_v30 = vld [vmem:[#allocation14_spill] sm:$0xff]  ;;  %v8565_v11 = vld [vmem:[#allocation44_spill] sm:$0xff] }
 0x25b   : > { %v7096_v16 = vadd.f32 %v2112_v6, %v6998_v52  ;;  %v2509_v12 = vadd.f32 %v2477_v15, %v8562_v30  ;;  %v2451_v27 = vmul.f32 %v6607_v35, %v7073_v44  ;;  %v2449_v9 = vmul.f32 %v6621_v10, %v7092_v61  ;;  %v8567_v35 = vld [vmem:[#allocation5_spill] sm:$0xff]  ;;  %v8568_v30 = vld [vmem:[#allocation54_spill] sm:$0xff] }
 0x25c   : > { %v7101_v37 = vadd.f32 %v2110_v4, %v7005_v1  ;;  %v7111_v1 = vsel %vm604_vm1, 1.0, %v8427_v43  ;;  %vm602_vm6 = vcmp.le.s32.totalorder %v410_v25, 14 }
 0x25d   : > { %v5004_v33 = vpop.f32.mrb[60].mxu1  ;;  %8566 = vst [vmem:[#allocation47_spill] sm:$0xff] %v7111_v1 }
 0x25e   : > { %v2482_v22 = vmul.f32 %v5004_v33, %v8563_v28  ;;  %v2345_v21 = vpop.f32.mrb[61].mxu1  ;;  %v5030_v52 = vpop.f32.mrb[76].mxu0  ;;  %v8569_v28 = vld [vmem:[#allocation29_spill] sm:$0xff] }
 0x25f   : > { %v2480_v6 = vmul.f32 %v8564_v53, %v2345_v21  ;;  %v2704_v20 = vmul.f32 %v5030_v52, %v8565_v11  ;;  %v5005_v15 = vpop.f32.mrb[62].mxu1  ;;  %v2575_v29 = vpop.f32.mrb[77].mxu0  ;;  %v416_v44 = vand.u32 15, %v8569_v28 }
 0x260   : > { %v7114_v54 = vadd.f32 %v2482_v22, %v8567_v35  ;;  %v2483_v4 = vmul.f32 %v5005_v15, %v2451_v27  ;;  %v2702_v10 = vmul.f32 %v8568_v30, %v2575_v29  ;;  %v2348_v61 = vpop.f32.mrb[63].mxu1  ;;  %v5031_v33 = vpop.f32.mrb[78].mxu0  ;;  %v7129_v27 = vsel %vm602_vm6, 1.0, %v8427_v43  ;;  %v8572_v22 = vld [vmem:[#allocation2_spill] sm:$0xff] }
 0x261   : > { %v7119_v21 = vadd.f32 %v2480_v6, %v8570_v42  ;;  %v2481_v52 = vmul.f32 %v2449_v9, %v2348_v61  ;;  %v7121_v53 = vadd.f32 %v5031_v33, %v2507_v63  ;;  %v2578_v11 = vpop.f32.mrb[79].mxu0  ;;  %v7124_v46 = vadd.f32 %v2704_v20, %v7038_v7  ;;  %8571 = vst [vmem:[#allocation52_spill] sm:$0xff] %v7129_v27  ;;  %v8573_v35 = vld [vmem:[#allocation34_spill] sm:$0xff]  ;;  %v8574_v6 = vld [vmem:[#allocation87_spill] sm:$0xff] }
 0x262   : > { %v7126_v25 = vadd.f32 %v2578_v11, %v2505_v51  ;;  %v2515_v15 = vadd.f32 %v2483_v4, %v8572_v22  ;;  %v7133_v29 = vadd.f32 %v2702_v10, %v7046_v2  ;;  %v414_v42 = vand.u32 15, %v8573_v35  ;;  %v8575_v2 = vld [vmem:[#allocation58_spill] sm:$0xff]  ;;  %v8577_v22 = vld [vmem:[#allocation59_spill] sm:$0xff] }
 0x263   : > { %v2513_v61 = vadd.f32 %v2481_v52, %v8574_v6  ;;  %v2455_v63 = vmul.f32 %v6335_v58, %v7111_v1  ;;  %vm608_vm7 = vcmp.le.s32.totalorder %v416_v44, 14  ;;  %v2453_v51 = vmul.f32 %v6587_v17, %v7129_v27  ;;  %v8578_v6 = vld [vmem:[#allocation74_spill] sm:$0xff]  ;;  %v8579_v27 = vld [vmem:[#allocation24_spill] sm:$0xff] }
 0x264   : > { %v7145_v52 = vsel %vm608_vm7, 1.0, %v8427_v43  ;;  %vm606_vm8 = vcmp.le.s32.totalorder %v414_v42, 14 }
 0x265   : > { %v5008_v7 = vpop.f32.mrb[64].mxu1  ;;  %8576 = vst [vmem:[#allocation61_spill] sm:$0xff] %v7145_v52 }
 0x266   : > { %v2486_v9 = vmul.f32 %v5008_v7, %v8519_v55  ;;  %v2361_v11 = vpop.f32.mrb[65].mxu1  ;;  %v5034_v20 = vpop.f32.mrb[80].mxu0  ;;  %v420_v7 = vand.u32 15, %v8578_v6 }
 0x267   : > { %v2484_v4 = vmul.f32 %v8520_v38, %v2361_v11  ;;  %v2708_v10 = vmul.f32 %v5034_v20, %v8575_v2  ;;  %v5009_v33 = vpop.f32.mrb[66].mxu1  ;;  %v2591_v28 = vpop.f32.mrb[81].mxu0 }
 0x268   : > { %v7148_v58 = vadd.f32 %v2486_v9, %v6887_v34  ;;  %v2487_v44 = vmul.f32 %v5009_v33, %v2455_v63  ;;  %v2706_v17 = vmul.f32 %v8577_v22, %v2591_v28  ;;  %v2364_v35 = vpop.f32.mrb[67].mxu1  ;;  %v5035_v55 = vpop.f32.mrb[82].mxu0  ;;  %v7163_v34 = vsel %vm606_vm8, 1.0, %v8427_v43  ;;  %v8583_v63 = vld [vmem:[#allocation22_spill] sm:$0xff]  ;;  %v8584_v28 = vld [vmem:[#allocation75_spill] sm:$0xff] }
 0x269   : > { %v7153_v38 = vadd.f32 %v2484_v4, %v8579_v27  ;;  %v2485_v11 = vmul.f32 %v2453_v51, %v2364_v35  ;;  %v7155_v20 = vadd.f32 %v5035_v55, %v2511_v36  ;;  %v2594_v1 = vpop.f32.mrb[83].mxu0  ;;  %v7158_v2 = vadd.f32 %v2708_v10, %v7076_v60  ;;  %8582 = vst [vmem:[#allocation86_spill] sm:$0xff] %v7163_v34  ;;  %v8585_v4 = vld [vmem:[#allocation20_spill] sm:$0xff]  ;;  %v8587_v10 = vld [vmem:[#allocation41_spill] sm:$0xff] }
 0x26a   : > { %v7160_v42 = vadd.f32 %v2594_v1, %v2509_v12  ;;  %v2519_v9 = vadd.f32 %v2487_v44, %v8583_v63  ;;  %v7167_v33 = vadd.f32 %v2706_v17, %v7084_v0  ;;  %v418_v27 = vand.u32 15, %v8584_v28  ;;  %v8586_v12 = vld [vmem:[#allocation81_spill] sm:$0xff]  ;;  %v8588_v44 = vld [vmem:[#allocation66_spill] sm:$0xff]  ;;  %v8589_v0 = vld [vmem:[#allocation68_spill] sm:$0xff] }
 0x26b   : > { %8580 = vst [vmem:[#allocation63_spill] sm:$0xff] %v7155_v20  ;;  %v2517_v51 = vadd.f32 %v2485_v11, %v8585_v4  ;;  %v2459_v36 = vmul.f32 %v6600_v57, %v7145_v52  ;;  %vm612_vm9 = vcmp.le.s32.totalorder %v420_v7, 14  ;;  %v2457_v1 = vmul.f32 %v8586_v12, %v7163_v34  ;;  %v8591_v57 = vld [vmem:[#allocation36_spill] sm:$0xff]  ;;  %v8592_v52 = vld [vmem:[#allocation71_spill] sm:$0xff] }
 0x26c   : > { %8581 = vst [vmem:[#allocation4_spill] sm:$0xff] %v7160_v42  ;;  %v7179_v11 = vsel %vm612_vm9, 1.0, %v8427_v43  ;;  %vm610_vm10 = vcmp.le.s32.totalorder %v418_v27, 14  ;;  %v8594_v42 = vld [vmem:[#allocation37_spill] sm:$0xff] }
 0x26d   : > { %v5012_v60 = vpop.f32.mrb[68].mxu1  ;;  %8590 = vst [vmem:[#allocation10_spill] sm:$0xff] %v7179_v11 }
 0x26e   : > { %v2490_v35 = vmul.f32 %v5012_v60, %v8587_v10  ;;  %v2377_v55 = vpop.f32.mrb[69].mxu1  ;;  %v5038_v6 = vpop.f32.mrb[84].mxu0  ;;  %v8593_v10 = vld [vmem:[#allocation82_spill] sm:$0xff] }
 0x26f   : > { %v2488_v63 = vmul.f32 %v8588_v44, %v2377_v55  ;;  %v2712_v17 = vmul.f32 %v5038_v6, %v8589_v0  ;;  %v5013_v22 = vpop.f32.mrb[70].mxu1  ;;  %v2607_v28 = vpop.f32.mrb[85].mxu0  ;;  %v424_v30 = vand.u32 15, %v8593_v10 }
 0x270   : > { %v7182_v7 = vadd.f32 %v2490_v35, %v8591_v57  ;;  %v2491_v4 = vmul.f32 %v5013_v22, %v2459_v36  ;;  %v2710_v12 = vmul.f32 %v8592_v52, %v2607_v28  ;;  %v2380_v34 = vpop.f32.mrb[71].mxu1  ;;  %v5039_v60 = vpop.f32.mrb[86].mxu0  ;;  %v7197_v22 = vsel %vm610_vm10, 1.0, %v8427_v43  ;;  %v8596_v36 = vld [vmem:[#allocation40_spill] sm:$0xff]  ;;  %v8597_v57 = vld [vmem:[#allocation85_spill] sm:$0xff] }
 0x271   : > { %v7187_v55 = vadd.f32 %v2488_v63, %v8594_v42  ;;  %v2489_v6 = vmul.f32 %v2457_v1, %v2380_v34  ;;  %v7189_v44 = vadd.f32 %v5039_v60, %v2515_v15  ;;  %v2610_v0 = vpop.f32.mrb[87].mxu0  ;;  %v7192_v20 = vadd.f32 %v2712_v17, %v7114_v54  ;;  %8595 = vst [vmem:[#allocation14_spill] sm:$0xff] %v7197_v22  ;;  %v8598_v63 = vld [vmem:[#allocation30_spill] sm:$0xff] }
 0x272   : > { %v7194_v27 = vadd.f32 %v2610_v0, %v2513_v61  ;;  %v2523_v35 = vadd.f32 %v2491_v4, %v8596_v36  ;;  %v7201_v28 = vadd.f32 %v2710_v12, %v7119_v21  ;;  %v422_v42 = vand.u32 15, %v8597_v57  ;;  %v8599_v21 = vld [vmem:[#allocation21_spill] sm:$0xff]  ;;  %v8601_v36 = vld [vmem:[#allocation26_spill] sm:$0xff] }
 0x273   : > { %v2521_v34 = vadd.f32 %v2489_v6, %v8598_v63  ;;  %v2463_v15 = vmul.f32 %v6723_v50, %v7179_v11  ;;  %vm616_vm11 = vcmp.le.s32.totalorder %v424_v30, 14  ;;  %v2461_v61 = vmul.f32 %v6756_v56, %v7197_v22  ;;  %v8602_v63 = vld [vmem:[#allocation11_spill] sm:$0xff] }
 0x274   : > { %v7213_v6 = vsel %vm616_vm11, 1.0, %v8427_v43  ;;  %vm614_vm12 = vcmp.le.s32.totalorder %v422_v42, 14 }
 0x275   : > { %v5016_v54 = vpop.f32.mrb[72].mxu1  ;;  %8600 = vst [vmem:[#allocation69_spill] sm:$0xff] %v7213_v6 }
 0x276   : > { %v2494_v1 = vmul.f32 %v5016_v54, %v6634_v14  ;;  %v2393_v0 = vpop.f32.mrb[73].mxu1  ;;  %v5042_v17 = vpop.f32.mrb[88].mxu0  ;;  %v428_v54 = vand.u32 15, %v8602_v63 }
 0x277   : > { %v2492_v4 = vmul.f32 %v6667_v8, %v2393_v0  ;;  %v2716_v12 = vmul.f32 %v5042_v17, %v8599_v21  ;;  %v5017_v60 = vpop.f32.mrb[74].mxu1  ;;  %v2623_v10 = vpop.f32.mrb[89].mxu0 }
 0x278   : > { %v7216_v50 = vadd.f32 %v2494_v1, %v7003_v41  ;;  %v2495_v30 = vmul.f32 %v5017_v60, %v2463_v15  ;;  %v2714_v56 = vmul.f32 %v8601_v36, %v2623_v10  ;;  %v2396_v57 = vpop.f32.mrb[75].mxu1  ;;  %v5043_v14 = vpop.f32.mrb[90].mxu0  ;;  %v7229_v41 = vsel %vm614_vm12, 1.0, %v8427_v43  ;;  %v8604_v60 = vld [vmem:[#allocation19_spill] sm:$0xff] }
 0x279   : > { %v2524_v8 = vadd.f32 %v2492_v4, %v7014_v31  ;;  %v2493_v0 = vmul.f32 %v2461_v61, %v2396_v57  ;;  %v7221_v17 = vadd.f32 %v5043_v14, %v2519_v9  ;;  %v2626_v22 = vpop.f32.mrb[91].mxu0  ;;  %v7224_v11 = vadd.f32 %v2716_v12, %v7148_v58  ;;  %8603 = vst [vmem:[#allocation72_spill] sm:$0xff] %v7229_v41 }
 0x27a   : > { %v7226_v42 = vadd.f32 %v2626_v22, %v2517_v51  ;;  %v2527_v15 = vadd.f32 %v2495_v30, %v7021_v62  ;;  %v7233_v1 = vadd.f32 %v2714_v56, %v7153_v38  ;;  %v426_v10 = vand.u32 15, %v8604_v60  ;;  %v8605_v38 = vld [vmem:[#allocation39_spill] sm:$0xff] }
 0x27b   : > { %v2525_v31 = vadd.f32 %v2493_v0, %v7025_v18  ;;  %v2467_v9 = vmul.f32 %v6900_v24, %v7213_v6  ;;  %v2465_v58 = vmul.f32 %v6905_v19, %v7229_v41  ;;  %vm620_vm13 = vcmp.le.s32.totalorder %v428_v54, 14  ;;  %v8606_v24 = vld [vmem:[#allocation48_spill] sm:$0xff] }
 0x27c   : > { %vm618_vm14 = vcmp.le.s32.totalorder %v426_v10, 14  ;;  %v7247_v19 = vsel %vm620_vm13, 1.0, %v8427_v43 }
 0x27d   : > { %v5020_v61 = vpop.f32.mrb[76].mxu1  ;;  %8607 = vst [vmem:[#allocation5_spill] sm:$0xff] %v7247_v19 }
 0x27e   : > { %v2498_v51 = vmul.f32 %v5020_v61, %v6794_v48  ;;  %v2409_v22 = vpop.f32.mrb[77].mxu1  ;;  %v5046_v4 = vpop.f32.mrb[92].mxu0 }
 0x27f   : > { %v2496_v62 = vmul.f32 %v6806_v39, %v2409_v22  ;;  %v2720_v12 = vmul.f32 %v5046_v4, %v8605_v38  ;;  %v5021_v30 = vpop.f32.mrb[78].mxu1  ;;  %v2639_v56 = vpop.f32.mrb[93].mxu0 }
 0x280   : > { %v2530_v18 = vadd.f32 %v2498_v51, %v7043_v13  ;;  %v2499_v57 = vmul.f32 %v5021_v30, %v2467_v9  ;;  %v2718_v14 = vmul.f32 %v8606_v24, %v2639_v56  ;;  %v2412_v63 = vpop.f32.mrb[79].mxu1  ;;  %v5047_v0 = vpop.f32.mrb[94].mxu0  ;;  %v7258_v13 = vsel %vm618_vm14, 1.0, %v8427_v43 }
 0x281   : > { %v2528_v48 = vadd.f32 %v2496_v62, %v7050_v59  ;;  %v2497_v54 = vmul.f32 %v2465_v58, %v2412_v63  ;;  %v7250_v60 = vadd.f32 %v5047_v0, %v2523_v35  ;;  %v2642_v39 = vpop.f32.mrb[95].mxu0  ;;  %v7253_v61 = vadd.f32 %v2720_v12, %v7182_v7  ;;  %8608 = vst [vmem:[#allocation29_spill] sm:$0xff] %v7258_v13  ;;  %v8609_v12 = vld [vmem:[#allocation77_spill] sm:$0xff] }
 0x282   : > { %v7255_v10 = vadd.f32 %v2642_v39, %v2521_v34  ;;  %v2531_v9 = vadd.f32 %v2499_v57, %v7058_v40  ;;  %v7262_v51 = vadd.f32 %v2718_v14, %v7187_v55  ;;  %v2471_v59 = vmul.f32 %v6969_v3, %v7247_v19  ;;  %v8610_v57 = vld [vmem:[#allocation80_spill] sm:$0xff] }
 0x283   : > { %v2529_v22 = vadd.f32 %v2497_v54, %v7063_v32  ;;  %v2469_v7 = vmul.f32 %v6979_v5, %v7258_v13 }
 0x285   : > { %v5024_v35 = vpop.f32.mrb[80].mxu1 }
 0x286   : > { %v2502_v34 = vmul.f32 %v5024_v35, %v6921_v26  ;;  %v2425_v58 = vpop.f32.mrb[81].mxu1  ;;  %v5050_v4 = vpop.f32.mrb[96].mxu0 }
 0x287   : > { %v2500_v62 = vmul.f32 %v6935_v45, %v2425_v58  ;;  %v2724_v40 = vmul.f32 %v5050_v4, %v8609_v12  ;;  %v5025_v30 = vpop.f32.mrb[82].mxu1  ;;  %v2655_v55 = vpop.f32.mrb[97].mxu0 }
 0x288   : > { %v2534_v56 = vadd.f32 %v2502_v34, %v7081_v49  ;;  %v2503_v32 = vmul.f32 %v5025_v30, %v2471_v59  ;;  %v2722_v14 = vmul.f32 %v8610_v57, %v2655_v55  ;;  %v2428_v3 = vpop.f32.mrb[83].mxu1  ;;  %v5051_v63 = vpop.f32.mrb[98].mxu0 }
 0x289   : > { %v2532_v0 = vadd.f32 %v2500_v62, %v7088_v23  ;;  %v2501_v5 = vmul.f32 %v2469_v7, %v2428_v3  ;;  %v7275_v54 = vadd.f32 %v5051_v63, %v2527_v15  ;;  %v2658_v26 = vpop.f32.mrb[99].mxu0  ;;  %v7278_v39 = vadd.f32 %v2724_v40, %v7216_v50  ;;  %v8611_v15 = vld [vmem:[#allocation16_spill] sm:$0xff]  ;;  %v8612_v40 = vld [vmem:[#allocation9_spill] sm:$0xff] }
 0x28a   : > { %v7280_v45 = vadd.f32 %v2658_v26, %v2525_v31  ;;  %v2535_v35 = vadd.f32 %v2503_v32, %v7096_v16  ;;  %v7283_v58 = vadd.f32 %v2722_v14, %v2524_v8  ;;  %v8613_v32 = vld [vmem:[#allocation33_spill] sm:$0xff] }
 0x28b   : > { %v2533_v49 = vadd.f32 %v2501_v5, %v7101_v37 }
 0x28d   : > { %v5064_v59 = vpop.f32.mrb[84].mxu1 }
 0x28e   : > { %v7287_v34 = vadd.f32 %v5064_v59, %v7124_v46  ;;  %v5054_v23 = vpop.f32.mrb[100].mxu0  ;;  %v2805_v7 = vpop.f32.mrb[85].mxu1 }
 0x28f   : > { %v2728_v4 = vmul.f32 %v5054_v23, %v8611_v15  ;;  %v7291_v62 = vadd.f32 %v2805_v7, %v7133_v29  ;;  %v2671_v50 = vpop.f32.mrb[101].mxu0  ;;  %v5065_v31 = vpop.f32.mrb[86].mxu1  ;;  %v8614_v23 = vld [vmem:[#allocation32_spill] sm:$0xff] }
 0x290   : > { %v2726_v30 = vmul.f32 %v8612_v40, %v2671_v50  ;;  %v2935_v16 = vmul.f32 %v5065_v31, %v7011_v47  ;;  %v5055_v8 = vpop.f32.mrb[102].mxu0  ;;  %v2808_v55 = vpop.f32.mrb[87].mxu1  ;;  %vm783_vm15 = vcmp.le.s32.totalorder %v8614_v23, 14  ;;  %v8615_v31 = vld [vmem:[#allocation38_spill] sm:$0xff] }
 0x291   : > { %v7295_v37 = vadd.f32 %v5055_v8, %v2531_v9  ;;  %v2933_v46 = vmul.f32 %v8613_v32, %v2808_v55  ;;  %v2674_v14 = vpop.f32.mrb[103].mxu0  ;;  %v7298_v3 = vadd.f32 %v2728_v4, %v2530_v18  ;;  %vm781_vm2 = vcmp.le.s32.totalorder %v8615_v31, 14  ;;  %v8616_v18 = vld [vmem:[#allocation25_spill] sm:$0xff] }
 0x292   : > { %v2967_v63 = vadd.f32 %v2935_v16, %v7121_v53  ;;  %v7301_v5 = vadd.f32 %v2674_v14, %v2529_v22  ;;  %v7303_v29 = vadd.f32 %v2726_v30, %v2528_v48  ;;  %v8617_v30 = vld [vmem:[#allocation35_spill] sm:$0xff] }
 0x293   : > { %v2965_v26 = vadd.f32 %v2933_v46, %v7126_v25  ;;  %v8618_v25 = vld [vmem:[#allocation50_spill] sm:$0xff] }
 0x295   : > { %v5068_v59 = vpop.f32.mrb[88].mxu1 }
 0x296   : > { %v7308_v7 = vadd.f32 %v5068_v59, %v7158_v2  ;;  %v5058_v9 = vpop.f32.mrb[104].mxu0  ;;  %v2821_v50 = vpop.f32.mrb[89].mxu1  ;;  %v7318_v2 = vsel %vm783_vm15, 1.0, %v8427_v43  ;;  %v8620_v59 = vld [vmem:[#allocation53_spill] sm:$0xff] }
 0x297   : > { %v2732_v4 = vmul.f32 %v5058_v9, %v8616_v18  ;;  %v7313_v53 = vadd.f32 %v2821_v50, %v7167_v33  ;;  %v2687_v22 = vpop.f32.mrb[105].mxu0  ;;  %v5069_v48 = vpop.f32.mrb[90].mxu1  ;;  %8619 = vst [vmem:[#allocation7_spill] sm:$0xff] %v7318_v2  ;;  %v7324_v9 = vsel %vm781_vm2, 1.0, %v8427_v43  ;;  %v8622_v50 = vld [vmem:[#allocation63_spill] sm:$0xff] }
 0x298   : > { %v2730_v16 = vmul.f32 %v8617_v30, %v2687_v22  ;;  %v2939_v8 = vmul.f32 %v5069_v48, %v8618_v25  ;;  %v5059_v55 = vpop.f32.mrb[106].mxu0  ;;  %v2824_v46 = vpop.f32.mrb[91].mxu1  ;;  %8621 = vst [vmem:[#allocation2_spill] sm:$0xff] %v7324_v9  ;;  %v8623_v25 = vld [vmem:[#allocation4_spill] sm:$0xff] }
 0x299   : > { %v7320_v14 = vadd.f32 %v5059_v55, %v2535_v35  ;;  %v2937_v23 = vmul.f32 %v8620_v59, %v2824_v46  ;;  %v2690_v31 = vpop.f32.mrb[107].mxu0  ;;  %v7326_v33 = vadd.f32 %v2732_v4, %v2534_v56  ;;  %v8624_v35 = vld [vmem:[#allocation44_spill] sm:$0xff]  ;;  %v8625_v46 = vld [vmem:[#allocation45_spill] sm:$0xff]  ;;  %v8626_v59 = vld [vmem:[#allocation54_spill] sm:$0xff] }
 0x29a   : > { %v7329_v32 = vadd.f32 %v2939_v8, %v8622_v50  ;;  %v7331_v22 = vadd.f32 %v2690_v31, %v2533_v49  ;;  %v7333_v48 = vadd.f32 %v2730_v16, %v2532_v0  ;;  %v3164_v55 = vmul.f32 %v7318_v2, %v8624_v35  ;;  %v8627_v56 = vld [vmem:[#allocation46_spill] sm:$0xff]  ;;  %v8628_v8 = vld [vmem:[#allocation51_spill] sm:$0xff] }
 0x29b   : > { %v7336_v47 = vadd.f32 %v2937_v23, %v8623_v25  ;;  %vm784_vm3 = vcmp.le.s32.totalorder %v8625_v46, 14  ;;  %v3162_v30 = vmul.f32 %v7324_v9, %v8626_v59  ;;  %vm782_vm5 = vcmp.le.s32.totalorder %v8627_v56, 14  ;;  %v8629_v23 = vld [vmem:[#allocation55_spill] sm:$0xff]  ;;  %v8630_v56 = vld [vmem:[#allocation56_spill] sm:$0xff] }
 0x29c   : > { %vm787_vm1 = vcmp.le.s32.totalorder %v8628_v8, 14  ;;  %v7349_v25 = vsel %vm784_vm3, 1.0, %v8427_v43  ;;  %vm785_vm6 = vcmp.le.s32.totalorder %v8629_v23, 14  ;;  %v7356_v46 = vsel %vm782_vm5, 1.0, %v8427_v43  ;;  %v8632_v23 = vld [vmem:[#allocation57_spill] sm:$0xff] }
 0x29d   : > { %v5072_v4 = vpop.f32.mrb[92].mxu1  ;;  %v7360_v9 = vsel %vm787_vm1, 1.0, %v8427_v43 }
 0x29e   : > { %v7346_v49 = vadd.f32 %v5072_v4, %v7192_v20  ;;  %v2837_v0 = vpop.f32.mrb[93].mxu1  ;;  %v5098_v16 = vpop.f32.mrb[108].mxu0  ;;  %8631 = vst [vmem:[#allocation34_spill] sm:$0xff] %v7360_v9 }
 0x29f   : > { %v7353_v31 = vadd.f32 %v2837_v0, %v7201_v28  ;;  %v3196_v50 = vmul.f32 %v5098_v16, %v3164_v55  ;;  %v5073_v59 = vpop.f32.mrb[94].mxu1  ;;  %v3035_v35 = vpop.f32.mrb[109].mxu0  ;;  %v7368_v16 = vsel %vm785_vm6, 1.0, %v8427_v43 }
 0x2a0   : > { %v2943_v8 = vmul.f32 %v5073_v59, %v8630_v56  ;;  %v3194_v20 = vmul.f32 %v3162_v30, %v3035_v35  ;;  %v2840_v4 = vpop.f32.mrb[95].mxu1  ;;  %v5099_v18 = vpop.f32.mrb[110].mxu0  ;;  %8633 = vst [vmem:[#allocation87_spill] sm:$0xff] %v7368_v16  ;;  %v8638_v56 = vld [vmem:[#allocation59_spill] sm:$0xff] }
 0x2a1   : > { %v7363_v2 = vadd.f32 %v3196_v50, %v7287_v34  ;;  %v2941_v28 = vmul.f32 %v8632_v23, %v2840_v4  ;;  %v3197_v55 = vmul.f32 %v5099_v18, %v7349_v25  ;;  %v3038_v0 = vpop.f32.mrb[111].mxu0  ;;  %v8635_v50 = vld [vmem:[#allocation58_spill] sm:$0xff]  ;;  %v8636_v4 = vld [vmem:[#allocation60_spill] sm:$0xff] }
 0x2a2   : > { %v7371_v40 = vadd.f32 %v2943_v8, %v7189_v44  ;;  %v7374_v30 = vadd.f32 %v3194_v20, %v7291_v62  ;;  %v3195_v59 = vmul.f32 %v7356_v46, %v3038_v0  ;;  %v3168_v18 = vmul.f32 %v7360_v9, %v8635_v50  ;;  %v8639_v8 = vld [vmem:[#allocation62_spill] sm:$0xff]  ;;  %v8640_v20 = vld [vmem:[#allocation64_spill] sm:$0xff]  ;;  %v8641_v0 = vld [vmem:[#allocation65_spill] sm:$0xff] }
 0x2a3   : > { %v7378_v35 = vadd.f32 %v2941_v28, %v7194_v27  ;;  %v7380_v34 = vadd.f32 %v3197_v55, %v2967_v63  ;;  %vm788_vm7 = vcmp.le.s32.totalorder %v8636_v4, 14  ;;  %v3166_v44 = vmul.f32 %v7368_v16, %v8638_v56 }
 0x2a4   : > { %v7385_v23 = vadd.f32 %v3195_v59, %v2965_v26  ;;  %vm786_vm8 = vcmp.le.s32.totalorder %v8639_v8, 14  ;;  %vm791_vm9 = vcmp.le.s32.totalorder %v8640_v20, 14  ;;  %v7395_v55 = vsel %vm788_vm7, 1.0, %v8427_v43  ;;  %v8642_v8 = vld [vmem:[#allocation47_spill] sm:$0xff] }
 0x2a5   : > { %8634 = vst [vmem:[#allocation74_spill] sm:$0xff] %v7380_v34  ;;  %v5076_v62 = vpop.f32.mrb[96].mxu1  ;;  %vm789_vm10 = vcmp.le.s32.totalorder %v8641_v0, 14  ;;  %v7402_v4 = vsel %vm786_vm8, 1.0, %v8427_v43  ;;  %v7406_v9 = vsel %vm791_vm9, 1.0, %v8427_v43  ;;  %v8644_v0 = vld [vmem:[#allocation52_spill] sm:$0xff] }
 0x2a6   : > { %8637 = vst [vmem:[#allocation24_spill] sm:$0xff] %v7385_v23  ;;  %v7392_v27 = vadd.f32 %v5076_v62, %v7224_v11  ;;  %v2853_v63 = vpop.f32.mrb[97].mxu1  ;;  %v5102_v28 = vpop.f32.mrb[112].mxu0  ;;  %8643 = vst [vmem:[#allocation22_spill] sm:$0xff] %v7406_v9 }
 0x2a7   : > { %v7399_v26 = vadd.f32 %v2853_v63, %v7233_v1  ;;  %v3200_v59 = vmul.f32 %v5102_v28, %v3168_v18  ;;  %v5077_v56 = vpop.f32.mrb[98].mxu1  ;;  %v3051_v50 = vpop.f32.mrb[113].mxu0  ;;  %v7414_v28 = vsel %vm789_vm10, 1.0, %v8427_v43 }
 0x2a8   : > { %v2947_v20 = vmul.f32 %v5077_v56, %v8642_v8  ;;  %v3198_v11 = vmul.f32 %v3166_v44, %v3051_v50  ;;  %v2856_v62 = vpop.f32.mrb[99].mxu1  ;;  %v5103_v16 = vpop.f32.mrb[114].mxu0  ;;  %8645 = vst [vmem:[#allocation75_spill] sm:$0xff] %v7414_v28 }
 0x2a9   : > { %v7409_v23 = vadd.f32 %v3200_v59, %v7308_v7  ;;  %v2945_v1 = vmul.f32 %v8644_v0, %v2856_v62  ;;  %v3201_v18 = vmul.f32 %v5103_v16, %v7395_v55  ;;  %v3054_v63 = vpop.f32.mrb[115].mxu0  ;;  %v8646_v59 = vld [vmem:[#allocation68_spill] sm:$0xff]  ;;  %v8647_v62 = vld [vmem:[#allocation67_spill] sm:$0xff] }
 0x2aa   : > { %v7417_v34 = vadd.f32 %v2947_v20, %v7221_v17  ;;  %v7420_v44 = vadd.f32 %v3198_v11, %v7313_v53  ;;  %v3199_v56 = vmul.f32 %v7402_v4, %v3054_v63  ;;  %v3172_v16 = vmul.f32 %v7406_v9, %v8646_v59  ;;  %v8649_v53 = vld [vmem:[#allocation70_spill] sm:$0xff]  ;;  %v8651_v63 = vld [vmem:[#allocation8_spill] sm:$0xff] }
 0x2ab   : > { %v7424_v50 = vadd.f32 %v2945_v1, %v7226_v42  ;;  %v7427_v7 = vadd.f32 %v3201_v18, %v7329_v32  ;;  %vm792_vm11 = vcmp.le.s32.totalorder %v8647_v62, 14  ;;  %v3170_v17 = vmul.f32 %v7414_v28, %v8592_v52  ;;  %v8650_v11 = vld [vmem:[#allocation6_spill] sm:$0xff] }
 0x2ac   : > { %v7433_v0 = vadd.f32 %v3199_v56, %v7336_v47  ;;  %vm790_vm12 = vcmp.le.s32.totalorder %v8649_v53, 14  ;;  %vm795_vm13 = vcmp.le.s32.totalorder %v8650_v11, 14  ;;  %v7443_v18 = vsel %vm792_vm11, 1.0, %v8427_v43  ;;  %v8652_v53 = vld [vmem:[#allocation61_spill] sm:$0xff] }
 0x2ad   : > { %v5080_v20 = vpop.f32.mrb[100].mxu1  ;;  %vm793_vm14 = vcmp.le.s32.totalorder %v8651_v63, 14  ;;  %v7450_v62 = vsel %vm790_vm12, 1.0, %v8427_v43  ;;  %v7454_v28 = vsel %vm795_vm13, 1.0, %v8427_v43  ;;  %v8654_v63 = vld [vmem:[#allocation86_spill] sm:$0xff] }
 0x2ae   : > { %8648 = vst [vmem:[#allocation20_spill] sm:$0xff] %v7433_v0  ;;  %v7440_v42 = vadd.f32 %v5080_v20, %v7253_v61  ;;  %v2869_v32 = vpop.f32.mrb[101].mxu1  ;;  %v5106_v1 = vpop.f32.mrb[116].mxu0  ;;  %8653 = vst [vmem:[#allocation81_spill] sm:$0xff] %v7454_v28 }
 0x2af   : > { %v7447_v47 = vadd.f32 %v2869_v32, %v7262_v51  ;;  %v3204_v56 = vmul.f32 %v5106_v1, %v3172_v16  ;;  %v5081_v52 = vpop.f32.mrb[102].mxu1  ;;  %v3067_v59 = vpop.f32.mrb[117].mxu0  ;;  %v7462_v1 = vsel %vm793_vm14, 1.0, %v8427_v43 }
 0x2b0   : > { %v2951_v11 = vmul.f32 %v5081_v52, %v8652_v53  ;;  %v3202_v61 = vmul.f32 %v3170_v17, %v3067_v59  ;;  %v2872_v20 = vpop.f32.mrb[103].mxu1  ;;  %v5107_v8 = vpop.f32.mrb[118].mxu0  ;;  %8655 = vst [vmem:[#allocation41_spill] sm:$0xff] %v7462_v1 }
 0x2b1   : > { %v7457_v9 = vadd.f32 %v3204_v56, %v7346_v49  ;;  %v2949_v51 = vmul.f32 %v8654_v63, %v2872_v20  ;;  %v3205_v16 = vmul.f32 %v5107_v8, %v7443_v18  ;;  %v3070_v32 = vpop.f32.mrb[119].mxu0  ;;  %v3176_v8 = vmul.f32 %v7454_v28, %v8599_v21  ;;  %v8656_v56 = vld [vmem:[#allocation23_spill] sm:$0xff] }
 0x2b2   : > { %v7465_v0 = vadd.f32 %v2951_v11, %v7250_v60  ;;  %v7468_v17 = vadd.f32 %v3202_v61, %v7353_v31  ;;  %v3203_v52 = vmul.f32 %v7450_v62, %v3070_v32  ;;  %vm796_vm15 = vcmp.le.s32.totalorder %v8656_v56, 14  ;;  %v8657_v31 = vld [vmem:[#allocation31_spill] sm:$0xff]  ;;  %v8658_v61 = vld [vmem:[#allocation28_spill] sm:$0xff] }
 0x2b3   : > { %v7472_v59 = vadd.f32 %v2949_v51, %v7255_v10  ;;  %v7475_v49 = vadd.f32 %v3205_v16, %v7371_v40  ;;  %v3174_v60 = vmul.f32 %v7462_v1, %v8601_v36  ;;  %vm794_vm2 = vcmp.le.s32.totalorder %v8657_v31, 14  ;;  %v8659_v16 = vld [vmem:[#allocation42_spill] sm:$0xff] }
 0x2b4   : > { %v7481_v20 = vadd.f32 %v3203_v52, %v7378_v35  ;;  %vm799_vm3 = vcmp.le.s32.totalorder %v8658_v61, 14  ;;  %v7491_v21 = vsel %vm796_vm15, 1.0, %v8427_v43  ;;  %vm797_vm5 = vcmp.le.s32.totalorder %v8659_v16, 14  ;;  %v8660_v31 = vld [vmem:[#allocation10_spill] sm:$0xff] }
 0x2b5   : > { %v5084_v11 = vpop.f32.mrb[104].mxu1  ;;  %v7498_v56 = vsel %vm794_vm2, 1.0, %v8427_v43  ;;  %v7502_v53 = vsel %vm799_vm3, 1.0, %v8427_v43  ;;  %v8661_v16 = vld [vmem:[#allocation14_spill] sm:$0xff] }
 0x2b6   : > { %v7488_v10 = vadd.f32 %v5084_v11, %v7278_v39  ;;  %v2885_v40 = vpop.f32.mrb[105].mxu1  ;;  %v5110_v51 = vpop.f32.mrb[120].mxu0 }
 0x2b7   : > { %v7495_v35 = vadd.f32 %v2885_v40, %v7283_v58  ;;  %v3208_v32 = vmul.f32 %v5110_v51, %v3176_v8  ;;  %v5085_v36 = vpop.f32.mrb[106].mxu1  ;;  %v3083_v52 = vpop.f32.mrb[121].mxu0  ;;  %v7510_v51 = vsel %vm797_vm5, 1.0, %v8427_v43 }
 0x2b8   : > { %v2955_v61 = vmul.f32 %v5085_v36, %v8660_v31  ;;  %v3206_v39 = vmul.f32 %v3174_v60, %v3083_v52  ;;  %v2888_v11 = vpop.f32.mrb[107].mxu1  ;;  %v5111_v63 = vpop.f32.mrb[122].mxu0 }
 0x2b9   : > { %v7505_v1 = vadd.f32 %v3208_v32, %v7392_v27  ;;  %v2953_v58 = vmul.f32 %v8661_v16, %v2888_v11  ;;  %v3209_v8 = vmul.f32 %v5111_v63, %v7491_v21  ;;  %v3086_v40 = vpop.f32.mrb[123].mxu0  ;;  %v3180_v63 = vmul.f32 %v7502_v53, %v8605_v38  ;;  %v8662_v32 = vld [vmem:[#allocation43_spill] sm:$0xff] }
 0x2ba   : > { %v7513_v28 = vadd.f32 %v2955_v61, %v7275_v54  ;;  %v7516_v60 = vadd.f32 %v3206_v39, %v7399_v26  ;;  %v3207_v36 = vmul.f32 %v7498_v56, %v3086_v40  ;;  %vm800_vm1 = vcmp.le.s32.totalorder %v8662_v32, 14  ;;  %v8663_v26 = vld [vmem:[#allocation49_spill] sm:$0xff] }
 0x2bb   : > { %v7520_v52 = vadd.f32 %v2953_v58, %v7280_v45  ;;  %v7523_v27 = vadd.f32 %v3209_v8, %v7417_v34  ;;  %v3178_v54 = vmul.f32 %v7510_v51, %v8606_v24  ;;  %vm798_vm6 = vcmp.le.s32.totalorder %v8663_v26, 14  ;;  %v8664_v39 = vld [vmem:[#allocation73_spill] sm:$0xff]  ;;  %v8665_v8 = vld [vmem:[#allocation76_spill] sm:$0xff] }
 0x2bc   : > { %v7529_v11 = vadd.f32 %v3207_v36, %v7424_v50  ;;  %vm803_vm7 = vcmp.le.s32.totalorder %v8664_v39, 14  ;;  %v7539_v38 = vsel %vm800_vm1, 1.0, %v8427_v43  ;;  %vm801_vm8 = vcmp.le.s32.totalorder %v8665_v8, 14 }
 0x2bd   : > { %v5088_v61 = vpop.f32.mrb[108].mxu1  ;;  %v7546_v32 = vsel %vm798_vm6, 1.0, %v8427_v43  ;;  %v7550_v16 = vsel %vm803_vm7, 1.0, %v8427_v43 }
 0x2be   : > { %v7536_v45 = vadd.f32 %v5088_v61, %v7298_v3  ;;  %v2901_v34 = vpop.f32.mrb[109].mxu1  ;;  %v5114_v58 = vpop.f32.mrb[124].mxu0 }
 0x2bf   : > { %v7543_v50 = vadd.f32 %v2901_v34, %v7303_v29  ;;  %v3212_v40 = vmul.f32 %v5114_v58, %v3180_v63  ;;  %v5089_v24 = vpop.f32.mrb[110].mxu1  ;;  %v3099_v36 = vpop.f32.mrb[125].mxu0  ;;  %v7558_v58 = vsel %vm801_vm8, 1.0, %v8427_v43 }
 0x2c0   : > { %v2959_v26 = vmul.f32 %v5089_v24, %v7213_v6  ;;  %v3210_v3 = vmul.f32 %v3178_v54, %v3099_v36  ;;  %v2904_v61 = vpop.f32.mrb[111].mxu1  ;;  %v5115_v39 = vpop.f32.mrb[126].mxu0 }
 0x2c1   : > { %v7553_v31 = vadd.f32 %v3212_v40, %v7440_v42  ;;  %v2957_v29 = vmul.f32 %v7229_v41, %v2904_v61  ;;  %v3213_v63 = vmul.f32 %v5115_v39, %v7539_v38  ;;  %v3102_v34 = vpop.f32.mrb[127].mxu0  ;;  %v3184_v40 = vmul.f32 %v7550_v16, %v8609_v12  ;;  %v8666_v61 = vld [vmem:[#allocation78_spill] sm:$0xff] }
 0x2c2   : > { %v7561_v8 = vadd.f32 %v2959_v26, %v7295_v37  ;;  %v7564_v54 = vadd.f32 %v3210_v3, %v7447_v47  ;;  %v3211_v24 = vmul.f32 %v7546_v32, %v3102_v34  ;;  %vm804_vm9 = vcmp.le.s32.totalorder %v8666_v61, 14  ;;  %v8667_v47 = vld [vmem:[#allocation79_spill] sm:$0xff] }
 0x2c3   : > { %v7568_v36 = vadd.f32 %v2957_v29, %v7301_v5  ;;  %v7571_v42 = vadd.f32 %v3213_v63, %v7465_v0  ;;  %v3182_v37 = vmul.f32 %v7558_v58, %v8610_v57  ;;  %vm802_vm10 = vcmp.le.s32.totalorder %v8667_v47, 14  ;;  %v8668_v3 = vld [vmem:[#allocation83_spill] sm:$0xff]  ;;  %v8669_v63 = vld [vmem:[#allocation84_spill] sm:$0xff] }
 0x2c4   : > { %v7577_v39 = vadd.f32 %v3211_v24, %v7472_v59  ;;  %vm807_vm11 = vcmp.le.s32.totalorder %v8668_v3, 14  ;;  %v7587_v12 = vsel %vm804_vm9, 1.0, %v8427_v43  ;;  %vm805_vm12 = vcmp.le.s32.totalorder %v8669_v63, 14 }
 0x2c5   : > { %v5092_v26 = vpop.f32.mrb[112].mxu1  ;;  %v7594_v61 = vsel %vm802_vm10, 1.0, %v8427_v43  ;;  %v7598_v41 = vsel %vm807_vm11, 1.0, %v8427_v43 }
 0x2c6   : > { %v7584_v5 = vadd.f32 %v5092_v26, %v7326_v33  ;;  %v2917_v0 = vpop.f32.mrb[113].mxu1  ;;  %v5118_v29 = vpop.f32.mrb[128].mxu0  ;;  %8670 = vst [vmem:[#allocation66_spill] sm:$0xff] %v7594_v61  ;;  %8671 = vst [vmem:[#allocation36_spill] sm:$0xff] %v7598_v41 }
 0x2c7   : > { %v7591_v59 = vadd.f32 %v2917_v0, %v7333_v48  ;;  %v3216_v34 = vmul.f32 %v5118_v29, %v3184_v40  ;;  %v5093_v57 = vpop.f32.mrb[114].mxu1  ;;  %v3115_v24 = vpop.f32.mrb[129].mxu0  ;;  %v7606_v29 = vsel %vm805_vm12, 1.0, %v8427_v43 }
 0x2c8   : > { %v2963_v47 = vmul.f32 %v5093_v57, %v7247_v19  ;;  %v3214_v33 = vmul.f32 %v3182_v37, %v3115_v24  ;;  %v2920_v26 = vpop.f32.mrb[115].mxu1  ;;  %v5119_v3 = vpop.f32.mrb[130].mxu0  ;;  %8672 = vst [vmem:[#allocation71_spill] sm:$0xff] %v7606_v29 }
 0x2c9   : > { %v7601_v6 = vadd.f32 %v3216_v34, %v7488_v10  ;;  %v2961_v48 = vmul.f32 %v7258_v13, %v2920_v26  ;;  %v3217_v40 = vmul.f32 %v5119_v3, %v7587_v12  ;;  %v3118_v0 = vpop.f32.mrb[131].mxu0  ;;  %v3188_v34 = vmul.f32 %v7598_v41, %v8611_v15  ;;  %v8675_v26 = vld [vmem:[#allocation17_spill] sm:$0xff] }
 0x2ca   : > { %v7609_v63 = vadd.f32 %v2963_v47, %v7320_v14  ;;  %v7612_v37 = vadd.f32 %v3214_v33, %v7495_v35  ;;  %v3215_v57 = vmul.f32 %v7594_v61, %v3118_v0  ;;  %vm808_vm13 = vcmp.le.s32.totalorder %v8675_v26, 14  ;;  %v8677_v14 = vld [vmem:[#allocation9_spill] sm:$0xff]  ;;  %v8678_v47 = vld [vmem:[#allocation12_spill] sm:$0xff]  ;;  %v8679_v33 = vld [vmem:[#allocation18_spill] sm:$0xff] }
 0x2cb   : > { %v7616_v24 = vadd.f32 %v2961_v48, %v7331_v22  ;;  %v7619_v10 = vadd.f32 %v3217_v40, %v7513_v28  ;;  %v3186_v35 = vmul.f32 %v7606_v29, %v8677_v14  ;;  %vm806_vm14 = vcmp.le.s32.totalorder %v8678_v47, 14  ;;  %v8680_v48 = vld [vmem:[#allocation13_spill] sm:$0xff]  ;;  %v8681_v28 = vld [vmem:[#allocation7_spill] sm:$0xff] }
 0x2cc   : > { %8673 = vst [vmem:[#allocation82_spill] sm:$0xff] %v7612_v37  ;;  %v7625_v3 = vadd.f32 %v3215_v57, %v7520_v52  ;;  %vm811_vm15 = vcmp.le.s32.totalorder %v8679_v33, 14  ;;  %vm809_vm2 = vcmp.le.s32.totalorder %v8680_v48, 14  ;;  %v7634_v15 = vsel %vm808_vm13, 1.0, %v8427_v43  ;;  %v8682_v52 = vld [vmem:[#allocation2_spill] sm:$0xff] }
 0x2cd   : > { %8674 = vst [vmem:[#allocation37_spill] sm:$0xff] %v7619_v10  ;;  %v5132_v22 = vpop.f32.mrb[116].mxu1  ;;  %v7638_v14 = vsel %vm806_vm14, 1.0, %v8427_v43  ;;  %v7641_v47 = vsel %vm811_vm15, 1.0, %v8427_v43 }
 0x2ce   : > { %8676 = vst [vmem:[#allocation40_spill] sm:$0xff] %v7625_v3  ;;  %v3426_v40 = vmul.f32 %v5132_v22, %v8681_v28  ;;  %v5122_v0 = vpop.f32.mrb[132].mxu0  ;;  %v3297_v13 = vpop.f32.mrb[117].mxu1  ;;  %8683 = vst [vmem:[#allocation85_spill] sm:$0xff] %v7638_v14 }
 0x2cf   : > { %v3220_v26 = vmul.f32 %v5122_v0, %v3188_v34  ;;  %v3424_v57 = vmul.f32 %v8682_v52, %v3297_v13  ;;  %v3131_v19 = vpop.f32.mrb[133].mxu0  ;;  %v5133_v41 = vpop.f32.mrb[118].mxu1  ;;  %8684 = vst [vmem:[#allocation30_spill] sm:$0xff] %v7641_v47  ;;  %v7650_v13 = vsel %vm809_vm2, 1.0, %v8427_v43 }
 0x2d0   : > { %v7644_v33 = vadd.f32 %v3426_v40, %v7363_v2  ;;  %v3218_v22 = vmul.f32 %v3186_v35, %v3131_v19  ;;  %v3427_v29 = vmul.f32 %v5133_v41, %v7349_v25  ;;  %v5123_v3 = vpop.f32.mrb[134].mxu0  ;;  %v3300_v61 = vpop.f32.mrb[119].mxu1  ;;  %8685 = vst [vmem:[#allocation21_spill] sm:$0xff] %v7650_v13  ;;  %v8687_v35 = vld [vmem:[#allocation74_spill] sm:$0xff] }
 0x2d1   : > { %v7653_v34 = vadd.f32 %v3220_v26, %v7536_v45  ;;  %v7656_v0 = vadd.f32 %v3424_v57, %v7374_v30  ;;  %v3221_v10 = vmul.f32 %v5123_v3, %v7634_v15  ;;  %v3425_v2 = vmul.f32 %v7356_v46, %v3300_v61  ;;  %v3134_v19 = vpop.f32.mrb[135].mxu0  ;;  %v8689_v45 = vld [vmem:[#allocation24_spill] sm:$0xff]  ;;  %v8691_v57 = vld [vmem:[#allocation27_spill] sm:$0xff] }
 0x2d2   : > { %v7661_v41 = vadd.f32 %v3218_v22, %v7543_v50  ;;  %v3459_v40 = vadd.f32 %v3427_v29, %v8687_v35  ;;  %v3219_v48 = vmul.f32 %v7638_v14, %v3134_v19  ;;  %vm812_vm3 = vcmp.le.s32.totalorder %v8691_v57, 14  ;;  %v8693_v3 = vld [vmem:[#allocation35_spill] sm:$0xff]  ;;  %v8695_v19 = vld [vmem:[#allocation34_spill] sm:$0xff] }
 0x2d3   : > { %8686 = vst [vmem:[#allocation26_spill] sm:$0xff] %v7653_v34  ;;  %v7666_v37 = vadd.f32 %v3221_v10, %v7561_v8  ;;  %v3457_v26 = vadd.f32 %v3425_v2, %v8689_v45  ;;  %v8690_v34 = vld [vmem:[#allocation25_spill] sm:$0xff]  ;;  %v3190_v50 = vmul.f32 %v7650_v13, %v8693_v3  ;;  %v8694_v22 = vld [vmem:[#allocation15_spill] sm:$0xff]  ;;  %v7680_v2 = vsel %vm812_vm3, 1.0, %v8427_v43 }
 0x2d4   : > { %v3192_v30 = vmul.f32 %v7641_v47, %v8690_v34  ;;  %v7673_v61 = vadd.f32 %v3219_v48, %v7568_v36  ;;  %vm810_vm5 = vcmp.le.s32.totalorder %v8694_v22, 14  ;;  %v8696_v34 = vld [vmem:[#allocation87_spill] sm:$0xff] }
 0x2d5   : > { %8688 = vst [vmem:[#allocation11_spill] sm:$0xff] %v7666_v37  ;;  %v5136_v29 = vpop.f32.mrb[120].mxu1  ;;  %v7684_v36 = vsel %vm810_vm5, 1.0, %v8427_v43 }
 0x2d6   : > { %8692 = vst [vmem:[#allocation19_spill] sm:$0xff] %v7673_v61  ;;  %v3430_v35 = vmul.f32 %v5136_v29, %v8695_v19  ;;  %v5126_v8 = vpop.f32.mrb[136].mxu0  ;;  %v3313_v10 = vpop.f32.mrb[121].mxu1  ;;  %8697 = vst [vmem:[#allocation39_spill] sm:$0xff] %v7684_v36 }
 0x2d7   : > { %v3224_v45 = vmul.f32 %v5126_v8, %v3192_v30  ;;  %v3428_v47 = vmul.f32 %v8696_v34, %v3313_v10  ;;  %v3147_v57 = vpop.f32.mrb[137].mxu0  ;;  %v5137_v14 = vpop.f32.mrb[122].mxu1 }
 0x2d8   : > { %v7687_v48 = vadd.f32 %v3430_v35, %v7409_v23  ;;  %v3222_v3 = vmul.f32 %v3190_v50, %v3147_v57  ;;  %v3431_v22 = vmul.f32 %v5137_v14, %v7395_v55  ;;  %v5127_v29 = vpop.f32.mrb[138].mxu0  ;;  %v3316_v13 = vpop.f32.mrb[123].mxu1 }
 0x2d9   : > { %v7691_v61 = vadd.f32 %v3224_v45, %v7584_v5  ;;  %v7694_v30 = vadd.f32 %v3428_v47, %v7420_v44  ;;  %v3225_v8 = vmul.f32 %v5127_v29, %v7680_v2  ;;  %v3429_v10 = vmul.f32 %v7402_v4, %v3316_v13  ;;  %v3150_v43 = vpop.f32.mrb[139].mxu0  ;;  %v8699_v5 = vld [vmem:[#allocation20_spill] sm:$0xff]  ;;  %v8701_v13 = vld [vmem:[#allocation3_spill] sm:$0xff] }
 0x2da   : > { %v7699_v37 = vadd.f32 %v3222_v3, %v7591_v59  ;;  %v7702_v23 = vadd.f32 %v3431_v22, %v7427_v7  ;;  %v3223_v14 = vmul.f32 %v7684_v36, %v3150_v43  ;;  %v3657_v45 = vmul.f32 %v7349_v25, %v8701_v13  ;;  %v8702_v59 = vld [vmem:[#allocation22_spill] sm:$0xff]  ;;  %v8703_v22 = vld [vmem:[#allocation33_spill] sm:$0xff]  ;;  %v8704_v43 = vld [vmem:[#allocation75_spill] sm:$0xff] }
 0x2db   : > { %v7706_v50 = vadd.f32 %v3225_v8, %v7609_v63  ;;  %v7709_v35 = vadd.f32 %v3429_v10, %v8699_v5  ;;  %v3655_v29 = vmul.f32 %v7356_v46, %v8703_v22  ;;  %v7727_v25 = vld [vmem:[%s8146_s5] ss:$0 sm:$0xff] }
 0x2dc   : > { %v7712_v44 = vadd.f32 %v3223_v14, %v7616_v24  ;;  %v7739_v22 = vld [vmem:[%s8147_s6] ss:$0 sm:$0xff] }
 0x2dd   : > { %8698 = vst [vmem:[#allocation48_spill] sm:$0xff] %v7706_v50  ;;  %v5140_v47 = vpop.f32.mrb[124].mxu1  ;;  %v8705_v36 = vld [vmem:[#allocation50_spill] sm:$0xff] }
 0x2de   : > { %8700 = vst [vmem:[#allocation77_spill] sm:$0xff] %v7712_v44  ;;  %v3434_v57 = vmul.f32 %v5140_v47, %v8702_v59  ;;  %v3329_v3 = vpop.f32.mrb[125].mxu1  ;;  %v5166_v7 = vpop.f32.mrb[140].mxu0 }
 0x2df   : > { %v3432_v63 = vmul.f32 %v8704_v43, %v3329_v3  ;;  %v3688_v8 = vmul.f32 %v5166_v7, %v8681_v28  ;;  %v5141_v10 = vpop.f32.mrb[126].mxu1  ;;  %v3527_v5 = vpop.f32.mrb[141].mxu0 }
 0x2e0   : > { %v7722_v24 = vadd.f32 %v3434_v57, %v7457_v9  ;;  %v3435_v14 = vmul.f32 %v5141_v10, %v7443_v18  ;;  %v3686_v47 = vmul.f32 %v8682_v52, %v3527_v5  ;;  %v3332_v13 = vpop.f32.mrb[127].mxu1  ;;  %v5167_v46 = vpop.f32.mrb[142].mxu0 }
 0x2e1   : > { %v7732_v3 = vadd.f32 %v3432_v63, %v7468_v17  ;;  %v3720_v28 = vadd.f32 %v3688_v8, %v7644_v33  ;;  %v3433_v7 = vmul.f32 %v7450_v62, %v3332_v13  ;;  %v3689_v9 = vmul.f32 %v5167_v46, %v3657_v45  ;;  %v3530_v57 = vpop.f32.mrb[143].mxu0 }
 0x2e2   : > { %v7742_v10 = vadd.f32 %v3435_v14, %v7475_v49  ;;  %v3718_v52 = vadd.f32 %v3686_v47, %v7656_v0  ;;  %v3687_v5 = vmul.f32 %v3655_v29, %v3530_v57  ;;  %v3661_v49 = vmul.f32 %v7395_v55, %v8705_v36  ;;  %v8706_v14 = vld [vmem:[#allocation81_spill] sm:$0xff] }
 0x2e3   : > { %v3759_v17 = vmul.f32 %v7727_v25, %v3720_v28  ;;  %v7747_v63 = vadd.f32 %v3433_v7, %v7481_v20  ;;  %v3721_v33 = vadd.f32 %v3689_v9, %v3459_v40  ;;  %v8707_v40 = vld [vmem:[#allocation53_spill] sm:$0xff] }
 0x2e4   : > { %v3757_v45 = vmul.f32 %v7727_v25, %v3718_v52  ;;  %v3719_v8 = vadd.f32 %v3687_v5, %v3457_v26  ;;  %v3659_v7 = vmul.f32 %v7402_v4, %v8707_v40  ;;  %v8708_v57 = vld [vmem:[#allocation41_spill] sm:$0xff] }
 0x2e5   : > { %v3798_v13 = vadd.f32 %v7739_v22, %v3759_v17  ;;  %v3760_v46 = vmul.f32 %v7727_v25, %v3721_v33  ;;  %v5144_v44 = vpop.f32.mrb[128].mxu1 }
 0x2e6   : > { %v3796_v0 = vadd.f32 %v7739_v22, %v3757_v45  ;;  %v3758_v29 = vmul.f32 %v7727_v25, %v3719_v8  ;;  %v3438_v47 = vmul.f32 %v5144_v44, %v8706_v14  ;;  %v3345_v20 = vpop.f32.mrb[129].mxu1  ;;  %v5170_v28 = vpop.f32.mrb[144].mxu0 }
 0x2e7   : > { %v3830_v26 = vmax.f32 %v3798_v13, 0.0  ;;  %v3799_v9 = vadd.f32 %v7739_v22, %v3760_v46  ;;  %v3436_v52 = vmul.f32 %v8708_v57, %v3345_v20  ;;  %v3692_v5 = vmul.f32 %v5170_v28, %v8695_v19  ;;  %v5145_v17 = vpop.f32.mrb[130].mxu1  ;;  %v3543_v55 = vpop.f32.mrb[145].mxu0 }
 0x2e8   : > { %v3828_v36 = vmax.f32 %v3796_v0, 0.0  ;;  %v3797_v33 = vadd.f32 %v7739_v22, %v3758_v29  ;;  %v7764_v45 = vadd.f32 %v3438_v47, %v7505_v1  ;;  %v3439_v44 = vmul.f32 %v5145_v17, %v7491_v21  ;;  %v3348_v8 = vpop.f32.mrb[131].mxu1  ;;  %v5171_v50 = vpop.f32.mrb[146].mxu0 }
 0x2e9   : > { %v3831_v4 = vmax.f32 %v3799_v9, 0.0  ;;  %v7768_v13 = vadd.f32 %v3436_v52, %v7516_v60  ;;  %v3724_v46 = vadd.f32 %v3692_v5, %v7687_v48  ;;  %v3690_v19 = vmul.f32 %v8696_v34, %v3543_v55  ;;  %v3546_v20 = vpop.f32.mrb[147].mxu0 }
 0x2ea   : > { %v3829_v28 = vmax.f32 %v3797_v33, 0.0  ;;  %v7773_v0 = vadd.f32 %v3439_v44, %v7523_v27  ;;  %v3437_v1 = vmul.f32 %v7498_v56, %v3348_v8  ;;  %v3693_v29 = vmul.f32 %v5171_v50, %v3661_v49 }
 0x2eb   : > { %v3861_v47 = vpack.c.bf16 %v3831_v4, %v3830_v26  ;;  %v3763_v40 = vmul.f32 %v7727_v25, %v3724_v46  ;;  %v3722_v9 = vadd.f32 %v3690_v19, %v7694_v30  ;;  %v3691_v17 = vmul.f32 %v3659_v7, %v3546_v20 }
 0x2ec   : > { %v7779_v60 = vadd.f32 %v3437_v1, %v7529_v11  ;;  %v3725_v48 = vadd.f32 %v3693_v29, %v7702_v23  ;;  %v3860_v34 = vpack.c.bf16 %v3829_v28, %v3828_v36  ;;  %v8709_v11 = vld [vmem:[#allocation56_spill] sm:$0xff]  ;;  %v8710_v23 = vld [vmem:[#allocation57_spill] sm:$0xff] }
 0x2ed   : > { %v3802_v52 = vadd.f32 %v7739_v22, %v3763_v40  ;;  %v3761_v27 = vmul.f32 %v7727_v25, %v3722_v9  ;;  %v3723_v5 = vadd.f32 %v3691_v17, %v7709_v35  ;;  %v5148_v55 = vpop.f32.mrb[132].mxu1  ;;  %v3665_v7 = vmul.f32 %v7443_v18, %v8709_v11 }
 0x2ee   : > { %v3764_v50 = vmul.f32 %v7727_v25, %v3725_v48  ;;  %v3442_v49 = vmul.f32 %v5148_v55, %v7502_v53  ;;  %v3361_v26 = vpop.f32.mrb[133].mxu1  ;;  %v5174_v30 = vpop.f32.mrb[148].mxu0  ;;  %5198 = vmatprep.mubr.msk.bf16.mxu1 %vm1425_vm4, %v3860_v34  ;;  %v3663_v36 = vmul.f32 %v7450_v62, %v8710_v23 }
 0x2ef   : > { %v3834_v33 = vmax.f32 %v3802_v52, 0.0  ;;  %v3800_v44 = vadd.f32 %v7739_v22, %v3761_v27  ;;  %v3762_v35 = vmul.f32 %v7727_v25, %v3723_v5  ;;  %v3440_v8 = vmul.f32 %v7510_v51, %v3361_v26  ;;  %v5149_v4 = vpop.f32.mrb[134].mxu1  ;;  %v3559_v46 = vpop.f32.mrb[149].mxu0  ;;  %5199 = vmatmul.mubr.msk.bf16.vlgmr.msra.gmra.mrb[148].mxu1 %vm1425_vm4, %v3861_v47 }
 0x2f0   : > { %v3803_v19 = vadd.f32 %v7739_v22, %v3764_v50  ;;  %v7798_v20 = vadd.f32 %v3442_v49, %v7553_v31  ;;  %v3696_v18 = vmul.f32 %v5174_v30, %v8702_v59  ;;  %v3443_v62 = vmul.f32 %v5149_v4, %v7539_v38  ;;  %v3364_v28 = vpop.f32.mrb[135].mxu1  ;;  %v5175_v1 = vpop.f32.mrb[150].mxu0 }
 0x2f1   : > { %v3832_v29 = vmax.f32 %v3800_v44, 0.0  ;;  %v3801_v40 = vadd.f32 %v7739_v22, %v3762_v35  ;;  %v7804_v9 = vadd.f32 %v3440_v8, %v7564_v54  ;;  %v3694_v17 = vmul.f32 %v8704_v43, %v3559_v46  ;;  %v3562_v47 = vpop.f32.mrb[151].mxu0 }
 0x2f2   : > { %v3835_v48 = vmax.f32 %v3803_v19, 0.0  ;;  %v3728_v34 = vadd.f32 %v3696_v18, %v7722_v24  ;;  %v7809_v31 = vadd.f32 %v3443_v62, %v7571_v42  ;;  %v3441_v59 = vmul.f32 %v7546_v32, %v3364_v28 }
 0x2f3   : > { %v3833_v52 = vmax.f32 %v3801_v40, 0.0  ;;  %v3726_v27 = vadd.f32 %v3694_v17, %v7732_v3  ;;  %v3697_v5 = vmul.f32 %v5175_v1, %v3665_v7  ;;  %v3695_v55 = vmul.f32 %v3663_v36, %v3562_v47  ;;  %v8711_v36 = vld [vmem:[#allocation47_spill] sm:$0xff]  ;;  %v8713_v17 = vld [vmem:[#allocation82_spill] sm:$0xff] }
 0x2f4   : > { %v3767_v50 = vmul.f32 %v7727_v25, %v3728_v34  ;;  %v7815_v54 = vadd.f32 %v3441_v59, %v7577_v39  ;;  %v3863_v43 = vpack.c.bf16 %v3835_v48, %v3834_v33  ;;  %v3669_v44 = vmul.f32 %v7491_v21, %v8711_v36  ;;  %v8712_v39 = vld [vmem:[#allocation52_spill] sm:$0xff]  ;;  %v8714_v34 = vld [vmem:[#allocation37_spill] sm:$0xff] }
 0x2f5   : > { %v3765_v49 = vmul.f32 %v7727_v25, %v3726_v27  ;;  %v3729_v24 = vadd.f32 %v3697_v5, %v7742_v10  ;;  %v3727_v42 = vadd.f32 %v3695_v55, %v7747_v63  ;;  %v5152_v26 = vpop.f32.mrb[136].mxu1  ;;  %v3862_v30 = vpack.c.bf16 %v3833_v52, %v3832_v29  ;;  %v8715_v52 = vld [vmem:[#allocation66_spill] sm:$0xff] }
 0x2f6   : > { %v3806_v11 = vadd.f32 %v7739_v22, %v3767_v50  ;;  %v3446_v3 = vmul.f32 %v5152_v26, %v7550_v16  ;;  %v3377_v7 = vpop.f32.mrb[137].mxu1  ;;  %v5178_v23 = vpop.f32.mrb[152].mxu0  ;;  %v3667_v33 = vmul.f32 %v7498_v56, %v8712_v39  ;;  %v8718_v39 = vld [vmem:[#allocation36_spill] sm:$0xff] }
 0x2f7   : > { %v3804_v35 = vadd.f32 %v7739_v22, %v3765_v49  ;;  %v3768_v10 = vmul.f32 %v7727_v25, %v3729_v24  ;;  %v3766_v63 = vmul.f32 %v7727_v25, %v3727_v42  ;;  %v3444_v8 = vmul.f32 %v7558_v58, %v3377_v7  ;;  %5202 = vmatprep.mubr.msk.bf16.mxu1 %vm1425_vm4, %v3862_v30  ;;  %v5153_v4 = vpop.f32.mrb[138].mxu1  ;;  %v3575_v46 = vpop.f32.mrb[153].mxu0  ;;  %v8716_v42 = vld [vmem:[#allocation40_spill] sm:$0xff]  ;;  %v8717_v30 = vld [vmem:[#allocation61_spill] sm:$0xff] }
 0x2f8   : > { %v3838_v19 = vmax.f32 %v3806_v11, 0.0  ;;  %v7832_v18 = vadd.f32 %v3446_v3, %v7601_v6  ;;  %v3700_v21 = vmul.f32 %v5178_v23, %v8706_v14  ;;  %v3447_v56 = vmul.f32 %v5153_v4, %v7587_v12  ;;  %5203 = vmatmul.mubr.msk.bf16.gmra.mrb[152].mxu1 %vm1425_vm4, %v3863_v43  ;;  %v3380_v62 = vpop.f32.mrb[139].mxu1  ;;  %v5179_v28 = vpop.f32.mrb[154].mxu0 }
 0x2f9   : > { %v3836_v1 = vmax.f32 %v3804_v35, 0.0  ;;  %v3807_v29 = vadd.f32 %v7739_v22, %v3768_v10  ;;  %v3805_v40 = vadd.f32 %v7739_v22, %v3766_v63  ;;  %v7840_v47 = vadd.f32 %v3444_v8, %v8713_v17  ;;  %v3578_v48 = vpop.f32.mrb[155].mxu0  ;;  %v8719_v10 = vld [vmem:[#allocation86_spill] sm:$0xff]  ;;  %v8720_v8 = vld [vmem:[#allocation71_spill] sm:$0xff] }
 0x2fa   : > { %v3732_v6 = vadd.f32 %v3700_v21, %v7764_v45  ;;  %v7844_v59 = vadd.f32 %v3447_v56, %v8714_v34  ;;  %v3698_v14 = vmul.f32 %v8708_v57, %v3575_v46  ;;  %v3445_v27 = vmul.f32 %v8715_v52, %v3380_v62  ;;  %v8721_v62 = vld [vmem:[#allocation26_spill] sm:$0xff] }
 0x2fb   : > { %v3839_v5 = vmax.f32 %v3807_v29, 0.0  ;;  %v3837_v55 = vmax.f32 %v3805_v40, 0.0  ;;  %v3701_v50 = vmul.f32 %v5179_v28, %v3669_v44  ;;  %v3699_v43 = vmul.f32 %v3667_v33, %v3578_v48 }
 0x2fc   : > { %v3771_v49 = vmul.f32 %v7727_v25, %v3732_v6  ;;  %v3730_v24 = vadd.f32 %v3698_v14, %v7768_v13  ;;  %v7851_v26 = vadd.f32 %v3445_v27, %v8716_v42  ;;  %v3673_v45 = vmul.f32 %v7539_v38, %v8717_v30  ;;  %v8722_v14 = vld [vmem:[#allocation11_spill] sm:$0xff] }
 0x2fd   : > { %v3733_v11 = vadd.f32 %v3701_v50, %v7773_v0  ;;  %v3731_v57 = vadd.f32 %v3699_v43, %v7779_v60  ;;  %v5156_v3 = vpop.f32.mrb[140].mxu1  ;;  %v3864_v7 = vpack.c.bf16 %v3837_v55, %v3836_v1  ;;  %v3865_v23 = vpack.c.bf16 %v3839_v5, %v3838_v19  ;;  %v8723_v55 = vld [vmem:[#allocation85_spill] sm:$0xff] }
 0x2fe   : > { %v3810_v36 = vadd.f32 %v7739_v22, %v3771_v49  ;;  %v3769_v44 = vmul.f32 %v7727_v25, %v3730_v24  ;;  %v3450_v33 = vmul.f32 %v5156_v3, %v8718_v39  ;;  %v3393_v13 = vpop.f32.mrb[141].mxu1  ;;  %v5182_v35 = vpop.f32.mrb[156].mxu0  ;;  %v3671_v63 = vmul.f32 %v7546_v32, %v8719_v10 }
 0x2ff   : > { %v3772_v38 = vmul.f32 %v7727_v25, %v3733_v11  ;;  %v3770_v0 = vmul.f32 %v7727_v25, %v3731_v57  ;;  %v3448_v60 = vmul.f32 %v8720_v8, %v3393_v13  ;;  %v3704_v4 = vmul.f32 %v5182_v35, %v7502_v53  ;;  %5206 = vmatprep.mubr.msk.bf16.mxu1 %vm1425_vm4, %v3864_v7  ;;  %v5157_v46 = vpop.f32.mrb[142].mxu1  ;;  %v3591_v19 = vpop.f32.mrb[157].mxu0  ;;  %v8726_v13 = vld [vmem:[#allocation30_spill] sm:$0xff] }
 0x300   : > { %v3842_v21 = vmax.f32 %v3810_v36, 0.0  ;;  %v3808_v56 = vadd.f32 %v7739_v22, %v3769_v44  ;;  %v7869_v28 = vadd.f32 %v3450_v33, %v8721_v62  ;;  %v3451_v32 = vmul.f32 %v5157_v46, %v7634_v15  ;;  %5207 = vmatmul.mubr.msk.bf16.gmra.mrb[156].mxu1 %vm1425_vm4, %v3865_v23  ;;  %v3396_v1 = vpop.f32.mrb[143].mxu1  ;;  %v5183_v29 = vpop.f32.mrb[158].mxu0  ;;  %v8725_v36 = vld [vmem:[#allocation10_spill] sm:$0xff] }
 0x301   : > { %v3811_v40 = vadd.f32 %v7739_v22, %v3772_v38  ;;  %v3809_v53 = vadd.f32 %v7739_v22, %v3770_v0  ;;  %v7876_v17 = vadd.f32 %v3448_v60, %v7661_v41  ;;  %v3736_v48 = vadd.f32 %v3704_v4, %v7798_v20  ;;  %v3594_v6 = vpop.f32.mrb[159].mxu0  ;;  %v8724_v41 = vld [vmem:[#allocation19_spill] sm:$0xff]  ;;  %v8727_v38 = vld [vmem:[#allocation21_spill] sm:$0xff]  ;;  %v8728_v4 = vld [vmem:[#allocation14_spill] sm:$0xff] }
 0x302   : > { %v3840_v34 = vmax.f32 %v3808_v56, 0.0  ;;  %v7880_v27 = vadd.f32 %v3451_v32, %v8722_v14  ;;  %v3702_v5 = vmul.f32 %v7510_v51, %v3591_v19  ;;  %v3449_v50 = vmul.f32 %v8723_v55, %v3396_v1 }
 0x303   : > { %v3843_v43 = vmax.f32 %v3811_v40, 0.0  ;;  %v3841_v49 = vmax.f32 %v3809_v53, 0.0  ;;  %v3775_v24 = vmul.f32 %v7727_v25, %v3736_v48  ;;  %v3705_v42 = vmul.f32 %v5183_v29, %v3673_v45  ;;  %v8729_v48 = vld [vmem:[#allocation48_spill] sm:$0xff] }
 0x304   : > { %v3734_v30 = vadd.f32 %v3702_v5, %v7804_v9  ;;  %v7887_v11 = vadd.f32 %v3449_v50, %v8724_v41  ;;  %v3703_v20 = vmul.f32 %v3671_v63, %v3594_v6  ;;  %v3677_v51 = vmul.f32 %v7587_v12, %v8725_v36 }
 0x305   : > { %v3737_v57 = vadd.f32 %v3705_v42, %v7809_v31  ;;  %v5160_v3 = vpop.f32.mrb[144].mxu1  ;;  %v3866_v7 = vpack.c.bf16 %v3841_v49, %v3840_v34  ;;  %v3867_v23 = vpack.c.bf16 %v3843_v43, %v3842_v21  ;;  %v3814_v44 = vadd.f32 %v7739_v22, %v3775_v24  ;;  %v8730_v34 = vld [vmem:[#allocation39_spill] sm:$0xff] }
 0x306   : > { %v3773_v33 = vmul.f32 %v7727_v25, %v3734_v30  ;;  %v3735_v45 = vadd.f32 %v3703_v20, %v7815_v54  ;;  %v3454_v9 = vmul.f32 %v5160_v3, %v8726_v13  ;;  %v3409_v35 = vpop.f32.mrb[145].mxu1  ;;  %v5186_v10 = vpop.f32.mrb[160].mxu0  ;;  %v3675_v46 = vmul.f32 %v8715_v52, %v8728_v4 }
 0x307   : > { %v3776_v63 = vmul.f32 %v7727_v25, %v3737_v57  ;;  %v3452_v31 = vmul.f32 %v8727_v38, %v3409_v35  ;;  %v3708_v0 = vmul.f32 %v5186_v10, %v7550_v16  ;;  %5210 = vmatprep.mubr.msk.bf16.mxu1 %vm1425_vm4, %v3866_v7  ;;  %v5161_v60 = vpop.f32.mrb[146].mxu1  ;;  %v3607_v12 = vpop.f32.mrb[161].mxu0  ;;  %v3846_v53 = vmax.f32 %v3814_v44, 0.0  ;;  %v8732_v57 = vld [vmem:[#allocation69_spill] sm:$0xff] }
 0x308   : > { %v3812_v19 = vadd.f32 %v7739_v22, %v3773_v33  ;;  %v3774_v54 = vmul.f32 %v7727_v25, %v3735_v45  ;;  %v7905_v21 = vadd.f32 %v3454_v9, %v7691_v61  ;;  %v3455_v56 = vmul.f32 %v5161_v60, %v7680_v2  ;;  %5211 = vmatmul.mubr.msk.bf16.gmra.mrb[160].mxu1 %vm1425_vm4, %v3867_v23  ;;  %v3412_v62 = vpop.f32.mrb[147].mxu1  ;;  %v5187_v16 = vpop.f32.mrb[162].mxu0 }
 0x309   : > { %v3815_v32 = vadd.f32 %v7739_v22, %v3776_v63  ;;  %v7911_v1 = vadd.f32 %v3452_v31, %v7699_v37  ;;  %v3740_v52 = vadd.f32 %v3708_v0, %v7832_v18  ;;  %v3706_v29 = vmul.f32 %v7558_v58, %v3607_v12  ;;  %v3610_v40 = vpop.f32.mrb[163].mxu0  ;;  %v8731_v18 = vld [vmem:[#allocation77_spill] sm:$0xff] }
 0x30a   : > { %v3813_v61 = vadd.f32 %v7739_v22, %v3774_v54  ;;  %v7917_v6 = vadd.f32 %v3455_v56, %v8729_v48  ;;  %v3453_v14 = vmul.f32 %v8730_v34, %v3412_v62  ;;  %v3709_v37 = vmul.f32 %v5187_v16, %v3677_v51 }
 0x30b   : > { %v3847_v5 = vmax.f32 %v3815_v32, 0.0  ;;  %v3779_v50 = vmul.f32 %v7727_v25, %v3740_v52  ;;  %v3738_v43 = vadd.f32 %v3706_v29, %v7840_v47  ;;  %v3844_v49 = vmax.f32 %v3812_v19, 0.0  ;;  %v8733_v47 = vld [vmem:[#allocation72_spill] sm:$0xff]  ;;  %v8734_v52 = vld [vmem:[#allocation5_spill] sm:$0xff] }
 0x30c   : > { %v3845_v24 = vmax.f32 %v3813_v61, 0.0  ;;  %v7923_v42 = vadd.f32 %v3453_v14, %v8731_v18  ;;  %v3707_v58 = vmul.f32 %v3675_v46, %v3610_v40  ;;  %v3741_v41 = vadd.f32 %v3709_v37, %v7844_v59  ;;  %v8735_v61 = vld [vmem:[#allocation29_spill] sm:$0xff] }
 0x30d   : > { %v3777_v30 = vmul.f32 %v7727_v25, %v3738_v43  ;;  %v3869_v20 = vpack.c.bf16 %v3847_v5, %v3846_v53  ;;  %v3681_v3 = vmul.f32 %v7634_v15, %v8732_v57  ;;  %v3679_v51 = vmul.f32 %v8723_v55, %v8733_v47 }
 0x30e   : > { %v3739_v7 = vadd.f32 %v3707_v58, %v7851_v26  ;;  %v5190_v23 = vpop.f32.mrb[164].mxu0  ;;  %v3868_v36 = vpack.c.bf16 %v3845_v24, %v3844_v49  ;;  %v3818_v44 = vadd.f32 %v7739_v22, %v3779_v50  ;;  %v3780_v33 = vmul.f32 %v7727_v25, %v3741_v41 }
 0x30f   : > { %v3712_v45 = vmul.f32 %v5190_v23, %v8718_v39  ;;  %v3623_v9 = vpop.f32.mrb[165].mxu0  ;;  %v3816_v59 = vadd.f32 %v7739_v22, %v3777_v30  ;;  %v3683_v48 = vmul.f32 %v8730_v34, %v8735_v61 }
 0x310   : > { %v3778_v35 = vmul.f32 %v7727_v25, %v3739_v7  ;;  %5214 = vmatprep.mubr.msk.bf16.mxu1 %vm1425_vm4, %v3868_v36  ;;  %v3710_v15 = vmul.f32 %v8720_v8, %v3623_v9  ;;  %v5191_v26 = vpop.f32.mrb[166].mxu0  ;;  %v3819_v10 = vadd.f32 %v7739_v22, %v3780_v33  ;;  %v3850_v12 = vmax.f32 %v3818_v44, 0.0 }
 0x311   : > { %v3744_v55 = vadd.f32 %v3712_v45, %v7869_v28  ;;  %5215 = vmatmul.mubr.msk.bf16.gmra.mrb[164].mxu1 %vm1425_vm4, %v3869_v20  ;;  %v3713_v63 = vmul.f32 %v5191_v26, %v3681_v3  ;;  %v3626_v31 = vpop.f32.mrb[167].mxu0  ;;  %v3848_v19 = vmax.f32 %v3816_v59, 0.0  ;;  %v5286_v26 = vld [vmem:[%s5386_s23 + $0x8] sm:$0xff]  }
 0x312   : > { %v3817_v39 = vadd.f32 %v7739_v22, %v3778_v35  ;;  %v3742_v0 = vadd.f32 %v3710_v15, %v7876_v17  ;;  %v3711_v60 = vmul.f32 %v3679_v51, %v3626_v31  ;;  %v3851_v4 = vmax.f32 %v3819_v10, 0.0  ;;  %v7986_v35 = vld [vmem:[%s8150_s9] ss:$0 sm:$0xff] }
 0x313   : > { %v3783_v46 = vmul.f32 %v7727_v25, %v3744_v55  ;;  %v3745_v8 = vadd.f32 %v3713_v63, %v7880_v27  ;;  %v3685_v17 = vmul.f32 %v7680_v2, %v8734_v52  ;;  %v4169_v10 = vunpack.c.l.bf16 %v5286_v26  ;;  %v5287_v63 = vld [vmem:[%s5386_s23] sm:$0xff]  }
 0x314   : > { %v3849_v54 = vmax.f32 %v3817_v39, 0.0  ;;  %v3781_v56 = vmul.f32 %v7727_v25, %v3742_v0  ;;  %v3743_v28 = vadd.f32 %v3711_v60, %v7887_v11  ;;  %v3871_v32 = vpack.c.bf16 %v3851_v4, %v3850_v12 }
 0x315   : > { %v3822_v62 = vadd.f32 %v7739_v22, %v3783_v46  ;;  %v3784_v16 = vmul.f32 %v7727_v25, %v3745_v8  ;;  %v4167_v31 = vunpack.c.l.bf16 %v5287_v63  ;;  %v4170_v4 = vunpack.c.h.bf16 %v5286_v26 }
 0x316   : > { %v3820_v29 = vadd.f32 %v7739_v22, %v3781_v56  ;;  %v3782_v40 = vmul.f32 %v7727_v25, %v3743_v28  ;;  %v5194_v53 = vpop.f32.mrb[168].mxu0  ;;  %v3870_v27 = vpack.c.bf16 %v3849_v54, %v3848_v19  ;;  %v4168_v8 = vunpack.c.h.bf16 %v5287_v63 }
 0x317   : > { %v3823_v14 = vadd.f32 %v7739_v22, %v3784_v16  ;;  %v3716_v11 = vmul.f32 %v5194_v53, %v8726_v13  ;;  %v3639_v5 = vpop.f32.mrb[169].mxu0  ;;  %v3854_v37 = vmax.f32 %v3822_v62, 0.0 }
 0x318   : > { %v3821_v50 = vadd.f32 %v7739_v22, %v3782_v40  ;;  %5218 = vmatprep.mubr.msk.bf16.mxu1 %vm1425_vm4, %v3870_v27  ;;  %v3714_v2 = vmul.f32 %v8727_v38, %v3639_v5  ;;  %v5195_v43 = vpop.f32.mrb[170].mxu0  ;;  %v3852_v58 = vmax.f32 %v3820_v29, 0.0 }
 0x319   : > { %v3855_v49 = vmax.f32 %v3823_v14, 0.0  ;;  %v3748_v24 = vadd.f32 %v3716_v11, %v7905_v21  ;;  %5219 = vmatmul.mubr.msk.bf16.gmra.mrb[168].mxu1 %vm1425_vm4, %v3871_v32  ;;  %v3717_v18 = vmul.f32 %v5195_v43, %v3685_v17  ;;  %v3642_v34 = vpop.f32.mrb[171].mxu0 }
 0x31a   : > { %v3853_v30 = vmax.f32 %v3821_v50, 0.0  ;;  %v3746_v13 = vadd.f32 %v3714_v2, %v7911_v1  ;;  %v3715_v41 = vmul.f32 %v3683_v48, %v3642_v34  ;;  %v5288_v48 = vld [vmem:[%s5386_s23 + $0x18] sm:$0xff]   ;;  %v5289_v50 = vld [vmem:[%s5386_s23 + $0x10] sm:$0xff]  }
 0x31b   : > { %v3787_v20 = vmul.f32 %v7727_v25, %v3748_v24  ;;  %v3749_v57 = vadd.f32 %v3717_v18, %v7917_v6  ;;  %v3873_v3 = vpack.c.bf16 %v3855_v49, %v3854_v37  ;;  %v4173_v14 = vunpack.c.l.bf16 %v5288_v48 }
 0x31c   : > { %v3785_v38 = vmul.f32 %v7727_v25, %v3746_v13  ;;  %v3747_v7 = vadd.f32 %v3715_v41, %v7923_v42  ;;  %v3872_v23 = vpack.c.bf16 %v3853_v30, %v3852_v58  ;;  %v4171_v2 = vunpack.c.l.bf16 %v5289_v50 }
 0x31d   : > { %v3826_v21 = vadd.f32 %v7739_v22, %v3787_v20  ;;  %v3788_v36 = vmul.f32 %v7727_v25, %v3749_v57  ;;  %v4174_v24 = vunpack.c.h.bf16 %v5288_v48  ;;  %v4172_v30 = vunpack.c.h.bf16 %v5289_v50 }
 0x31e   : > { %v3824_v47 = vadd.f32 %v7739_v22, %v3785_v38  ;;  %v3786_v51 = vmul.f32 %v7727_v25, %v3747_v7  ;;  %5222 = vmatprep.mubr.msk.bf16.mxu1 %vm1425_vm4, %v3872_v23  ;;  %v7981_v25 = vld [vmem:[%s8149_s8] ss:$0 sm:$0xff] }
 0x31f   : > { %v3827_v1 = vadd.f32 %v7739_v22, %v3788_v36  ;;  %v3858_v44 = vmax.f32 %v3826_v21, 0.0 }
 0x320   : > { %v3825_v6 = vadd.f32 %v7739_v22, %v3786_v51  ;;  %v3856_v42 = vmax.f32 %v3824_v47, 0.0  ;;  %v5290_v51 = vld [vmem:[%s5386_s23 + $0x28] sm:$0xff]  }
 0x321   : > { %v3859_v33 = vmax.f32 %v3827_v1, 0.0  ;;  %5223 = vmatmul.mubr.msk.bf16.gmra.mrb[172].mxu1 %vm1425_vm4, %v3873_v3  ;;  %v4177_v1 = vunpack.c.l.bf16 %v5290_v51 }
 0x322   : > { %v3857_v45 = vmax.f32 %v3825_v6, 0.0 }
 0x323   : > { %v3875_v9 = vpack.c.bf16 %v3859_v33, %v3858_v44 }
 0x324   : > { %v3874_v59 = vpack.c.bf16 %v3857_v45, %v3856_v42  ;;  %v5291_v42 = vld [vmem:[%s5386_s23 + $0x20] sm:$0xff]  }
 0x325   : > { %v4175_v45 = vunpack.c.l.bf16 %v5291_v42  ;;  %v4176_v63 = vunpack.c.h.bf16 %v5291_v42 }
 0x326   : > { %5226 = vmatprep.mubr.msk.bf16.mxu1 %vm1425_vm4, %v3874_v59 }
 0x329   : > { %5227 = vmatmul.mubr.msk.bf16.gmra.mrb[176].mxu1 %vm1425_vm4, %v3875_v9 }
 0x3c2   : > { %v5200_v22 = vpop.f32.mrb[148].mxu1 }
 0x3c3   : > { %v4098_v15 = vmul.f32 %v5200_v22, %v7981_v25  ;;  %v3962_v55 = vpop.f32.mrb[149].mxu1 }
 0x3c4   : > { %v4096_v39 = vmul.f32 %v7981_v25, %v3962_v55  ;;  %v5201_v0 = vpop.f32.mrb[150].mxu1 }
 0x3c5   : > { %v4137_v60 = vadd.f32 %v7986_v35, %v4098_v15  ;;  %v4099_v12 = vmul.f32 %v5201_v0, %v7981_v25  ;;  %v3965_v46 = vpop.f32.mrb[151].mxu1  ;;  %v4178_v15 = vunpack.c.h.bf16 %v5290_v51 }
 0x3c6   : > { %v4135_v19 = vadd.f32 %v7986_v35, %v4096_v39  ;;  %v4097_v54 = vmul.f32 %v7981_v25, %v3965_v46 }
 0x3c7   : > { %v4201_v56 = vadd.f32 %v4169_v10, %v4137_v60  ;;  %v4138_v28 = vadd.f32 %v7986_v35, %v4099_v12 }
 0x3c8   : > { %v4199_v62 = vadd.f32 %v4167_v31, %v4135_v19  ;;  %v4136_v16 = vadd.f32 %v7986_v35, %v4097_v54 }
 0x3c9   : > { %v4233_v32 = vmax.f32 %v4201_v56, 0.0  ;;  %v4202_v52 = vadd.f32 %v4170_v4, %v4138_v28  ;;  %v5292_v28 = vld [vmem:[%s5386_s23 + $0x38] sm:$0xff]  }
 0x3ca   : > { %v4231_v17 = vmax.f32 %v4199_v62, 0.0  ;;  %v4200_v29 = vadd.f32 %v4168_v8, %v4136_v16  ;;  %v4181_v62 = vunpack.c.l.bf16 %v5292_v28 }
 0x3cb   : > { %4265 = vst.msk [vmem:[%s8001_s25 + $0x10] sm:$0xff] %vm1005_vm0, %v4233_v32  ;;  %v4234_v40 = vmax.f32 %v4202_v52, 0.0  ;;  %v5204_v53 = vpop.f32.mrb[152].mxu1 }
 0x3cc   : > { %4263 = vst.msk [vmem:[%s8001_s25] sm:$0xff] %vm1005_vm0, %v4231_v17  ;;  %v4232_v27 = vmax.f32 %v4200_v29, 0.0  ;;  %v4102_v61 = vmul.f32 %v5204_v53, %v7981_v25  ;;  %v3978_v11 = vpop.f32.mrb[153].mxu1  ;;  %v5293_v17 = vld [vmem:[%s5386_s23 + $0x30] sm:$0xff]  }
 0x3cd   : > { %4266 = vst.msk [vmem:[%s8001_s25 + $0x18] sm:$0xff] %vm1005_vm0, %v4234_v40  ;;  %v4100_v5 = vmul.f32 %v7981_v25, %v3978_v11  ;;  %v5205_v43 = vpop.f32.mrb[154].mxu1  ;;  %v4179_v29 = vunpack.c.l.bf16 %v5293_v17 }
 0x3ce   : > { %4264 = vst.msk [vmem:[%s8001_s25 + $0x8] sm:$0xff] %vm1005_vm0, %v4232_v27  ;;  %v4141_v37 = vadd.f32 %v7986_v35, %v4102_v61  ;;  %v4103_v49 = vmul.f32 %v5205_v43, %v7981_v25  ;;  %v3981_v18 = vpop.f32.mrb[155].mxu1  ;;  %v4182_v61 = vunpack.c.h.bf16 %v5292_v28 }
 0x3cf   : > { %v4139_v34 = vadd.f32 %v7986_v35, %v4100_v5  ;;  %v4101_v58 = vmul.f32 %v7981_v25, %v3981_v18  ;;  %v4180_v5 = vunpack.c.h.bf16 %v5293_v17 }
 0x3d0   : > { %v4205_v13 = vadd.f32 %v4173_v14, %v4141_v37  ;;  %v4142_v41 = vadd.f32 %v7986_v35, %v4103_v49 }
 0x3d1   : > { %v4203_v20 = vadd.f32 %v4171_v2, %v4139_v34  ;;  %v4140_v57 = vadd.f32 %v7986_v35, %v4101_v58 }
 0x3d2   : > { %v4237_v3 = vmax.f32 %v4205_v13, 0.0  ;;  %v4206_v38 = vadd.f32 %v4174_v24, %v4142_v41 }
 0x3d3   : > { %v4235_v7 = vmax.f32 %v4203_v20, 0.0  ;;  %v4204_v23 = vadd.f32 %v4172_v30, %v4140_v57  ;;  %v5208_v21 = vpop.f32.mrb[156].mxu1  ;;  %v5294_v20 = vld [vmem:[%s5386_s23 + $0x48] sm:$0xff]  }
 0x3d4   : > { %4269 = vst.msk [vmem:[%s8001_s25 + $0x30] sm:$0xff] %vm1005_vm0, %v4237_v3  ;;  %v4238_v36 = vmax.f32 %v4206_v38, 0.0  ;;  %v4106_v47 = vmul.f32 %v5208_v21, %v7981_v25  ;;  %v3994_v6 = vpop.f32.mrb[157].mxu1  ;;  %v4185_v57 = vunpack.c.l.bf16 %v5294_v20  ;;  %v4186_v51 = vunpack.c.h.bf16 %v5294_v20 }
 0x3d5   : > { %4267 = vst.msk [vmem:[%s8001_s25 + $0x20] sm:$0xff] %vm1005_vm0, %v4235_v7  ;;  %v4236_v44 = vmax.f32 %v4204_v23, 0.0  ;;  %v4104_v33 = vmul.f32 %v7981_v25, %v3994_v6  ;;  %v5209_v9 = vpop.f32.mrb[158].mxu1  ;;  %v5295_v7 = vld [vmem:[%s5386_s23 + $0x40] sm:$0xff]  }
 0x3d6   : > { %4270 = vst.msk [vmem:[%s8001_s25 + $0x38] sm:$0xff] %vm1005_vm0, %v4238_v36  ;;  %v4145_v59 = vadd.f32 %v7986_v35, %v4106_v47  ;;  %v4107_v22 = vmul.f32 %v5209_v9, %v7981_v25  ;;  %v3997_v26 = vpop.f32.mrb[159].mxu1  ;;  %v4183_v23 = vunpack.c.l.bf16 %v5295_v7 }
 0x3d7   : > { %4268 = vst.msk [vmem:[%s8001_s25 + $0x28] sm:$0xff] %vm1005_vm0, %v4236_v44  ;;  %v4143_v10 = vadd.f32 %v7986_v35, %v4104_v33  ;;  %v4105_v55 = vmul.f32 %v7981_v25, %v3997_v26  ;;  %v4184_v33 = vunpack.c.h.bf16 %v5295_v7 }
 0x3d8   : > { %v4209_v31 = vadd.f32 %v4177_v1, %v4145_v59  ;;  %v4146_v39 = vadd.f32 %v7986_v35, %v4107_v22 }
 0x3d9   : > { %v4207_v0 = vadd.f32 %v4175_v45, %v4143_v10  ;;  %v4144_v60 = vadd.f32 %v7986_v35, %v4105_v55 }
 0x3da   : > { %v4241_v12 = vmax.f32 %v4209_v31, 0.0  ;;  %v4210_v4 = vadd.f32 %v4178_v15, %v4146_v39  ;;  %v5296_v39 = vld [vmem:[%s5386_s23 + $0x58] sm:$0xff]  }
 0x3db   : > { %v4239_v46 = vmax.f32 %v4207_v0, 0.0  ;;  %v4208_v8 = vadd.f32 %v4176_v63, %v4144_v60  ;;  %v5212_v19 = vpop.f32.mrb[160].mxu1  ;;  %v4189_v0 = vunpack.c.l.bf16 %v5296_v39  ;;  %v4190_v28 = vunpack.c.h.bf16 %v5296_v39 }
 0x3dc   : > { %4273 = vst.msk [vmem:[%s8001_s25 + $0x50] sm:$0xff] %vm1005_vm0, %v4241_v12  ;;  %v4242_v54 = vmax.f32 %v4210_v4, 0.0  ;;  %v4110_v56 = vmul.f32 %v5212_v19, %v7981_v25  ;;  %v4010_v16 = vpop.f32.mrb[161].mxu1 }
 0x3dd   : > { %4271 = vst.msk [vmem:[%s8001_s25 + $0x40] sm:$0xff] %vm1005_vm0, %v4239_v46  ;;  %v4240_v32 = vmax.f32 %v4208_v8, 0.0  ;;  %v4108_v52 = vmul.f32 %v7981_v25, %v4010_v16  ;;  %v5213_v40 = vpop.f32.mrb[162].mxu1  ;;  %v5297_v46 = vld [vmem:[%s5386_s23 + $0x50] sm:$0xff]  }
 0x3de   : > { %4274 = vst.msk [vmem:[%s8001_s25 + $0x58] sm:$0xff] %vm1005_vm0, %v4242_v54  ;;  %v4149_v53 = vadd.f32 %v7986_v35, %v4110_v56  ;;  %v4111_v27 = vmul.f32 %v5213_v40, %v7981_v25  ;;  %v4013_v48 = vpop.f32.mrb[163].mxu1  ;;  %v4187_v8 = vunpack.c.l.bf16 %v5297_v46 }
 0x3df   : > { %4272 = vst.msk [vmem:[%s8001_s25 + $0x48] sm:$0xff] %vm1005_vm0, %v4240_v32  ;;  %v4147_v14 = vadd.f32 %v7986_v35, %v4108_v52  ;;  %v4109_v11 = vmul.f32 %v7981_v25, %v4013_v48  ;;  %v4188_v52 = vunpack.c.h.bf16 %v5297_v46 }
 0x3e0   : > { %v4213_v50 = vadd.f32 %v4181_v62, %v4149_v53  ;;  %v4150_v2 = vadd.f32 %v7986_v35, %v4111_v27 }
 0x3e1   : > { %v4211_v43 = vadd.f32 %v4179_v29, %v4147_v14  ;;  %v4148_v37 = vadd.f32 %v7986_v35, %v4109_v11 }
 0x3e2   : > { %v4245_v49 = vmax.f32 %v4213_v50, 0.0  ;;  %v4214_v24 = vadd.f32 %v4182_v61, %v4150_v2  ;;  %v5298_v2 = vld [vmem:[%s5386_s23 + $0x68] sm:$0xff]  }
 0x3e3   : > { %v4243_v18 = vmax.f32 %v4211_v43, 0.0  ;;  %v4212_v34 = vadd.f32 %v4180_v5, %v4148_v37  ;;  %v4193_v43 = vunpack.c.l.bf16 %v5298_v2 }
 0x3e4   : > { %4277 = vst.msk [vmem:[%s8001_s25 + $0x70] sm:$0xff] %vm1005_vm0, %v4245_v49  ;;  %v4246_v58 = vmax.f32 %v4214_v24, 0.0  ;;  %v5216_v30 = vpop.f32.mrb[164].mxu1 }
 0x3e5   : > { %4275 = vst.msk [vmem:[%s8001_s25 + $0x60] sm:$0xff] %vm1005_vm0, %v4243_v18  ;;  %v4244_v13 = vmax.f32 %v4212_v34, 0.0  ;;  %v4114_v41 = vmul.f32 %v5216_v30, %v7981_v25  ;;  %v4026_v3 = vpop.f32.mrb[165].mxu1  ;;  %v5299_v18 = vld [vmem:[%s5386_s23 + $0x60] sm:$0xff]  }
 0x3e6   : > { %4278 = vst.msk [vmem:[%s8001_s25 + $0x78] sm:$0xff] %vm1005_vm0, %v4246_v58  ;;  %v4112_v38 = vmul.f32 %v7981_v25, %v4026_v3  ;;  %v5217_v21 = vpop.f32.mrb[166].mxu1  ;;  %v4191_v34 = vunpack.c.l.bf16 %v5299_v18 }
 0x3e7   : > { %4276 = vst.msk [vmem:[%s8001_s25 + $0x68] sm:$0xff] %vm1005_vm0, %v4244_v13  ;;  %v4153_v36 = vadd.f32 %v7986_v35, %v4114_v41  ;;  %v4115_v47 = vmul.f32 %v5217_v21, %v7981_v25  ;;  %v4029_v1 = vpop.f32.mrb[167].mxu1  ;;  %v4194_v41 = vunpack.c.h.bf16 %v5298_v2 }
 0x3e8   : > { %v4151_v6 = vadd.f32 %v7986_v35, %v4112_v38  ;;  %v4113_v44 = vmul.f32 %v7981_v25, %v4029_v1  ;;  %v4192_v38 = vunpack.c.h.bf16 %v5299_v18 }
 0x3e9   : > { %v4217_v42 = vadd.f32 %v4185_v57, %v4153_v36  ;;  %v4154_v45 = vadd.f32 %v7986_v35, %v4115_v47 }
 0x3ea   : > { %v4215_v9 = vadd.f32 %v4183_v23, %v4151_v6  ;;  %v4152_v59 = vadd.f32 %v7986_v35, %v4113_v44 }
 0x3eb   : > { %v4249_v22 = vmax.f32 %v4217_v42, 0.0  ;;  %v4218_v15 = vadd.f32 %v4186_v51, %v4154_v45  ;;  %v5300_v45 = vld [vmem:[%s5386_s23 + $0x78] sm:$0xff]  }
 0x3ec   : > { %v4247_v26 = vmax.f32 %v4215_v9, 0.0  ;;  %v4216_v10 = vadd.f32 %v4184_v33, %v4152_v59  ;;  %v5220_v55 = vpop.f32.mrb[168].mxu1  ;;  %v4197_v9 = vunpack.c.l.bf16 %v5300_v45  ;;  %v4198_v39 = vunpack.c.h.bf16 %v5300_v45 }
 0x3ed   : > { %4281 = vst.msk [vmem:[%s8001_s25 + $0x90] sm:$0xff] %vm1005_vm0, %v4249_v22  ;;  %v4250_v63 = vmax.f32 %v4218_v15, 0.0  ;;  %v4118_v31 = vmul.f32 %v5220_v55, %v7981_v25  ;;  %v4042_v60 = vpop.f32.mrb[169].mxu1 }
 0x3ee   : > { %4279 = vst.msk [vmem:[%s8001_s25 + $0x80] sm:$0xff] %vm1005_vm0, %v4247_v26  ;;  %v4248_v12 = vmax.f32 %v4216_v10, 0.0  ;;  %v4116_v4 = vmul.f32 %v7981_v25, %v4042_v60  ;;  %v5221_v19 = vpop.f32.mrb[170].mxu1  ;;  %v5301_v26 = vld [vmem:[%s5386_s23 + $0x70] sm:$0xff]  }
 0x3ef   : > { %4282 = vst.msk [vmem:[%s8001_s25 + $0x98] sm:$0xff] %vm1005_vm0, %v4250_v63  ;;  %v4157_v54 = vadd.f32 %v7986_v35, %v4118_v31  ;;  %v4119_v56 = vmul.f32 %v5221_v19, %v7981_v25  ;;  %v4045_v62 = vpop.f32.mrb[171].mxu1  ;;  %v4195_v10 = vunpack.c.l.bf16 %v5301_v26 }
 0x3f0   : > { %4280 = vst.msk [vmem:[%s8001_s25 + $0x88] sm:$0xff] %vm1005_vm0, %v4248_v12  ;;  %v4155_v16 = vadd.f32 %v7986_v35, %v4116_v4  ;;  %v4117_v32 = vmul.f32 %v7981_v25, %v4045_v62  ;;  %v4196_v4 = vunpack.c.h.bf16 %v5301_v26 }
 0x3f1   : > { %v4221_v17 = vadd.f32 %v4189_v0, %v4157_v54  ;;  %v4158_v29 = vadd.f32 %v7986_v35, %v4119_v56 }
 0x3f2   : > { %v4219_v40 = vadd.f32 %v4187_v8, %v4155_v16  ;;  %v4156_v53 = vadd.f32 %v7986_v35, %v4117_v32 }
 0x3f3   : > { %v4253_v27 = vmax.f32 %v4221_v17, 0.0  ;;  %v4222_v61 = vadd.f32 %v4190_v28, %v4158_v29 }
 0x3f4   : > { %v4251_v48 = vmax.f32 %v4219_v40, 0.0  ;;  %v4220_v14 = vadd.f32 %v4188_v52, %v4156_v53  ;;  %v5224_v11 = vpop.f32.mrb[172].mxu1 }
 0x3f5   : > { %4285 = vst.msk [vmem:[%s8001_s25 + $0xb0] sm:$0xff] %vm1005_vm0, %v4253_v27  ;;  %v4254_v5 = vmax.f32 %v4222_v61, 0.0  ;;  %v4122_v50 = vmul.f32 %v5224_v11, %v7981_v25  ;;  %v4058_v37 = vpop.f32.mrb[173].mxu1 }
 0x3f6   : > { %4283 = vst.msk [vmem:[%s8001_s25 + $0xa0] sm:$0xff] %vm1005_vm0, %v4251_v48  ;;  %v4252_v49 = vmax.f32 %v4220_v14, 0.0  ;;  %v4120_v24 = vmul.f32 %v7981_v25, %v4058_v37  ;;  %v5225_v58 = vpop.f32.mrb[174].mxu1 }
 0x3f7   : > { %4286 = vst.msk [vmem:[%s8001_s25 + $0xb8] sm:$0xff] %vm1005_vm0, %v4254_v5  ;;  %v4161_v30 = vadd.f32 %v7986_v35, %v4122_v50  ;;  %v4123_v13 = vmul.f32 %v5225_v58, %v7981_v25  ;;  %v4061_v20 = vpop.f32.mrb[175].mxu1 }
 0x3f8   : > { %4284 = vst.msk [vmem:[%s8001_s25 + $0xa8] sm:$0xff] %vm1005_vm0, %v4252_v49  ;;  %v4159_v57 = vadd.f32 %v7986_v35, %v4120_v24  ;;  %v4121_v3 = vmul.f32 %v7981_v25, %v4061_v20 }
 0x3f9   : > { %v4225_v7 = vadd.f32 %v4193_v43, %v4161_v30  ;;  %v4162_v23 = vadd.f32 %v7986_v35, %v4123_v13 }
 0x3fa   : > { %v4223_v21 = vadd.f32 %v4191_v34, %v4159_v57  ;;  %v4160_v36 = vadd.f32 %v7986_v35, %v4121_v3 }
 0x3fb   : > { %v4257_v47 = vmax.f32 %v4225_v7, 0.0  ;;  %v4226_v51 = vadd.f32 %v4194_v41, %v4162_v23 }
 0x3fc   : > { %v4255_v1 = vmax.f32 %v4223_v21, 0.0  ;;  %v4224_v6 = vadd.f32 %v4192_v38, %v4160_v36  ;;  %v5228_v44 = vpop.f32.mrb[176].mxu1 }
 0x3fd   : > { %4289 = vst.msk [vmem:[%s8001_s25 + $0xd0] sm:$0xff] %vm1005_vm0, %v4257_v47  ;;  %v4258_v33 = vmax.f32 %v4226_v51, 0.0  ;;  %v4126_v42 = vmul.f32 %v5228_v44, %v7981_v25  ;;  %v4074_v59 = vpop.f32.mrb[177].mxu1 }
 0x3fe   : > { %4287 = vst.msk [vmem:[%s8001_s25 + $0xc0] sm:$0xff] %vm1005_vm0, %v4255_v1  ;;  %v4256_v22 = vmax.f32 %v4224_v6, 0.0  ;;  %v4124_v15 = vmul.f32 %v7981_v25, %v4074_v59  ;;  %v5229_v55 = vpop.f32.mrb[178].mxu1 }
 0x3ff   : > { %4290 = vst.msk [vmem:[%s8001_s25 + $0xd8] sm:$0xff] %vm1005_vm0, %v4258_v33  ;;  %v4165_v63 = vadd.f32 %v7986_v35, %v4126_v42  ;;  %v4127_v31 = vmul.f32 %v5229_v55, %v7981_v25  ;;  %v4077_v0 = vpop.f32.mrb[179].mxu1 }
 0x400   : > { %4288 = vst.msk [vmem:[%s8001_s25 + $0xc8] sm:$0xff] %vm1005_vm0, %v4256_v22  ;;  %v4163_v60 = vadd.f32 %v7986_v35, %v4124_v15  ;;  %v4125_v12 = vmul.f32 %v7981_v25, %v4077_v0 }
 0x401   : > { %v4229_v46 = vadd.f32 %v4197_v9, %v4165_v63  ;;  %v4166_v8 = vadd.f32 %v7986_v35, %v4127_v31 }
 0x402   : > { %v4227_v19 = vadd.f32 %v4195_v10, %v4163_v60  ;;  %v4164_v54 = vadd.f32 %v7986_v35, %v4125_v12 }
 0x403   : > { %v4261_v56 = vmax.f32 %v4229_v46, 0.0  ;;  %v4230_v28 = vadd.f32 %v4198_v39, %v4166_v8 }
 0x404   : > { %v4259_v62 = vmax.f32 %v4227_v19, 0.0  ;;  %v4228_v16 = vadd.f32 %v4196_v4, %v4164_v54 }
 0x405   : > { %4293 = vst.msk [vmem:[%s8001_s25 + $0xf0] sm:$0xff] %vm1005_vm0, %v4261_v56  ;;  %v4262_v32 = vmax.f32 %v4230_v28, 0.0 }
 0x406   : > { %4291 = vst.msk [vmem:[%s8001_s25 + $0xe0] sm:$0xff] %vm1005_vm0, %v4259_v62  ;;  %v4260_v52 = vmax.f32 %v4228_v16, 0.0 }
 0x407   : > { %4294 = vst.msk [vmem:[%s8001_s25 + $0xf8] sm:$0xff] %vm1005_vm0, %v4262_v32 }
 0x408   : > { %4292 = vst.msk [vmem:[%s8001_s25 + $0xe8] sm:$0xff] %vm1005_vm0, %v4260_v52 }
 0x409 PF: > { %s20_s13 = sadd.s32 1, %s5308_s13  }
 0x40a   : > { %p17_p4 = scmp.ge.s32.totalorder %s20_s13, 4  }
 0x40c   :  { %19 = sbr.rel (!%p17_p4) target bundleno = 1 (0x1), region = 98 }

</bundles_post_ra>
